<compile_context>
chip_gen: v5e
topology: v5e:2x2
jax: 0.10.0
libtpu: 0.0.40
codegen_flags: <defaults>
</compile_context>

<pallas_src>
import functools

import jax
import jax.numpy as jnp
from jax import lax
from jax.experimental import pallas as pl
from jax.experimental.pallas import tpu as pltpu

BN_EPS = 1e-5
_TAPS = tuple((ky, kx) for ky in range(3) for kx in range(3))


def _vmem_limit_bytes():
    """Scoped-VMEM request derived from the actual part (64 MiB v7x, 128 MiB v5e/v6e)."""
    cap = 64 * 1024 * 1024  # conservative fallback (v7x per-TC VMEM)
    try:
        info = pltpu.get_tpu_info()
        cap = int(getattr(info, "vmem_capacity_bytes", cap)) or cap
    except Exception:
        pass
    return int(min(cap * 3 // 4, 96 * 1024 * 1024))


# ----------------------------------------------------------------------------
# Kernels
# ----------------------------------------------------------------------------
def _conv_taps(xi, w_ref, H, W, Cin, Cout):
    """In-VMEM tap formation + 9 accumulating MXU matmuls.

    xi:    (H+2, W+2, Cin) bf16 value (padded image, loaded once)
    w_ref: (9, Cin, Cout)  bf16 ref   (tap t = 3*ky + kx)
    returns (H*W, Cout) f32 conv accumulator.
    """
    acc = jnp.zeros((H * W, Cout), jnp.float32)
    for t, (ky, kx) in enumerate(_TAPS):
        tap = xi[ky:ky + H, kx:kx + W, :].reshape(H * W, Cin)
        acc = acc + jnp.dot(tap, w_ref[t], preferred_element_type=jnp.float32)
    return acc


def _fused_conv_bn_kernel(inv_m, x_ref, w_ref, g_ref, b_ref, o_ref, sum_sc, ssq_sc):
    """Pipelined fused path: grid over images, (N,H,W,Cout) output VMEM-resident."""
    i = pl.program_id(0)
    _, Hp2, Wp2, Cin = x_ref.shape
    H, W = Hp2 - 2, Wp2 - 2
    Cout = o_ref.shape[-1]

    @pl.when(i == 0)
    def _init():
        sum_sc[...] = jnp.zeros_like(sum_sc)
        ssq_sc[...] = jnp.zeros_like(ssq_sc)

    acc = _conv_taps(x_ref[0], w_ref, H, W, Cin, Cout)            # (H*W, Cout) f32
    o_ref[i] = acc.reshape(H, W, Cout)
    sum_sc[...] += jnp.sum(acc, axis=0, keepdims=True)            # (1, Cout)
    ssq_sc[...] += jnp.sum(acc * acc, axis=0, keepdims=True)

    @pl.when(i == pl.num_programs(0) - 1)
    def _finalize():
        mean = sum_sc[...] * inv_m                                # (1, Cout)
        var = jnp.maximum(ssq_sc[...] * inv_m - mean * mean, 0.0)
        scale = g_ref[...] * lax.rsqrt(var + BN_EPS)              # rsqrt -> EUP
        shift = b_ref[...] - mean * scale
        o_ref[...] = (o_ref[...] * scale.reshape(1, 1, 1, -1)
                      + shift.reshape(1, 1, 1, -1))


def _conv_stats_kernel(x_ref, w_ref, conv_ref, sum_ref, ssq_ref):
    """Tiled phase 1 (megacore-parallel): per-image conv + per-image partial stats."""
    _, Hp2, Wp2, Cin = x_ref.shape
    H, W = Hp2 - 2, Wp2 - 2
    Cout = conv_ref.shape[-1]
    acc = _conv_taps(x_ref[0], w_ref, H, W, Cin, Cout)
    conv_ref[0] = acc.reshape(H, W, Cout)
    sum_ref[...] = jnp.sum(acc, axis=0).reshape(1, 1, Cout)
    ssq_ref[...] = jnp.sum(acc * acc, axis=0).reshape(1, 1, Cout)


def _bn_apply_kernel(conv_ref, scale_ref, shift_ref, o_ref):
    """Tiled phase 2: fused scale/shift FMA, written in place over the conv intermediate."""
    scale = scale_ref[...].reshape(1, 1, 1, -1)
    shift = shift_ref[...].reshape(1, 1, 1, -1)
    o_ref[...] = conv_ref[...] * scale + shift


# ----------------------------------------------------------------------------
# Wrapper
# ----------------------------------------------------------------------------
def conv_block_no_relu(x_nchw, weight_hwio, bias, gamma, beta, *,
                       compute_dtype=jnp.bfloat16, force_tiled=False):
    """x_nchw: (N, Cin, H, W). weight_hwio: (3, 3, Cin, Cout). Returns (N, Cout, H, W) f32."""
    del bias  # exactly cancelled by training-mode BatchNorm's batch-mean subtraction
    # TODO(synk): eval-mode BN (running stats) would need the conv bias folded into
    # `shift` and running_mean/var used; running-stat buffer updates are not emitted.
    N, Cin, H, W = x_nchw.shape
    Cout = weight_hwio.shape[-1]
    M = N * H * W
    inv_m = 1.0 / float(M)

    # One spatial zero-pad + NHWC relayout of x (1x traffic, no im2col); bf16 MXU inputs.
    x_nhwc = jnp.transpose(x_nchw.astype(jnp.float32), (0, 2, 3, 1))
    x_pad = jnp.pad(x_nhwc, ((0, 0), (1, 1), (1, 1), (0, 0))).astype(compute_dtype)
    w_taps = weight_hwio.astype(compute_dtype).reshape(9, Cin, Cout)   # tap t = 3*ky + kx
    g2 = gamma.astype(jnp.float32).reshape(1, Cout)
    b2 = beta.astype(jnp.float32).reshape(1, Cout)

    csize = jnp.dtype(compute_dtype).itemsize
    vmem_limit = _vmem_limit_bytes()
    x_blk = (H + 2) * (W + 2) * Cin * csize
    w_blk = 9 * Cin * Cout * csize
    conv_blk = H * W * Cout * 4
    tap_tmp = H * W * (Cin + Cout) * 4            # in-kernel tap copy + f32 accumulator
    fused_bytes = N * conv_blk + 2 * x_blk + 2 * w_blk + tap_tmp
    use_fused = (not force_tiled) and fused_bytes <= vmem_limit // 2

    def cparams(sem):
        return pltpu.CompilerParams(dimension_semantics=sem,
                                    vmem_limit_bytes=vmem_limit)

    x_spec = pl.BlockSpec((1, H + 2, W + 2, Cin), lambda i: (i, 0, 0, 0))
    w_spec = pl.BlockSpec((9, Cin, Cout), lambda i: (0, 0, 0))
    conv_spec = pl.BlockSpec((1, H, W, Cout), lambda i: (i, 0, 0, 0))
    vec_spec = pl.BlockSpec((1, Cout), lambda i: (0, 0))
    stat_spec = pl.BlockSpec((1, 1, Cout), lambda i: (i, 0, 0))

    if use_fused:
        # Fused, pipelined: output resident in VMEM across the grid; stats in scratch;
        # fused scale/shift applied on the last grid step (no conv HBM round-trip).
        out_nhwc = pl.pallas_call(
            functools.partial(_fused_conv_bn_kernel, inv_m),
            out_shape=jax.ShapeDtypeStruct((N, H, W, Cout), jnp.float32),
            grid=(N,),
            in_specs=[x_spec, w_spec, vec_spec, vec_spec],
            out_specs=pl.BlockSpec((N, H, W, Cout), lambda i: (0, 0, 0, 0)),
            scratch_shapes=[pltpu.VMEM((1, Cout), jnp.float32),
                            pltpu.VMEM((1, Cout), jnp.float32)],
            compiler_params=cparams(("arbitrary",)),   # resident output => arbitrary
        )(x_pad, w_taps, g2, b2)
    else:
        # ---- phase 1: per-image conv + per-image partial BN stats ("parallel") ----
        # TODO(synk): very large single images / channel counts would additionally need
        # H-row (halo) and K/Cout tiling to bound the per-step VMEM block.
        conv_t, psum, pssq = pl.pallas_call(
            _conv_stats_kernel,
            out_shape=(jax.ShapeDtypeStruct((N, H, W, Cout), jnp.float32),
                       jax.ShapeDtypeStruct((N, 1, Cout), jnp.float32),
                       jax.ShapeDtypeStruct((N, 1, Cout), jnp.float32)),
            grid=(N,),
            in_specs=[x_spec, w_spec],
            out_specs=(conv_spec, stat_spec, stat_spec),
            compiler_params=cparams(("parallel",)),
        )(x_pad, w_taps)

        # Tiny (N, Cout) partial-stat reduction + scale/shift precompute (wrapper side).
        mean = jnp.sum(psum[:, 0, :], axis=0) * inv_m                     # (Cout,)
        var = jnp.maximum(jnp.sum(pssq[:, 0, :], axis=0) * inv_m - mean * mean, 0.0)
        scale1 = gamma.astype(jnp.float32) * lax.rsqrt(var + BN_EPS)
        shift1 = beta.astype(jnp.float32) - mean * scale1

        # ---- phase 2: fused FMA, in place over conv_t (input_output_aliases) ----
        out_nhwc = pl.pallas_call(
            _bn_apply_kernel,
            out_shape=jax.ShapeDtypeStruct((N, H, W, Cout), jnp.float32),
            grid=(N,),
            in_specs=[conv_spec, vec_spec, vec_spec],
            out_specs=conv_spec,
            input_output_aliases={0: 0},
            compiler_params=cparams(("parallel",)),
        )(conv_t, scale1.reshape(1, Cout), shift1.reshape(1, Cout))

    # (N, H, W, Cout) -> (N, Cout, H, W) to match the PyTorch module's convention.
    return jnp.transpose(out_nhwc, (0, 3, 1, 2))


# ----------------------------------------------------------------------------
# Pure-JAX reference (conv + bias + training-mode BN) for validation
# ----------------------------------------------------------------------------
def reference(x_nchw, weight_hwio, bias, gamma, beta):
    x_nhwc = jnp.transpose(x_nchw, (0, 2, 3, 1))
    conv = lax.conv_general_dilated(
        x_nhwc, weight_hwio, window_strides=(1, 1), padding=((1, 1), (1, 1)),
        dimension_numbers=("NHWC", "HWIO", "NHWC"))
    conv = conv + bias.reshape(1, 1, 1, -1)
    mean = jnp.mean(conv, axis=(0, 1, 2), keepdims=True)
    var = jnp.mean((conv - mean) ** 2, axis=(0, 1, 2), keepdims=True)   # biased variance
    out = (conv - mean) * lax.rsqrt(var + BN_EPS)
    out = out * gamma.reshape(1, 1, 1, -1) + beta.reshape(1, 1, 1, -1)
    return jnp.transpose(out, (0, 3, 1, 2))


if __name__ == "__main__":
    # ConvBlockNoRelu(in_channels=4, out_channels=8) at a small shape.
    N, Cin, Cout, H, W = 2, 4, 8, 16, 16

    key = jax.random.PRNGKey(0)
    k_x, k_w, k_b, k_g, k_be = jax.random.split(key, 5)

    x = jax.random.normal(k_x, (N, Cin, H, W), dtype=jnp.float32)
    fan_in = Cin * 9
    bound = 1.0 / (fan_in ** 0.5)
    weight_hwio = jax.random.uniform(k_w, (3, 3, Cin, Cout), jnp.float32, -bound, bound)
    bias = jax.random.uniform(k_b, (Cout,), jnp.float32, -bound, bound)
    gamma = 1.0 + 0.1 * jax.random.normal(k_g, (Cout,), jnp.float32)
    beta = 0.1 * jax.random.normal(k_be, (Cout,), jnp.float32)

    # f32 reference, plus the same reference on bf16-rounded inputs (isolates the
    # intentional bf16 MXU-input rounding from any kernel error).
    ref_f32 = jax.block_until_ready(reference(x, weight_hwio, bias, gamma, beta))
    x_r = x.astype(jnp.bfloat16).astype(jnp.float32)
    w_r = weight_hwio.astype(jnp.bfloat16).astype(jnp.float32)
    ref_bf = jax.block_until_ready(reference(x_r, w_r, bias, gamma, beta))

    # Fused pipelined path (auto-selected at this size).
    out_fused = jax.block_until_ready(
        conv_block_no_relu(x, weight_hwio, bias, gamma, beta))
    assert out_fused.shape == (N, Cout, H, W)
    assert float(jnp.max(jnp.abs(out_fused - ref_bf))) < 1e-3, "fused path mismatch"
    assert float(jnp.max(jnp.abs(out_fused - ref_f32))) < 1e-1, "fused path far from f32 ref"

    # Two-phase tiled path (what runs at large activation sizes) — exercised explicitly.
    out_tiled = jax.block_until_ready(
        conv_block_no_relu(x, weight_hwio, bias, gamma, beta, force_tiled=True))
    assert out_tiled.shape == (N, Cout, H, W)
    assert float(jnp.max(jnp.abs(out_tiled - ref_bf))) < 1e-3, "tiled path mismatch"

    print("KERNEL_OK")
</pallas_src>

<mosaic_0001>
module attributes {stable_mosaic.version = 11 : i64} {
  func.func @_fused_conv_bn_kernel(%arg0: i32, %arg1: memref<1x18x18x4xbf16, #tpu.memory_space<vmem>>, %arg2: memref<9x4x8xbf16, #tpu.memory_space<vmem>>, %arg3: memref<1x8xf32, #tpu.memory_space<vmem>>, %arg4: memref<1x8xf32, #tpu.memory_space<vmem>>, %arg5: memref<2x16x16x8xf32, #tpu.memory_space<vmem>>, %arg6: memref<1x8xf32, #tpu.memory_space<vmem>>, %arg7: memref<1x8xf32, #tpu.memory_space<vmem>>) attributes {dimension_semantics = [#tpu.dimension_semantics<arbitrary>], iteration_bounds = array<i64: 2>, scalar_prefetch = 0 : i64, scratch_operands = 2 : i64, tpu.core_type = #tpu.core_type<tc>, window_params = [{transform_indices = @transform_0, window_bounds = array<i64: 1, 18, 18, 4>}, {pipeline_mode = #tpu.pipeline_mode<synchronous>, transform_indices = @transform_1, window_bounds = array<i64: 9, 4, 8>}, {pipeline_mode = #tpu.pipeline_mode<synchronous>, transform_indices = @transform_2, window_bounds = array<i64: 1, 8>}, {pipeline_mode = #tpu.pipeline_mode<synchronous>, transform_indices = @transform_3, window_bounds = array<i64: 1, 8>}, {pipeline_mode = #tpu.pipeline_mode<synchronous>, transform_indices = @transform_4, window_bounds = array<i64: 2, 16, 16, 8>}]} {
    %c0_i32 = arith.constant 0 : i32
    %0 = arith.cmpi eq, %arg0, %c0_i32 : i32
    %1 = arith.extui %0 : i1 to i32
    %c0_i32_0 = arith.constant 0 : i32
    %2 = arith.cmpi ne, %1, %c0_i32_0 : i32
    scf.if %2 {
      %cst_46 = arith.constant 0.000000e+00 : f32
      %79 = vector.broadcast %cst_46 : f32 to vector<1x8xf32>
      %c0_47 = arith.constant 0 : index
      %c0_48 = arith.constant 0 : index
      %80 = vector.load %arg6[%c0_47, %c0_48] : memref<1x8xf32, #tpu.memory_space<vmem>>, vector<1x8xf32>
      tpu.vector_store %arg6[%c0_47, %c0_48], %79 {strides = array<i32>} : memref<1x8xf32, #tpu.memory_space<vmem>>, vector<1x8xf32>,
      %cst_49 = arith.constant 0.000000e+00 : f32
      %81 = vector.broadcast %cst_49 : f32 to vector<1x8xf32>
      %c0_50 = arith.constant 0 : index
      %c0_51 = arith.constant 0 : index
      %82 = vector.load %arg7[%c0_50, %c0_51] : memref<1x8xf32, #tpu.memory_space<vmem>>, vector<1x8xf32>
      tpu.vector_store %arg7[%c0_50, %c0_51], %81 {strides = array<i32>} : memref<1x8xf32, #tpu.memory_space<vmem>>, vector<1x8xf32>,
    } else {
    }
    %c0 = arith.constant 0 : index
    %c0_1 = arith.constant 0 : index
    %c0_2 = arith.constant 0 : index
    %c0_3 = arith.constant 0 : index
    %3 = vector.load %arg1[%c0, %c0_1, %c0_2, %c0_3] : memref<1x18x18x4xbf16, #tpu.memory_space<vmem>>, vector<1x18x18x4xbf16>
    %4 = vector.shape_cast %3 : vector<1x18x18x4xbf16> to vector<18x18x4xbf16>
    %cst = arith.constant 0.000000e+00 : f32
    %5 = vector.broadcast %cst : f32 to vector<256x8xf32>
    %6 = vector.extract_strided_slice %4 {offsets = [0, 0, 0], sizes = [16, 16, 4], strides = [1, 1, 1]} : vector<18x18x4xbf16> to vector<16x16x4xbf16>
    %7 = vector.shape_cast %6 : vector<16x16x4xbf16> to vector<256x4xbf16>
    %c0_4 = arith.constant 0 : index
    %c0_5 = arith.constant 0 : index
    %c0_6 = arith.constant 0 : index
    %8 = vector.load %arg2[%c0_4, %c0_5, %c0_6] : memref<9x4x8xbf16, #tpu.memory_space<vmem>>, vector<1x4x8xbf16>
    %9 = vector.shape_cast %8 : vector<1x4x8xbf16> to vector<4x8xbf16>
    %cst_7 = arith.constant dense<0.000000e+00> : vector<256x8xf32>
    %10 = tpu.matmul %7, %9, %cst_7 {dimension_numbers = #tpu.dot_dimension_numbers<[1], [0], [0], [1], [0, 0, 1, 1], [], []>} : vector<256x4xbf16>, vector<4x8xbf16>, vector<256x8xf32> -> vector<256x8xf32>
    %11 = arith.addf %5, %10 : vector<256x8xf32>
    %12 = vector.extract_strided_slice %4 {offsets = [0, 1, 0], sizes = [16, 16, 4], strides = [1, 1, 1]} : vector<18x18x4xbf16> to vector<16x16x4xbf16>
    %13 = vector.shape_cast %12 : vector<16x16x4xbf16> to vector<256x4xbf16>
    %c1 = arith.constant 1 : index
    %c0_8 = arith.constant 0 : index
    %c0_9 = arith.constant 0 : index
    %14 = vector.load %arg2[%c1, %c0_8, %c0_9] : memref<9x4x8xbf16, #tpu.memory_space<vmem>>, vector<1x4x8xbf16>
    %15 = vector.shape_cast %14 : vector<1x4x8xbf16> to vector<4x8xbf16>
    %cst_10 = arith.constant dense<0.000000e+00> : vector<256x8xf32>
    %16 = tpu.matmul %13, %15, %cst_10 {dimension_numbers = #tpu.dot_dimension_numbers<[1], [0], [0], [1], [0, 0, 1, 1], [], []>} : vector<256x4xbf16>, vector<4x8xbf16>, vector<256x8xf32> -> vector<256x8xf32>
    %17 = arith.addf %11, %16 : vector<256x8xf32>
    %18 = vector.extract_strided_slice %4 {offsets = [0, 2, 0], sizes = [16, 16, 4], strides = [1, 1, 1]} : vector<18x18x4xbf16> to vector<16x16x4xbf16>
    %19 = vector.shape_cast %18 : vector<16x16x4xbf16> to vector<256x4xbf16>
    %c2 = arith.constant 2 : index
    %c0_11 = arith.constant 0 : index
    %c0_12 = arith.constant 0 : index
    %20 = vector.load %arg2[%c2, %c0_11, %c0_12] : memref<9x4x8xbf16, #tpu.memory_space<vmem>>, vector<1x4x8xbf16>
    %21 = vector.shape_cast %20 : vector<1x4x8xbf16> to vector<4x8xbf16>
    %cst_13 = arith.constant dense<0.000000e+00> : vector<256x8xf32>
    %22 = tpu.matmul %19, %21, %cst_13 {dimension_numbers = #tpu.dot_dimension_numbers<[1], [0], [0], [1], [0, 0, 1, 1], [], []>} : vector<256x4xbf16>, vector<4x8xbf16>, vector<256x8xf32> -> vector<256x8xf32>
    %23 = arith.addf %17, %22 : vector<256x8xf32>
    %24 = vector.extract_strided_slice %4 {offsets = [1, 0, 0], sizes = [16, 16, 4], strides = [1, 1, 1]} : vector<18x18x4xbf16> to vector<16x16x4xbf16>
    %25 = vector.shape_cast %24 : vector<16x16x4xbf16> to vector<256x4xbf16>
    %c3 = arith.constant 3 : index
    %c0_14 = arith.constant 0 : index
    %c0_15 = arith.constant 0 : index
    %26 = vector.load %arg2[%c3, %c0_14, %c0_15] : memref<9x4x8xbf16, #tpu.memory_space<vmem>>, vector<1x4x8xbf16>
    %27 = vector.shape_cast %26 : vector<1x4x8xbf16> to vector<4x8xbf16>
    %cst_16 = arith.constant dense<0.000000e+00> : vector<256x8xf32>
    %28 = tpu.matmul %25, %27, %cst_16 {dimension_numbers = #tpu.dot_dimension_numbers<[1], [0], [0], [1], [0, 0, 1, 1], [], []>} : vector<256x4xbf16>, vector<4x8xbf16>, vector<256x8xf32> -> vector<256x8xf32>
    %29 = arith.addf %23, %28 : vector<256x8xf32>
    %30 = vector.extract_strided_slice %4 {offsets = [1, 1, 0], sizes = [16, 16, 4], strides = [1, 1, 1]} : vector<18x18x4xbf16> to vector<16x16x4xbf16>
    %31 = vector.shape_cast %30 : vector<16x16x4xbf16> to vector<256x4xbf16>
    %c4 = arith.constant 4 : index
    %c0_17 = arith.constant 0 : index
    %c0_18 = arith.constant 0 : index
    %32 = vector.load %arg2[%c4, %c0_17, %c0_18] : memref<9x4x8xbf16, #tpu.memory_space<vmem>>, vector<1x4x8xbf16>
    %33 = vector.shape_cast %32 : vector<1x4x8xbf16> to vector<4x8xbf16>
    %cst_19 = arith.constant dense<0.000000e+00> : vector<256x8xf32>
    %34 = tpu.matmul %31, %33, %cst_19 {dimension_numbers = #tpu.dot_dimension_numbers<[1], [0], [0], [1], [0, 0, 1, 1], [], []>} : vector<256x4xbf16>, vector<4x8xbf16>, vector<256x8xf32> -> vector<256x8xf32>
    %35 = arith.addf %29, %34 : vector<256x8xf32>
    %36 = vector.extract_strided_slice %4 {offsets = [1, 2, 0], sizes = [16, 16, 4], strides = [1, 1, 1]} : vector<18x18x4xbf16> to vector<16x16x4xbf16>
    %37 = vector.shape_cast %36 : vector<16x16x4xbf16> to vector<256x4xbf16>
    %c5 = arith.constant 5 : index
    %c0_20 = arith.constant 0 : index
    %c0_21 = arith.constant 0 : index
    %38 = vector.load %arg2[%c5, %c0_20, %c0_21] : memref<9x4x8xbf16, #tpu.memory_space<vmem>>, vector<1x4x8xbf16>
    %39 = vector.shape_cast %38 : vector<1x4x8xbf16> to vector<4x8xbf16>
    %cst_22 = arith.constant dense<0.000000e+00> : vector<256x8xf32>
    %40 = tpu.matmul %37, %39, %cst_22 {dimension_numbers = #tpu.dot_dimension_numbers<[1], [0], [0], [1], [0, 0, 1, 1], [], []>} : vector<256x4xbf16>, vector<4x8xbf16>, vector<256x8xf32> -> vector<256x8xf32>
    %41 = arith.addf %35, %40 : vector<256x8xf32>
    %42 = vector.extract_strided_slice %4 {offsets = [2, 0, 0], sizes = [16, 16, 4], strides = [1, 1, 1]} : vector<18x18x4xbf16> to vector<16x16x4xbf16>
    %43 = vector.shape_cast %42 : vector<16x16x4xbf16> to vector<256x4xbf16>
    %c6 = arith.constant 6 : index
    %c0_23 = arith.constant 0 : index
    %c0_24 = arith.constant 0 : index
    %44 = vector.load %arg2[%c6, %c0_23, %c0_24] : memref<9x4x8xbf16, #tpu.memory_space<vmem>>, vector<1x4x8xbf16>
    %45 = vector.shape_cast %44 : vector<1x4x8xbf16> to vector<4x8xbf16>
    %cst_25 = arith.constant dense<0.000000e+00> : vector<256x8xf32>
    %46 = tpu.matmul %43, %45, %cst_25 {dimension_numbers = #tpu.dot_dimension_numbers<[1], [0], [0], [1], [0, 0, 1, 1], [], []>} : vector<256x4xbf16>, vector<4x8xbf16>, vector<256x8xf32> -> vector<256x8xf32>
    %47 = arith.addf %41, %46 : vector<256x8xf32>
    %48 = vector.extract_strided_slice %4 {offsets = [2, 1, 0], sizes = [16, 16, 4], strides = [1, 1, 1]} : vector<18x18x4xbf16> to vector<16x16x4xbf16>
    %49 = vector.shape_cast %48 : vector<16x16x4xbf16> to vector<256x4xbf16>
    %c7 = arith.constant 7 : index
    %c0_26 = arith.constant 0 : index
    %c0_27 = arith.constant 0 : index
    %50 = vector.load %arg2[%c7, %c0_26, %c0_27] : memref<9x4x8xbf16, #tpu.memory_space<vmem>>, vector<1x4x8xbf16>
    %51 = vector.shape_cast %50 : vector<1x4x8xbf16> to vector<4x8xbf16>
    %cst_28 = arith.constant dense<0.000000e+00> : vector<256x8xf32>
    %52 = tpu.matmul %49, %51, %cst_28 {dimension_numbers = #tpu.dot_dimension_numbers<[1], [0], [0], [1], [0, 0, 1, 1], [], []>} : vector<256x4xbf16>, vector<4x8xbf16>, vector<256x8xf32> -> vector<256x8xf32>
    %53 = arith.addf %47, %52 : vector<256x8xf32>
    %54 = vector.extract_strided_slice %4 {offsets = [2, 2, 0], sizes = [16, 16, 4], strides = [1, 1, 1]} : vector<18x18x4xbf16> to vector<16x16x4xbf16>
    %55 = vector.shape_cast %54 : vector<16x16x4xbf16> to vector<256x4xbf16>
    %c8 = arith.constant 8 : index
    %c0_29 = arith.constant 0 : index
    %c0_30 = arith.constant 0 : index
    %56 = vector.load %arg2[%c8, %c0_29, %c0_30] : memref<9x4x8xbf16, #tpu.memory_space<vmem>>, vector<1x4x8xbf16>
    %57 = vector.shape_cast %56 : vector<1x4x8xbf16> to vector<4x8xbf16>
    %cst_31 = arith.constant dense<0.000000e+00> : vector<256x8xf32>
    %58 = tpu.matmul %55, %57, %cst_31 {dimension_numbers = #tpu.dot_dimension_numbers<[1], [0], [0], [1], [0, 0, 1, 1], [], []>} : vector<256x4xbf16>, vector<4x8xbf16>, vector<256x8xf32> -> vector<256x8xf32>
    %59 = arith.addf %53, %58 : vector<256x8xf32>
    %60 = vector.shape_cast %59 : vector<256x8xf32> to vector<16x16x8xf32>
    %61 = arith.index_cast %arg0 : i32 to index
    %c0_32 = arith.constant 0 : index
    %c0_33 = arith.constant 0 : index
    %c0_34 = arith.constant 0 : index
    %62 = vector.load %arg5[%61, %c0_32, %c0_33, %c0_34] : memref<2x16x16x8xf32, #tpu.memory_space<vmem>>, vector<1x16x16x8xf32>
    %63 = vector.shape_cast %62 : vector<1x16x16x8xf32> to vector<16x16x8xf32>
    %64 = vector.shape_cast %60 : vector<16x16x8xf32> to vector<1x16x16x8xf32>
    tpu.vector_store %arg5[%61, %c0_32, %c0_33, %c0_34], %64 {strides = array<i32>} : memref<2x16x16x8xf32, #tpu.memory_space<vmem>>, vector<1x16x16x8xf32>,
    %c0_35 = arith.constant 0 : index
    %c0_36 = arith.constant 0 : index
    %65 = vector.load %arg6[%c0_35, %c0_36] : memref<1x8xf32, #tpu.memory_space<vmem>>, vector<1x8xf32>
    %cst_37 = arith.constant dense<0.000000e+00> : vector<8xf32>
    %66 = vector.multi_reduction <add>, %59, %cst_37 [0] : vector<256x8xf32> to vector<8xf32>
    %67 = vector.shape_cast %66 : vector<8xf32> to vector<1x8xf32>
    %68 = arith.addf %65, %67 : vector<1x8xf32>
    %c0_38 = arith.constant 0 : index
    %c0_39 = arith.constant 0 : index
    %69 = vector.load %arg6[%c0_38, %c0_39] : memref<1x8xf32, #tpu.memory_space<vmem>>, vector<1x8xf32>
    tpu.vector_store %arg6[%c0_38, %c0_39], %68 {strides = array<i32>} : memref<1x8xf32, #tpu.memory_space<vmem>>, vector<1x8xf32>,
    %c0_40 = arith.constant 0 : index
    %c0_41 = arith.constant 0 : index
    %70 = vector.load %arg7[%c0_40, %c0_41] : memref<1x8xf32, #tpu.memory_space<vmem>>, vector<1x8xf32>
    %71 = arith.mulf %59, %59 : vector<256x8xf32>
    %cst_42 = arith.constant dense<0.000000e+00> : vector<8xf32>
    %72 = vector.multi_reduction <add>, %71, %cst_42 [0] : vector<256x8xf32> to vector<8xf32>
    %73 = vector.shape_cast %72 : vector<8xf32> to vector<1x8xf32>
    %74 = arith.addf %70, %73 : vector<1x8xf32>
    %c0_43 = arith.constant 0 : index
    %c0_44 = arith.constant 0 : index
    %75 = vector.load %arg7[%c0_43, %c0_44] : memref<1x8xf32, #tpu.memory_space<vmem>>, vector<1x8xf32>
    tpu.vector_store %arg7[%c0_43, %c0_44], %74 {strides = array<i32>} : memref<1x8xf32, #tpu.memory_space<vmem>>, vector<1x8xf32>,
    %c1_i32 = arith.constant 1 : i32
    %76 = arith.cmpi eq, %arg0, %c1_i32 : i32
    %77 = arith.extui %76 : i1 to i32
    %c0_i32_45 = arith.constant 0 : i32
    %78 = arith.cmpi ne, %77, %c0_i32_45 : i32
    scf.if %78 {
      %c0_46 = arith.constant 0 : index
      %c0_47 = arith.constant 0 : index
      %79 = vector.load %arg6[%c0_46, %c0_47] : memref<1x8xf32, #tpu.memory_space<vmem>>, vector<1x8xf32>
      %cst_48 = arith.constant 0.001953125 : f32
      %80 = vector.broadcast %cst_48 : f32 to vector<1x8xf32>
      %81 = arith.mulf %79, %80 : vector<1x8xf32>
      %c0_49 = arith.constant 0 : index
      %c0_50 = arith.constant 0 : index
      %82 = vector.load %arg7[%c0_49, %c0_50] : memref<1x8xf32, #tpu.memory_space<vmem>>, vector<1x8xf32>
      %cst_51 = arith.constant 0.001953125 : f32
      %83 = vector.broadcast %cst_51 : f32 to vector<1x8xf32>
      %84 = arith.mulf %82, %83 : vector<1x8xf32>
      %85 = arith.mulf %81, %81 : vector<1x8xf32>
      %86 = arith.subf %84, %85 : vector<1x8xf32>
      %cst_52 = arith.constant 0.000000e+00 : f32
      %87 = vector.broadcast %cst_52 : f32 to vector<1x8xf32>
      %88 = arith.maximumf %86, %87 : vector<1x8xf32>
      %c0_53 = arith.constant 0 : index
      %c0_54 = arith.constant 0 : index
      %89 = vector.load %arg3[%c0_53, %c0_54] : memref<1x8xf32, #tpu.memory_space<vmem>>, vector<1x8xf32>
      %cst_55 = arith.constant 9.99999974E-6 : f32
      %90 = vector.broadcast %cst_55 : f32 to vector<1x8xf32>
      %91 = arith.addf %88, %90 : vector<1x8xf32>
      %92 = math.rsqrt %91 : vector<1x8xf32>
      %93 = arith.mulf %89, %92 : vector<1x8xf32>
      %c0_56 = arith.constant 0 : index
      %c0_57 = arith.constant 0 : index
      %94 = vector.load %arg4[%c0_56, %c0_57] : memref<1x8xf32, #tpu.memory_space<vmem>>, vector<1x8xf32>
      %95 = arith.mulf %81, %93 : vector<1x8xf32>
      %96 = arith.subf %94, %95 : vector<1x8xf32>
      %c0_58 = arith.constant 0 : index
      %c0_59 = arith.constant 0 : index
      %c0_60 = arith.constant 0 : index
      %c0_61 = arith.constant 0 : index
      %97 = vector.load %arg5[%c0_58, %c0_59, %c0_60, %c0_61] : memref<2x16x16x8xf32, #tpu.memory_space<vmem>>, vector<2x16x16x8xf32>
      %98 = vector.shape_cast %93 : vector<1x8xf32> to vector<1x1x1x8xf32>
      %99 = vector.broadcast %98 : vector<1x1x1x8xf32> to vector<2x16x16x8xf32>
      %100 = arith.mulf %97, %99 : vector<2x16x16x8xf32>
      %101 = vector.shape_cast %96 : vector<1x8xf32> to vector<1x1x1x8xf32>
      %102 = vector.broadcast %101 : vector<1x1x1x8xf32> to vector<2x16x16x8xf32>
      %103 = arith.addf %100, %102 : vector<2x16x16x8xf32>
      %c0_62 = arith.constant 0 : index
      %c0_63 = arith.constant 0 : index
      %c0_64 = arith.constant 0 : index
      %c0_65 = arith.constant 0 : index
      %104 = vector.load %arg5[%c0_62, %c0_63, %c0_64, %c0_65] : memref<2x16x16x8xf32, #tpu.memory_space<vmem>>, vector<2x16x16x8xf32>
      tpu.vector_store %arg5[%c0_62, %c0_63, %c0_64, %c0_65], %103 {strides = array<i32>} : memref<2x16x16x8xf32, #tpu.memory_space<vmem>>, vector<2x16x16x8xf32>,
    } else {
    }
    return
  }
  func.func @transform_0(%arg0: i32) -> (i32, i32, i32, i32) {
    %c0_i32 = arith.constant 0 : i32
    %c0_i32_0 = arith.constant 0 : i32
    %c0_i32_1 = arith.constant 0 : i32
    %c0_i32_2 = arith.constant 0 : i32
    return %arg0, %c0_i32, %c0_i32_0, %c0_i32_1 : i32, i32, i32, i32
  }
  func.func @transform_1(%arg0: i32) -> (i32, i32, i32) {
    %c0_i32 = arith.constant 0 : i32
    %c0_i32_0 = arith.constant 0 : i32
    %c0_i32_1 = arith.constant 0 : i32
    %c0_i32_2 = arith.constant 0 : i32
    return %c0_i32, %c0_i32_0, %c0_i32_1 : i32, i32, i32
  }
  func.func @transform_2(%arg0: i32) -> (i32, i32) {
    %c0_i32 = arith.constant 0 : i32
    %c0_i32_0 = arith.constant 0 : i32
    %c0_i32_1 = arith.constant 0 : i32
    return %c0_i32, %c0_i32_0 : i32, i32
  }
  func.func @transform_3(%arg0: i32) -> (i32, i32) {
    %c0_i32 = arith.constant 0 : i32
    %c0_i32_0 = arith.constant 0 : i32
    %c0_i32_1 = arith.constant 0 : i32
    return %c0_i32, %c0_i32_0 : i32, i32
  }
  func.func @transform_4(%arg0: i32) -> (i32, i32, i32, i32) {
    %c0_i32 = arith.constant 0 : i32
    %c0_i32_0 = arith.constant 0 : i32
    %c0_i32_1 = arith.constant 0 : i32
    %c0_i32_2 = arith.constant 0 : i32
    %c0_i32_3 = arith.constant 0 : i32
    return %c0_i32, %c0_i32_0, %c0_i32_1, %c0_i32_2 : i32, i32, i32, i32
  }
}

</mosaic_0001>

<bundles_post_ra>
// kernel: tpu_custom_call.1
= control target key start
LH: loop header
LB: loop body
LE: loop exit
PB: predicated region body
PF: predicated region fallthrough
CT: control target
= control target key end

     0   :  { %s3117_s15 = smov 0   ;;  %s4901_s0 = inlined_call_operand.vmem [shape: bf16[2,18,18,4], index: 0, kind: input, shape index: {}]   ;;  %s4902_s1 = inlined_call_operand.vmem [shape: bf16[9,4,8], index: 1, kind: input, shape index: {}]   ;;  %s4903_s2 = inlined_call_operand.vmem [shape: f32[1,8], index: 2, kind: input, shape index: {}]   ;;  %s4904_s3 = inlined_call_operand.vmem [shape: f32[1,8], index: 3, kind: input, shape index: {}]   ;;  %s4905_s4 = inlined_call_operand.vmem [shape: f32[2,16,16,8], index: 4, kind: output, shape index: {}]  }
   0x1 LB: > { %s3123_s16 = sadd.s32 4294967295, %s3089_s15   ;;  %p2792_p0 = scmp.ge.s32.totalorder %s3089_s15, 1  ;;  %s3089_s15 = sphi %s3117_s15, %s14_s15  }
   0x2   : > { %p157_p1 = scmp.lt.s32.totalorder %s3089_s15, 3 }
   0x4   : > { %p158_p2 = pnand %p2792_p0, %p157_p1 }
   0x6   : > { %161 = sbr.rel (%p158_p2) target bundleno = 887 (0x377), region = 36 }
   0xb   : > { %p178_p3 = scmp.lt.s32.totalorder %s3123_s16, 1  ;;  %p2794_p4 = scmp.ne.s32.totalorder %s3123_s16, 0 }
   0xd   : > { %s179_s17 = scalar_select %p178_p3, %s3123_s16, 1 }
   0xe   : > { %187 = sbr.rel (%p2794_p4) target bundleno = 22 (0x16), region = 40 }
   0xf   : > { %s3062_s18 = smul.u32 216, %s179_s17 }
  0x11   : > { %s3132_s21 = scalar_lea.vmem %s4901_s0, %s3062_s18 }
  0x13   : > { %vm188_vm0 = vcmask 57344   ;;  %v3091_v0 = vmov 0.0  }
  0x14   : > { %189 = vst.msk [vmem:[#allocation2] sm:$0x1] %vm188_vm0, %v3091_v0 }
  0x15   : > { %190 = vst.msk [vmem:[#allocation3] sm:$0x1] %vm188_vm0, %v3091_v0 }
  0x16 PF: > { %v2795_v1 = vld [vmem:[%s4902_s1 + $0x2] sm:$0x3]  ;;  %vm732_vm1 = vcmask 1041408   ;;  %v3139_v2 = vld [vmem:[%s3132_s21 + $0x30] sm:$0xf]  ;;  %vm683_vm4 = vcmask 31744  }
  0x17   : > { %v734_v3 = vsel %vm732_vm1, %v2795_v1, 0  ;;  %v3143_v4 = vld [vmem:[%s3132_s21 + $0x34] sm:$0xf]  ;;  %v3146_v5 = vld [vmem:[%s3132_s21 + $0x38] sm:$0x1]  ;;  %v346_v6 = vshrl.u32 %v3139_v2, 16 }
  0x18   : > { %3059 = vmatpush.bf16.msra.mxu1 %v734_v3  ;;  %3060 = vmatpush.bf16.msra.mxu2 %v734_v3  ;;  %vm246_vm2 = vsmask.f32 3328  ;;  %vm247_vm3 = vsmask.f32 7440  ;;  %v349_v7 = vshll.u32 %v3139_v2, 16  ;;  %v355_v8 = vshll.u32 %v3143_v4, 16 }
  0x19   : > { %3061 = vmatpush.bf16.msra.mxu3 %v734_v3  ;;  %743 = vmatpush.bf16.msra.mxu0 %v734_v3  ;;  %v348_v9 = vrot.slane %v346_v6, 4  ;;  %v359_v10 = vshrl.u32 %v3143_v4, 16  ;;  %v365_v11 = vshll.u32 %v3146_v5, 16  ;;  %v215_v12 = vld [vmem:[%s3132_s21 + $0x60] sm:$0xf]  ;;  %vm3159_vm5 = vmor %vm246_vm2, %vm247_vm3  ;;  %vm1061_vm6 = vcmask 1042432  }
  0x1a   : > { %v351_v13 = vrot.slane %v349_v7, 5  ;;  %v357_v14 = vrot.slane %v355_v8, 5  ;;  %v216_v15 = vld [vmem:[%s3132_s21 + $0x64] sm:$0xf]  ;;  %v217_v16 = vld [vmem:[%s3132_s21 + $0x68] sm:$0x1] }
  0x1b   : > { %v361_v17 = vrot.slane %v359_v10, 4  ;;  %v442_v18 = vshrl.u32 %v215_v12, 16  ;;  %v445_v19 = vshll.u32 %v215_v12, 16  ;;  %v451_v21 = vshll.u32 %v216_v15, 16  ;;  %v227_v24 = vld [vmem:[%s3132_s21 + $0x90] sm:$0xf] }
  0x1c   : > { %v352_v20 = vor.u32 %v351_v13, %v348_v9  ;;  %v455_v22 = vshrl.u32 %v216_v15, 16  ;;  %v461_v23 = vshll.u32 %v217_v16, 16  ;;  %v367_v27 = vrot.slane %v365_v11, 5  ;;  %v228_v30 = vld [vmem:[%s3132_s21 + $0x94] sm:$0xf]  ;;  %s3037_s14 = sshll.u32 %s3123_s16, 8 }
  0x1d   : > { %v362_v26 = vor.u32 %v361_v17, %v357_v14  ;;  %v444_v28 = vrot.slane %v442_v18, 4  ;;  %v447_v29 = vrot.slane %v445_v19, 5  ;;  %v453_v32 = vrot.slane %v451_v21, 5  ;;  %v229_v41 = vld [vmem:[%s3132_s21 + $0x98] sm:$0x1]  ;;  %s4067_s19 = scalar_lea.vmem %s4905_s4, %s3037_s14  ;;  %p3038_p5 = scmp.ne.s32.totalorder %s3123_s16, 1 }
  0x1e   : > { %v353_v31 = vrot.slane %v352_v20, 4  ;;  %v457_v33 = vrot.slane %v455_v22, 4  ;;  %v463_v34 = vrot.slane %v461_v23, 5  ;;  %v538_v37 = vshrl.u32 %v227_v24, 16  ;;  %v2908_v52 = vld [vmem:[%s4902_s1 + $0x4] sm:$0x3] }
  0x1f   : > { %v363_v35 = vrot.slane %v362_v26, 4  ;;  %v448_v36 = vor.u32 %v447_v29, %v444_v28  ;;  %v541_v38 = vshll.u32 %v227_v24, 16  ;;  %v547_v42 = vshll.u32 %v228_v30, 16  ;;  %v3175_v56 = vld [vmem:[%s3132_s21] sm:$0xf] }
  0x20   : > { %v358_v39 = vsel %vm3159_vm5, %v353_v31, %v357_v14  ;;  %v458_v40 = vor.u32 %v457_v33, %v453_v32  ;;  %v551_v43 = vshrl.u32 %v228_v30, 16  ;;  %v540_v47 = vrot.slane %v538_v37, 4  ;;  %v3178_v57 = vld [vmem:[%s3132_s21 + $0x4] sm:$0xf]  ;;  %v3185_v62 = vld [vmem:[%s3132_s21 + $0x8] sm:$0x1] }
  0x21   : > { %v368_v44 = vsel %vm3159_vm5, %v363_v35, %v367_v27  ;;  %v643_v45 = vunpack.c.l.b16 %v358_v39  ;;  %v449_v46 = vrot.slane %v448_v36, 4  ;;  %v543_v50 = vrot.slane %v541_v38, 5  ;;  %v2925_v6 = vld [vmem:[%s4902_s1 + $0x6] sm:$0x3]  ;;  %v245_v11 = vld [vmem:[%s4902_s1] sm:$0x3] }
  0x22   : > { %v644_v48 = vunpack.c.l.b16 %v368_v44  ;;  %v459_v49 = vrot.slane %v458_v40, 4  ;;  %v549_v51 = vrot.slane %v547_v42, 5  ;;  %v553_v54 = vrot.slane %v551_v43, 4  ;;  %v2946_v16 = vld [vmem:[%s4902_s1 + $0x8] sm:$0x3] }
  0x23   : > { %v454_v53 = vsel %vm3159_vm5, %v449_v46, %v453_v32  ;;  %v557_v55 = vshll.u32 %v229_v41, 16  ;;  %v544_v61 = vor.u32 %v543_v50, %v540_v47  ;;  %v1275_v3 = vsel %vm732_vm1, %v2908_v52, 0  ;;  %v3209_v21 = vld [vmem:[%s3132_s21 + $0x3c] sm:$0xf]  ;;  %v3216_v26 = vld [vmem:[%s3132_s21 + $0x40] sm:$0xf] }
  0x24   : > { %v3180_v58 = vpack.c.b16 %v644_v48, %v643_v45  ;;  %v464_v59 = vsel %vm3159_vm5, %v459_v49, %v463_v34  ;;  %v651_v60 = vunpack.c.l.b16 %v454_v53  ;;  %v554_v0 = vor.u32 %v553_v54, %v549_v51  ;;  %1284 = vmatpush.bf16.msrb.mxu2 %v1275_v3  ;;  %v3220_v31 = vld [vmem:[%s3132_s21 + $0x44] sm:$0x1]  ;;  %v3226_v36 = vld [vmem:[%s3132_s21 + $0x6c] sm:$0xf]  ;;  %v3235_v45 = vld [vmem:[%s3132_s21 + $0x70] sm:$0xf] }
  0x25   : > { %v652_v63 = vunpack.c.l.b16 %v464_v59  ;;  %v559_v1 = vrot.slane %v557_v55, 5  ;;  %v545_v7 = vrot.slane %v544_v61, 4  ;;  %v250_v8 = vshrl.u32 %v3175_v56, 16  ;;  %v3242_v49 = vld [vmem:[%s3132_s21 + $0x74] sm:$0x1] }
  0x26   : > { %2800 = vmatmul.msk.bf16.vlgmr.msra.gmra.mxu1 %vm683_vm4, %v3180_v58  ;;  %v253_v9 = vshll.u32 %v3175_v56, 16  ;;  %v259_v10 = vshll.u32 %v3178_v57, 16  ;;  %v555_v13 = vrot.slane %v554_v0, 4  ;;  %v263_v14 = vshrl.u32 %v3178_v57, 16 }
  0x27   : > { %v3199_v12 = vpack.c.b16 %v652_v63, %v651_v60  ;;  %v269_v15 = vshll.u32 %v3185_v62, 16  ;;  %v550_v17 = vsel %vm3159_vm5, %v545_v7, %v549_v51  ;;  %v252_v18 = vrot.slane %v250_v8, 4 }
  0x28   : > { %v255_v19 = vrot.slane %v253_v9, 5  ;;  %v261_v20 = vrot.slane %v259_v10, 5  ;;  %v560_v22 = vsel %vm3159_vm5, %v555_v13, %v559_v1  ;;  %v659_v23 = vunpack.c.l.b16 %v550_v17  ;;  %v231_v10 = vld [vmem:[%s3132_s21 + $0xa0] sm:$0xf] }
  0x29   : > { %4946 = vst [vmem:[#allocation4_spill] sm:$0xff] %v3199_v12  ;;  %2804 = vmatmul.msk.bf16.vlgmr.msra.gmra.mxu2 %vm683_vm4, %v3199_v12  ;;  %v265_v24 = vrot.slane %v263_v14, 4  ;;  %v660_v27 = vunpack.c.l.b16 %v560_v22  ;;  %v271_v29 = vrot.slane %v269_v15, 5  ;;  %v1409_v30 = vsel %vm732_vm1, %v2925_v6, 0  ;;  %v230_v6 = vld [vmem:[%s3132_s21 + $0x9c] sm:$0xf] }
  0x2a   : > { %v256_v28 = vor.u32 %v255_v19, %v252_v18  ;;  %1418 = vmatpush.bf16.msrb.mxu3 %v1409_v30  ;;  %v954_v33 = vsel %vm732_vm1, %v245_v11, 0  ;;  %v1565_v34 = vsel %vm732_vm1, %v2946_v16, 0  ;;  %v370_v35 = vshrl.u32 %v3209_v21, 16  ;;  %v232_v18 = vld [vmem:[%s3132_s21 + $0xa4] sm:$0x1] }
  0x2b   : > { %v266_v32 = vor.u32 %v265_v24, %v261_v20  ;;  %v3228_v37 = vpack.c.b16 %v660_v27, %v659_v23  ;;  %963 = vmatpush.bf16.msrb.mxu1 %v954_v33  ;;  %1574 = vmatpush.bf16.msrb.mxu0 %v1565_v34  ;;  %v373_v39 = vshll.u32 %v3209_v21, 16  ;;  %v379_v40 = vshll.u32 %v3216_v26, 16 }
  0x2c   : > { %v257_v38 = vrot.slane %v256_v28, 4  ;;  %v372_v42 = vrot.slane %v370_v35, 4  ;;  %v383_v43 = vshrl.u32 %v3216_v26, 16  ;;  %v389_v44 = vshll.u32 %v3220_v31, 16 }
  0x2d   : > { %4947 = vst [vmem:[#allocation5_spill] sm:$0xff] %v3228_v37  ;;  %v267_v41 = vrot.slane %v266_v32, 4  ;;  %2808 = vmatmul.msk.bf16.vlgmr.msra.gmra.mxu3 %vm683_vm4, %v3228_v37  ;;  %v375_v47 = vrot.slane %v373_v39, 5  ;;  %v381_v48 = vrot.slane %v379_v40, 5  ;;  %v466_v50 = vshrl.u32 %v3226_v36, 16 }
  0x2e   : > { %v262_v46 = vsel %vm3159_vm5, %v257_v38, %v261_v20  ;;  %v385_v53 = vrot.slane %v383_v43, 4  ;;  %v391_v54 = vrot.slane %v389_v44, 5  ;;  %v469_v61 = vshll.u32 %v3226_v36, 16  ;;  %v3260_v39 = vld [vmem:[%s3132_s21 + $0xc] sm:$0xf] }
  0x2f   : > { %v272_v51 = vsel %vm3159_vm5, %v267_v41, %v271_v29  ;;  %v635_v52 = vunpack.c.l.b16 %v262_v46  ;;  %v376_v59 = vor.u32 %v375_v47, %v372_v42  ;;  %v468_v60 = vrot.slane %v466_v50, 4  ;;  %v3267_v43 = vld [vmem:[%s3132_s21 + $0x10] sm:$0xf]  ;;  %v3270_v44 = vld [vmem:[%s3132_s21 + $0x14] sm:$0x1] }
  0x30   : > { %v636_v55 = vunpack.c.l.b16 %v272_v51  ;;  %v386_v63 = vor.u32 %v385_v53, %v381_v48  ;;  %v475_v0 = vshll.u32 %v3235_v45, 16  ;;  %v479_v1 = vshrl.u32 %v3235_v45, 16 }
  0x31   : > { %v485_v3 = vshll.u32 %v3242_v49, 16  ;;  %v377_v8 = vrot.slane %v376_v59, 4  ;;  %v471_v9 = vrot.slane %v469_v61, 5  ;;  %v562_v19 = vshrl.u32 %v230_v6, 16 }
  0x32   : > { %v667_v7 = vpack.c.b16 %v636_v55, %v635_v52  ;;  %v387_v11 = vrot.slane %v386_v63, 4  ;;  %v477_v13 = vrot.slane %v475_v0, 5  ;;  %v481_v14 = vrot.slane %v479_v1, 4  ;;  %v3282_v63 = vld [vmem:[%s3132_s21 + $0x48] sm:$0xf] }
  0x33   : > { %v487_v15 = vrot.slane %v485_v3, 5  ;;  %v382_v16 = vsel %vm3159_vm5, %v377_v8, %v381_v48  ;;  %v472_v17 = vor.u32 %v471_v9, %v468_v60  ;;  %v565_v20 = vshll.u32 %v230_v6, 16 }
  0x34   : > { %2796 = vmatmul.msk.bf16.vlgmr.msra.gmra.mxu0 %vm683_vm4, %v667_v7  ;;  %v392_v22 = vsel %vm3159_vm5, %v387_v11, %v391_v54  ;;  %v645_v23 = vunpack.c.l.b16 %v382_v16  ;;  %v482_v24 = vor.u32 %v481_v14, %v477_v13  ;;  %v571_v27 = vshll.u32 %v231_v10, 16  ;;  %v3289_v7 = vld [vmem:[%s3132_s21 + $0x4c] sm:$0xf] }
  0x35   : > { %v646_v28 = vunpack.c.l.b16 %v392_v22  ;;  %v473_v29 = vrot.slane %v472_v17, 4  ;;  %v564_v30 = vrot.slane %v562_v19, 4  ;;  %v567_v32 = vrot.slane %v565_v20, 5 }
  0x36   : > { %v483_v33 = vrot.slane %v482_v24, 4  ;;  %v573_v34 = vrot.slane %v571_v27, 5  ;;  %v575_v35 = vshrl.u32 %v231_v10, 16  ;;  %v581_v38 = vshll.u32 %v232_v18, 16 }
  0x37   : > { %v3262_v40 = vpack.c.b16 %v646_v28, %v645_v23  ;;  %v478_v41 = vsel %vm3159_vm5, %v473_v29, %v477_v13  ;;  %v568_v42 = vor.u32 %v567_v32, %v564_v30  ;;  %v274_v53 = vshrl.u32 %v3260_v39, 16  ;;  %v3303_v23 = vld [vmem:[%s3132_s21 + $0x78] sm:$0xf] }
  0x38   : > { %v488_v46 = vsel %vm3159_vm5, %v483_v33, %v487_v15  ;;  %v653_v47 = vunpack.c.l.b16 %v478_v41  ;;  %v577_v48 = vrot.slane %v575_v35, 4  ;;  %v583_v50 = vrot.slane %v581_v38, 5  ;;  %v3294_v15 = vld [vmem:[%s3132_s21 + $0x50] sm:$0x1] }
  0x39   : > { %2801 = vmatmul.msk.bf16.gmra.mxu1 %vm683_vm4, %v3262_v40  ;;  %v654_v51 = vunpack.c.l.b16 %v488_v46  ;;  %v569_v52 = vrot.slane %v568_v42, 4  ;;  %v277_v54 = vshll.u32 %v3260_v39, 16  ;;  %v283_v59 = vshll.u32 %v3267_v43, 16  ;;  %v3311_v42 = vld [vmem:[%s3132_s21 + $0x7c] sm:$0xf] }
  0x3a   : > { %v578_v55 = vor.u32 %v577_v48, %v573_v34  ;;  %v287_v60 = vshrl.u32 %v3267_v43, 16  ;;  %v293_v61 = vshll.u32 %v3270_v44, 16  ;;  %v276_v3 = vrot.slane %v274_v53, 4  ;;  %v3314_v46 = vld [vmem:[%s3132_s21 + $0x80] sm:$0x1] }
  0x3b   : > { %v3284_v0 = vpack.c.b16 %v654_v51, %v653_v47  ;;  %v574_v1 = vsel %vm3159_vm5, %v569_v52, %v573_v34  ;;  %v279_v6 = vrot.slane %v277_v54, 5  ;;  %v285_v10 = vrot.slane %v283_v59, 5 }
  0x3c   : > { %v579_v8 = vrot.slane %v578_v55, 4  ;;  %v661_v9 = vunpack.c.l.b16 %v574_v1  ;;  %v289_v11 = vrot.slane %v287_v60, 4  ;;  %v295_v14 = vrot.slane %v293_v61, 5 }
  0x3d   : > { %2805 = vmatmul.msk.bf16.gmra.mxu2 %vm683_vm4, %v3284_v0  ;;  %v280_v13 = vor.u32 %v279_v6, %v276_v3  ;;  %v394_v16 = vshrl.u32 %v3282_v63, 16  ;;  %v397_v17 = vshll.u32 %v3282_v63, 16  ;;  %v403_v20 = vshll.u32 %v3289_v7, 16  ;;  %v3326_v6 = vld [vmem:[%s3132_s21 + $0xa8] sm:$0xf] }
  0x3e   : > { %v584_v18 = vsel %vm3159_vm5, %v579_v8, %v583_v50  ;;  %v290_v19 = vor.u32 %v289_v11, %v285_v10  ;;  %v407_v22 = vshrl.u32 %v3289_v7, 16  ;;  %v413_v34 = vshll.u32 %v3294_v15, 16  ;;  %4949 = vst [vmem:[#allocation7_spill] sm:$0xff] %v3326_v6  ;;  %v3333_v11 = vld [vmem:[%s3132_s21 + $0xac] sm:$0xf] }
  0x3f   : > { %v662_v24 = vunpack.c.l.b16 %v584_v18  ;;  %v281_v27 = vrot.slane %v280_v13, 4  ;;  %v396_v28 = vrot.slane %v394_v16, 4  ;;  %v399_v29 = vrot.slane %v397_v17, 5  ;;  %4950 = vst [vmem:[#allocation8_spill] sm:$0xff] %v3333_v11  ;;  %v3338_v18 = vld [vmem:[%s3132_s21 + $0xb0] sm:$0x1] }
  0x40   : > { %v291_v30 = vrot.slane %v290_v19, 4  ;;  %v405_v32 = vrot.slane %v403_v20, 5  ;;  %v409_v33 = vrot.slane %v407_v22, 4  ;;  %v490_v47 = vshrl.u32 %v3303_v23, 16  ;;  %4951 = vst [vmem:[#allocation9_spill] sm:$0xff] %v3338_v18 }
  0x41   : > { %v3306_v35 = vpack.c.b16 %v662_v24, %v661_v9  ;;  %v286_v38 = vsel %vm3159_vm5, %v281_v27, %v285_v10  ;;  %v400_v41 = vor.u32 %v399_v29, %v396_v28  ;;  %v415_v52 = vrot.slane %v413_v34, 5 }
  0x42   : > { %v296_v48 = vsel %vm3159_vm5, %v291_v30, %v295_v14  ;;  %v637_v50 = vunpack.c.l.b16 %v286_v38  ;;  %v410_v51 = vor.u32 %v409_v33, %v405_v32  ;;  %v492_v55 = vrot.slane %v490_v47, 4 }
  0x43   : > { %4948 = vst [vmem:[#allocation6_spill] sm:$0xff] %v3306_v35  ;;  %2809 = vmatmul.msk.bf16.gmra.mxu3 %vm683_vm4, %v3306_v35  ;;  %v638_v53 = vunpack.c.l.b16 %v296_v48  ;;  %v401_v54 = vrot.slane %v400_v41, 4  ;;  %v493_v59 = vshll.u32 %v3303_v23, 16  ;;  %v499_v61 = vshll.u32 %v3311_v42, 16 }
  0x44   : > { %v411_v60 = vrot.slane %v410_v51, 4  ;;  %v503_v1 = vshrl.u32 %v3311_v42, 16  ;;  %v509_v3 = vshll.u32 %v3314_v46, 16  ;;  %v586_v24 = vshrl.u32 %v3326_v6, 16 }
  0x45   : > { %v3328_v8 = vpack.c.b16 %v638_v53, %v637_v50  ;;  %v406_v9 = vsel %vm3159_vm5, %v401_v54, %v405_v32  ;;  %v495_v10 = vrot.slane %v493_v59, 5  ;;  %v501_v16 = vrot.slane %v499_v61, 5  ;;  %v3347_v32 = vld [vmem:[%s3132_s21 + $0x18] sm:$0xf] }
  0x46   : > { %v416_v13 = vsel %vm3159_vm5, %v411_v60, %v415_v52  ;;  %v647_v14 = vunpack.c.l.b16 %v406_v9  ;;  %v505_v17 = vrot.slane %v503_v1, 4  ;;  %v511_v22 = vrot.slane %v509_v3, 5  ;;  %v3353_v52 = vld [vmem:[%s3132_s21 + $0x1c] sm:$0xf]  ;;  %v3366_v9 = vld [vmem:[%s3132_s21 + $0x54] sm:$0xf] }
  0x47   : > { %2797 = vmatmul.msk.bf16.gmra.mxu0 %vm683_vm4, %v3328_v8  ;;  %v648_v19 = vunpack.c.l.b16 %v416_v13  ;;  %v496_v20 = vor.u32 %v495_v10, %v492_v55  ;;  %v589_v28 = vshll.u32 %v3326_v6, 16  ;;  %v595_v29 = vshll.u32 %v3333_v11, 16  ;;  %v3360_v55 = vld [vmem:[%s3132_s21 + $0x20] sm:$0x1] }
  0x48   : > { %v506_v27 = vor.u32 %v505_v17, %v501_v16  ;;  %v599_v30 = vshrl.u32 %v3333_v11, 16  ;;  %v588_v38 = vrot.slane %v586_v24, 4  ;;  %v605_v41 = vshll.u32 %v3338_v18, 16  ;;  %v3446_v11 = vld [vmem:[%s3132_s21 + $0x2c] sm:$0x1] }
  0x49   : > { %v3349_v33 = vpack.c.b16 %v648_v19, %v647_v14  ;;  %v497_v34 = vrot.slane %v496_v20, 4  ;;  %v591_v48 = vrot.slane %v589_v28, 5  ;;  %v597_v50 = vrot.slane %v595_v29, 5  ;;  %v3375_v29 = vld [vmem:[%s3132_s21 + $0x58] sm:$0xf] }
  0x4a   : > { %v507_v47 = vrot.slane %v506_v27, 4  ;;  %v601_v51 = vrot.slane %v599_v30, 4  ;;  %v607_v54 = vrot.slane %v605_v41, 5  ;;  %v298_v59 = vshrl.u32 %v3347_v32, 16 }
  0x4b   : > { %4952 = vst [vmem:[#allocation10_spill] sm:$0xff] %v3349_v33  ;;  %2802 = vmatmul.msk.bf16.gmra.mxu1 %vm683_vm4, %v3349_v33  ;;  %v502_v53 = vsel %vm3159_vm5, %v497_v34, %v501_v16  ;;  %v592_v1 = vor.u32 %v591_v48, %v588_v38  ;;  %v301_v14 = vshll.u32 %v3347_v32, 16  ;;  %v307_v16 = vshll.u32 %v3353_v52, 16  ;;  %v3383_v48 = vld [vmem:[%s3132_s21 + $0x5c] sm:$0x1] }
  0x4c   : > { %v512_v60 = vsel %vm3159_vm5, %v507_v47, %v511_v22  ;;  %v655_v61 = vunpack.c.l.b16 %v502_v53  ;;  %v602_v3 = vor.u32 %v601_v51, %v597_v50  ;;  %v300_v13 = vrot.slane %v298_v59, 4  ;;  %v3386_v51 = vld [vmem:[%s3132_s21 + $0x84] sm:$0xf] }
  0x4d   : > { %v656_v10 = vunpack.c.l.b16 %v512_v60  ;;  %v593_v17 = vrot.slane %v592_v1, 4  ;;  %v311_v20 = vshrl.u32 %v3353_v52, 16  ;;  %v317_v22 = vshll.u32 %v3360_v55, 16  ;;  %4953 = vst [vmem:[#allocation11_spill] sm:$0xff] %v3386_v51 }
  0x4e   : > { %v603_v19 = vrot.slane %v602_v3, 4  ;;  %v303_v27 = vrot.slane %v301_v14, 5  ;;  %v309_v28 = vrot.slane %v307_v16, 5  ;;  %v418_v30 = vshrl.u32 %v3366_v9, 16 }
  0x4f   : > { %v3372_v24 = vpack.c.b16 %v656_v10, %v655_v61  ;;  %v598_v34 = vsel %vm3159_vm5, %v593_v17, %v597_v50  ;;  %v313_v41 = vrot.slane %v311_v20, 4  ;;  %v319_v47 = vrot.slane %v317_v22, 5 }
  0x50   : > { %v608_v38 = vsel %vm3159_vm5, %v603_v19, %v607_v54  ;;  %v663_v53 = vunpack.c.l.b16 %v598_v34  ;;  %v304_v60 = vor.u32 %v303_v27, %v300_v13  ;;  %v420_v61 = vrot.slane %v418_v30, 4  ;;  %v3398_v27 = vld [vmem:[%s3132_s21 + $0x88] sm:$0xf] }
  0x51   : > { %2806 = vmatmul.msk.bf16.gmra.mxu2 %vm683_vm4, %v3372_v24  ;;  %v664_v59 = vunpack.c.l.b16 %v608_v38  ;;  %v314_v1 = vor.u32 %v313_v41, %v309_v28  ;;  %v421_v50 = vshll.u32 %v3366_v9, 16  ;;  %v427_v54 = vshll.u32 %v3375_v29, 16  ;;  %v3405_v38 = vld [vmem:[%s3132_s21 + $0x8c] sm:$0x1] }
  0x52   : > { %v431_v3 = vshrl.u32 %v3375_v29, 16  ;;  %v305_v14 = vrot.slane %v304_v60, 4  ;;  %v437_v16 = vshll.u32 %v3383_v48, 16  ;;  %v514_v17 = vshrl.u32 %v3386_v51, 16 }
  0x53   : > { %v3393_v10 = vpack.c.b16 %v664_v59, %v663_v53  ;;  %v315_v19 = vrot.slane %v314_v1, 4  ;;  %v423_v20 = vrot.slane %v421_v50, 5  ;;  %v429_v22 = vrot.slane %v427_v54, 5 }
  0x54   : > { %v433_v13 = vrot.slane %v431_v3, 4  ;;  %v310_v30 = vsel %vm3159_vm5, %v305_v14, %v309_v28  ;;  %v439_v34 = vrot.slane %v437_v16, 5  ;;  %v516_v41 = vrot.slane %v514_v17, 4  ;;  %v3413_v14 = vld [vmem:[%s3132_s21 + $0xb4] sm:$0xf] }
  0x55   : > { %4954 = vst [vmem:[#allocation12_spill] sm:$0xff] %v3393_v10  ;;  %2810 = vmatmul.msk.bf16.gmra.mxu3 %vm683_vm4, %v3393_v10  ;;  %v517_v53 = vshll.u32 %v3386_v51, 16  ;;  %v320_v59 = vsel %vm3159_vm5, %v315_v19, %v319_v47  ;;  %v639_v60 = vunpack.c.l.b16 %v310_v30  ;;  %v424_v1 = vor.u32 %v423_v20, %v420_v61  ;;  %v3419_v61 = vld [vmem:[%s3132_s21 + $0xb8] sm:$0xf] }
  0x56   : > { %v434_v50 = vor.u32 %v433_v13, %v429_v22  ;;  %v640_v54 = vunpack.c.l.b16 %v320_v59  ;;  %v523_v10 = vshll.u32 %v3398_v27, 16  ;;  %v527_v28 = vshrl.u32 %v3398_v27, 16  ;;  %4955 = vst [vmem:[#allocation13_spill] sm:$0xff] %v3413_v14  ;;  %v3426_v59 = vld [vmem:[%s3132_s21 + $0xbc] sm:$0x1] }
  0x57   : > { %v519_v3 = vrot.slane %v517_v53, 5  ;;  %v425_v16 = vrot.slane %v424_v1, 4  ;;  %v533_v6 = vshll.u32 %v3405_v38, 16  ;;  %4956 = vst [vmem:[#allocation14_spill] sm:$0xff] %v3419_v61  ;;  %v610_v1 = vshrl.u32 %v3413_v14, 16 }
  0x58   : > { %v435_v17 = vrot.slane %v434_v50, 4  ;;  %v3416_v18 = vpack.c.b16 %v640_v54, %v639_v60  ;;  %v525_v19 = vrot.slane %v523_v10, 5  ;;  %v529_v30 = vrot.slane %v527_v28, 4  ;;  %4957 = vst [vmem:[#allocation15_spill] sm:$0xff] %v3426_v59 }
  0x59   : > { %v520_v47 = vor.u32 %v519_v3, %v516_v41  ;;  %v430_v20 = vsel %vm3159_vm5, %v425_v16, %v429_v22  ;;  %v535_v53 = vrot.slane %v533_v6, 5  ;;  %v612_v54 = vrot.slane %v610_v1, 4 }
  0x5a   : > { %v440_v13 = vsel %vm3159_vm5, %v435_v17, %v439_v34  ;;  %2798 = vmatmul.msk.bf16.gmra.mxu0 %vm683_vm4, %v3416_v18  ;;  %v649_v10 = vunpack.c.l.b16 %v430_v20  ;;  %v530_v50 = vor.u32 %v529_v30, %v525_v19  ;;  %v613_v22 = vshll.u32 %v3413_v14, 16  ;;  %v3435_v34 = vld [vmem:[%s3132_s21 + $0x24] sm:$0xf] }
  0x5b   : > { %v650_v41 = vunpack.c.l.b16 %v440_v13  ;;  %v521_v60 = vrot.slane %v520_v47, 4  ;;  %v619_v3 = vshll.u32 %v3419_v61, 16  ;;  %v623_v6 = vshrl.u32 %v3419_v61, 16  ;;  %v3443_v47 = vld [vmem:[%s3132_s21 + $0x28] sm:$0xf] }
  0x5c   : > { %v531_v17 = vrot.slane %v530_v50, 4  ;;  %v629_v20 = vshll.u32 %v3426_v59, 16  ;;  %v615_v13 = vrot.slane %v613_v22, 5  ;;  %v1069_v61 = vrot.slane %v3185_v62, 5 }
  0x5d   : > { %v3437_v28 = vpack.c.b16 %v650_v41, %v649_v10  ;;  %v526_v16 = vsel %vm3159_vm5, %v521_v60, %v525_v19  ;;  %v621_v1 = vrot.slane %v619_v3, 5  ;;  %v625_v14 = vrot.slane %v623_v6, 4 }
  0x5e   : > { %v657_v30 = vunpack.c.l.b16 %v526_v16  ;;  %v536_v10 = vsel %vm3159_vm5, %v531_v17, %v535_v53  ;;  %v631_v19 = vrot.slane %v629_v20, 5  ;;  %v322_v41 = vshrl.u32 %v3435_v34, 16  ;;  %v2981_v17 = vld [vmem:[%s4902_s1 + $0xc] sm:$0x3] }
  0x5f   : > { %4958 = vst [vmem:[#allocation16_spill] sm:$0xff] %v3437_v28  ;;  %2803 = vmatmul.msk.bf16.gmra.mxu1 %vm683_vm4, %v3437_v28  ;;  %v658_v60 = vunpack.c.l.b16 %v536_v10  ;;  %v616_v50 = vor.u32 %v615_v13, %v612_v54  ;;  %v626_v59 = vor.u32 %v625_v14, %v621_v1  ;;  %v325_v22 = vshll.u32 %v3435_v34, 16  ;;  %v3002_v13 = vld [vmem:[%s4902_s1 + $0xe] sm:$0x3] }
  0x60   : > { %v324_v3 = vrot.slane %v322_v41, 4  ;;  %v331_v6 = vshll.u32 %v3443_v47, 16  ;;  %v335_v16 = vshrl.u32 %v3443_v47, 16  ;;  %v341_v62 = vshll.u32 %v3446_v11, 16  ;;  %v2964_v41 = vld [vmem:[%s4902_s1 + $0xa] sm:$0x3] }
  0x61   : > { %v3458_v35 = vpack.c.b16 %v658_v60, %v657_v30  ;;  %v617_v37 = vrot.slane %v616_v50, 4  ;;  %v627_v51 = vrot.slane %v626_v59, 4  ;;  %v327_v53 = vrot.slane %v325_v22, 5  ;;  %v3020_v60 = vld [vmem:[%s4902_s1 + $0x10] sm:$0x3] }
  0x62   : > { %v333_v54 = vrot.slane %v331_v6, 5  ;;  %v337_v14 = vrot.slane %v335_v16, 4  ;;  %v343_v20 = vrot.slane %v341_v62, 5  ;;  %vm1062_vm7 = vcmask 1046532  }
  0x63   : > { %2807 = vmatmul.msk.bf16.gmra.mxu2 %vm683_vm4, %v3458_v35  ;;  %v622_v30 = vsel %vm3159_vm5, %v617_v37, %v621_v1  ;;  %v632_v59 = vsel %vm3159_vm5, %v627_v51, %v631_v19  ;;  %v328_v10 = vor.u32 %v327_v53, %v324_v3  ;;  %vm3478_vm8 = vmor %vm1061_vm6, %vm1062_vm7  ;;  %v2892_v37 = vrot.slane %v3175_v56, 9 }
  0x64   : > { %v665_v50 = vunpack.c.l.b16 %v622_v30  ;;  %v666_v22 = vunpack.c.l.b16 %v632_v59  ;;  %v338_v6 = vor.u32 %v337_v14, %v333_v54  ;;  %v1066_v1 = vrot.slane %v3178_v57, 5 }
  0x65   : > { %v329_v51 = vrot.slane %v328_v10, 4  ;;  %v1839_v19 = vsel %vm732_vm1, %v2981_v17, 0  ;;  %v1995_v3 = vsel %vm732_vm1, %v3002_v13, 0  ;;  %v1705_v14 = vsel %vm732_vm1, %v2964_v41, 0 }
  0x66   : > { %v3486_v62 = vpack.c.b16 %v666_v22, %v665_v50  ;;  %v339_v53 = vrot.slane %v338_v6, 4  ;;  %1848 = vmatpush.bf16.msra.mxu2 %v1839_v19  ;;  %2004 = vmatpush.bf16.msra.mxu3 %v1995_v3  ;;  %v2135_v30 = vsel %vm732_vm1, %v3020_v60, 0  ;;  %v1067_v57 = vsel %vm3478_vm8, %v2892_v37, %v1066_v1  ;;  %v3041_v6 = vld [vmem:[%s3132_s21] sm:$0xff]  ;;  %v3042_v3 = vld [vmem:[%s3132_s21 + $0xc] sm:$0xff] }
  0x67   : > { %v334_v56 = vsel %vm3159_vm5, %v329_v51, %v333_v54  ;;  %v1068_v59 = vrot.slane %v1066_v1, 4  ;;  %1714 = vmatpush.bf16.msra.mxu1 %v1705_v14  ;;  %2144 = vmatpush.bf16.msra.mxu0 %v2135_v30  ;;  %v2893_v17 = vrot.slane %v3260_v39, 9  ;;  %v1178_v41 = vunpack.c.l.b16 %v1067_v57  ;;  %v3525_v14 = vld [vmem:[%s3132_s21 + $0x18] sm:$0xff] }
  0x68   : > { %2811 = vmatmul.msk.bf16.gmra.mxu3 %vm683_vm4, %v3486_v62  ;;  %v344_v13 = vsel %vm3159_vm5, %v339_v53, %v343_v20  ;;  %v641_v10 = vunpack.c.l.b16 %v334_v56  ;;  %v1073_v60 = vrot.slane %v3267_v43, 5  ;;  %v1076_v22 = vrot.slane %v3270_v44, 5 }
  0x69   : > { %v642_v50 = vunpack.c.l.b16 %v344_v13  ;;  %v1070_v54 = vsel %vm3478_vm8, %v1068_v59, %v1069_v61  ;;  %v1080_v53 = vrot.slane %v3353_v52, 5  ;;  %v2894_v30 = vrot.slane %v3347_v32, 9  ;;  %v3545_v13 = vld [vmem:[%s3132_s21 + $0x24] sm:$0xff] }
  0x6a   : > { %v1179_v37 = vunpack.c.l.b16 %v1070_v54  ;;  %v1074_v39 = vsel %vm3478_vm8, %v2893_v17, %v1073_v60  ;;  %v1075_v51 = vrot.slane %v1073_v60, 4  ;;  %v1083_v57 = vrot.slane %v3360_v55, 5 }
  0x6b   : > { %v3506_v1 = vpack.c.b16 %v642_v50, %v641_v10  ;;  %v1180_v20 = vunpack.c.l.b16 %v1074_v39  ;;  %v1082_v56 = vrot.slane %v1080_v53, 4  ;;  %v1087_v55 = vrot.slane %v3443_v47, 5 }
  0x6c   : > { %v1210_v19 = vpack.c.b16 %v1179_v37, %v1178_v41  ;;  %v1077_v43 = vsel %vm3478_vm8, %v1075_v51, %v1076_v22  ;;  %v2895_v10 = vrot.slane %v3435_v34, 9  ;;  %v1090_v60 = vrot.slane %v3446_v11, 5  ;;  %v3567_v37 = vld [vmem:[%s3132_s21 + $0x30] sm:$0xff] }
  0x6d   : > { %2799 = vmatmul.msk.bf16.gmra.mxu0 %vm683_vm4, %v3506_v1  ;;  %v1181_v61 = vunpack.c.l.b16 %v1077_v43  ;;  %v1084_v52 = vsel %vm3478_vm8, %v1082_v56, %v1083_v57  ;;  %v1089_v41 = vrot.slane %v1087_v55, 4  ;;  %v1094_v11 = vrot.slane %v3143_v4, 5  ;;  %v3595_v57 = vld [vmem:[%s3132_s21 + $0x3c] sm:$0xff] }
  0x6e   : > { %v1183_v17 = vunpack.c.l.b16 %v1084_v52  ;;  %v1088_v50 = vsel %vm3478_vm8, %v2895_v10, %v1087_v55  ;;  %v2896_v39 = vrot.slane %v3139_v2, 9  ;;  %vm2260_vm9 = vcmask 64512  }
  0x6f   : > { %2876 = vmatmul.msk.bf16.vlgmr.msrb.gmra.mxu1 %vm683_vm4, %v3041_v6  ;;  %v3513_v44 = vpack.c.b16 %v1181_v61, %v1180_v20  ;;  %v1091_v47 = vsel %vm3478_vm8, %v1089_v41, %v1090_v60  ;;  %v1184_v54 = vunpack.c.l.b16 %v1088_v50  ;;  %v1096_v51 = vrot.slane %v1094_v11, 4 }
  0x70   : > { %v1185_v22 = vunpack.c.l.b16 %v1091_v47  ;;  %v1097_v20 = vrot.slane %v3146_v5, 5  ;;  %vm2364_vm10 = vcmask 57344  }
  0x72   : > { %v3559_v34 = vpack.c.b16 %v1185_v22, %v1184_v54  ;;  %v1098_v4 = vsel %vm3478_vm8, %v1096_v51, %v1097_v20  ;;  %v1108_v22 = vrot.slane %v3289_v7, 5  ;;  %v2898_v51 = vrot.slane %v3282_v63, 9 }
  0x73   : > { %2909 = vmatmul.msk.bf16.vlgmr.msrb.gmra.mxu2 %vm683_vm4, %v1210_v19  ;;  %v1095_v19 = vsel %vm3478_vm8, %v2896_v39, %v1094_v11  ;;  %v1187_v61 = vunpack.c.l.b16 %v1098_v4  ;;  %v3629_v39 = vld [vmem:[%s3132_s21 + $0x48] sm:$0xff] }
  0x74   : > { %v1186_v43 = vunpack.c.l.b16 %v1095_v19  ;;  %4963 = vst [vmem:[#allocation19_spill] sm:$0xff] %v3629_v39  ;;  %v1110_v20 = vrot.slane %v1108_v22, 4  ;;  %v1111_v19 = vrot.slane %v3294_v15, 5  ;;  %v1109_v7 = vsel %vm3478_vm8, %v2898_v51, %v1108_v22 }
  0x75   : > { %v1190_v63 = vunpack.c.l.b16 %v1109_v7  ;;  %v2899_v22 = vrot.slane %v3366_v9, 9 }
  0x76   : > { %v3587_v5 = vpack.c.b16 %v1187_v61, %v1186_v43  ;;  %v1112_v61 = vsel %vm3478_vm8, %v1110_v20, %v1111_v19  ;;  %v1118_v20 = vrot.slane %v3383_v48, 5 }
  0x78   : > { %2930 = vmatmul.msk.bf16.vlgmr.msrb.gmra.mxu3 %vm683_vm4, %v3042_v3 }
  0x7d   : > { %2947 = vmatmul.msk.bf16.vlgmr.msrb.gmra.mxu0 %vm683_vm4, %v3328_v8  ;;  %v1081_v8 = vsel %vm3478_vm8, %v2894_v30, %v1080_v53  ;;  %v1101_v30 = vrot.slane %v3216_v26, 5 }
  0x7e   : > { %v1182_v59 = vunpack.c.l.b16 %v1081_v8  ;;  %v2897_v8 = vrot.slane %v3209_v21, 9 }
  0x7f   : > { %2877 = vmatmul.msk.bf16.gmra.mxu1 %vm683_vm4, %v3042_v3  ;;  %v1103_v52 = vrot.slane %v1101_v30, 4 }
  0x80   : > { %v3539_v32 = vpack.c.b16 %v1183_v17, %v1182_v59  ;;  %v1104_v59 = vrot.slane %v3220_v31, 5  ;;  %v1102_v26 = vsel %vm3478_vm8, %v2897_v8, %v1101_v30  ;;  %v1191_v8 = vunpack.c.l.b16 %v1112_v61 }
  0x81   : > { %v1188_v60 = vunpack.c.l.b16 %v1102_v26  ;;  %v1115_v26 = vrot.slane %v3375_v29, 5 }
  0x82   : > { %v1105_v10 = vsel %vm3478_vm8, %v1103_v52, %v1104_v59  ;;  %v3653_v59 = vpack.c.b16 %v1191_v8, %v1190_v63 }
  0x83   : > { %2910 = vmatmul.msk.bf16.gmra.mxu2 %vm683_vm4, %v3513_v44  ;;  %v1189_v31 = vunpack.c.l.b16 %v1105_v10  ;;  %v1117_v51 = vrot.slane %v1115_v26, 4  ;;  %v1116_v29 = vsel %vm3478_vm8, %v2899_v22, %v1115_v26  ;;  %v3072_v22 = vld [vmem:[%s3132_s21 + $0x64] sm:$0xf] }
  0x84   : > { %4966 = vst [vmem:[#allocation22_spill] sm:$0xff] %v3653_v59  ;;  %v1192_v63 = vunpack.c.l.b16 %v1116_v29 }
  0x85   : > { %v3619_v47 = vpack.c.b16 %v1189_v31, %v1188_v60  ;;  %v3663_v31 = vld [vmem:[%s3132_s21 + $0x54] sm:$0xff]  ;;  %v1119_v61 = vsel %vm3478_vm8, %v1117_v51, %v1118_v20  ;;  %v1122_v51 = vrot.slane %v3072_v22, 5 }
  0x86   : > { %4967 = vst [vmem:[#allocation23_spill] sm:$0xff] %v3663_v31  ;;  %v1193_v48 = vunpack.c.l.b16 %v1119_v61  ;;  %v3073_v61 = vld [vmem:[%s3132_s21 + $0x68] sm:$0x1] }
  0x88   : > { %2931 = vmatmul.msk.bf16.gmra.mxu3 %vm683_vm4, %v3525_v14 }
  0x8d   : > { %2948 = vmatmul.msk.bf16.gmra.mxu0 %vm683_vm4, %v3416_v18 }
  0x8f   : > { %2878 = vmatmul.msk.bf16.gmra.mxu1 %vm683_vm4, %v3525_v14 }
  0x93   : > { %2911 = vmatmul.msk.bf16.gmra.mxu2 %vm683_vm4, %v3539_v32 }
  0x98   : > { %2932 = vmatmul.msk.bf16.gmra.mxu3 %vm683_vm4, %v3545_v13 }
  0x9d   : > { %2949 = vmatmul.msk.bf16.gmra.mxu0 %vm683_vm4, %v3506_v1 }
  0x9f   : > { %2879 = vmatmul.msk.bf16.gmra.mxu1 %vm683_vm4, %v3545_v13 }
  0xa3   : > { %v3562_v6 = vpop.f32.mrf.mxu1  ;;  %2912 = vmatmul.msk.bf16.gmra.mxu2 %vm683_vm4, %v3559_v34 }
  0xa8   : > { %2933 = vmatmul.msk.bf16.gmra.mxu3 %vm683_vm4, %v3567_v37 }
  0xab   : > { %v3579_v53 = vpop.f32.mrf.mxu1 }
  0xac   : > { %v3577_v3 = vpop.f32.mrf.mxu2 }
  0xad   : > { %2950 = vmatmul.msk.bf16.gmra.mxu0 %vm683_vm4, %v3180_v58 }
  0xaf   : > { %2880 = vmatmul.msk.bf16.gmra.mxu1 %vm683_vm4, %v3567_v37 }
  0xb0   : > { %v3590_v56 = vpop.f32.mrf.mxu3 }
  0xb1   : > { %v3585_v2 = vpop.f32.mrf.mxu0  ;;  %4961 = vst [vmem:[#allocation17_spill] sm:$0xff] %v3590_v56 }
  0xb3   : > { %2913 = vmatmul.msk.bf16.gmra.mxu2 %vm683_vm4, %v3587_v5 }
  0xb4   : > { %v3599_v17 = vpop.f32.mrf.mxu2 }
  0xb6   : > { %v3601_v55 = vpop.f32.mrf.mxu1 }
  0xb8   : > { %2934 = vmatmul.msk.bf16.gmra.mxu3 %vm683_vm4, %v3595_v57  ;;  %v3611_v21 = vpop.f32.mrf.mxu3 }
  0xb9   : > { %v3609_v41 = vpop.f32.mrf.mxu0  ;;  %4962 = vst [vmem:[#allocation18_spill] sm:$0xff] %v3611_v21 }
  0xbd   : > { %2951 = vmatmul.msk.bf16.gmra.mxu0 %vm683_vm4, %v3262_v40 }
  0xbe   : > { %v3615_v50 = vpop.f32.mrf.mxu1 }
  0xbf   : > { %2881 = vmatmul.msk.bf16.gmra.mxu1 %vm683_vm4, %v3595_v57 }
  0xc0   : > { %v3621_v54 = vpop.f32.mrf.mxu2 }
  0xc3   : > { %2914 = vmatmul.msk.bf16.gmra.mxu2 %vm683_vm4, %v3619_v47 }
  0xc4   : > { %v3624_v11 = vpop.f32.mrf.mxu0 }
  0xc6   : > { %v3633_v4 = vpop.f32.mrf.mxu3 }
  0xc7   : > { %4964 = vst [vmem:[#allocation20_spill] sm:$0xff] %v3633_v4  ;;  %v3698_v4 = vld [vmem:[%s3132_s21 + $0x60] sm:$0xff] }
  0xc8   : > { %v3635_v43 = vpop.f32.mrf.mxu1  ;;  %2935 = vmatmul.msk.bf16.gmra.mxu3 %vm683_vm4, %v3629_v39  ;;  %v3643_v30 = vpop.f32.mrf.mxu2  ;;  %4971 = vst [vmem:[#allocation27_spill] sm:$0xff] %v3698_v4 }
  0xcc   : > { %v3647_v15 = vpop.f32.mrf.mxu0 }
  0xcd   : > { %2952 = vmatmul.msk.bf16.gmra.mxu0 %vm683_vm4, %v3349_v33 }
  0xce   : > { %v3649_v52 = vpop.f32.mrf.mxu3 }
  0xcf   : > { %4965 = vst [vmem:[#allocation21_spill] sm:$0xff] %v3649_v52  ;;  %2882 = vmatmul.msk.bf16.gmra.mxu1 %vm683_vm4, %v3629_v39  ;;  %v1125_v52 = vrot.slane %v3073_v61, 5 }
  0xd0   : > { %v3656_v10 = vpop.f32.mrf.mxu1 }
  0xd3   : > { %2915 = vmatmul.msk.bf16.gmra.mxu2 %vm683_vm4, %v3653_v59 }
  0xd4   : > { %v3660_v60 = vpop.f32.mrf.mxu2 }
  0xd7   : > { %v3667_v19 = vpop.f32.mrf.mxu0 }
  0xd8   : > { %v3669_v7 = vpop.f32.mrf.mxu3  ;;  %2936 = vmatmul.msk.bf16.gmra.mxu3 %vm683_vm4, %v3663_v31 }
  0xd9   : > { %4968 = vst [vmem:[#allocation24_spill] sm:$0xff] %v3669_v7  ;;  %v3685_v7 = vpack.c.b16 %v1193_v48, %v1192_v63 }
  0xdb   : > { %4969 = vst [vmem:[#allocation25_spill] sm:$0xff] %v3685_v7 }
  0xdc   : > { %v3677_v9 = vpop.f32.mrf.mxu1  ;;  %v3679_v8 = vpop.f32.mrf.mxu2 }
  0xdd   : > { %2953 = vmatmul.msk.bf16.gmra.mxu0 %vm683_vm4, %v3437_v28  ;;  %v3074_v28 = vld [vmem:[%s3132_s21 + $0x60] sm:$0xf] }
  0xde   : > { %v2900_v21 = vrot.slane %v3074_v28, 9 }
  0xdf   : > { %2883 = vmatmul.msk.bf16.gmra.mxu1 %vm683_vm4, %v3663_v31  ;;  %v3687_v26 = vpop.f32.mrf.mxu0  ;;  %v1124_v31 = vrot.slane %v1122_v51, 4 }
  0xe0   : > { %v3690_v20 = vpop.f32.mrf.mxu3  ;;  %v1123_v48 = vsel %vm3478_vm8, %v2900_v21, %v1122_v51 }
  0xe1   : > { %4970 = vst [vmem:[#allocation26_spill] sm:$0xff] %v3690_v20  ;;  %v1126_v22 = vsel %vm3478_vm8, %v1124_v31, %v1125_v52  ;;  %v1194_v59 = vunpack.c.l.b16 %v1123_v48  ;;  %v1129_v52 = vrot.slane %v3235_v45, 5  ;;  %v3731_v48 = vld [vmem:[%s3132_s21 + $0x6c] sm:$0xff] }
  0xe2   : > { %v1195_v28 = vunpack.c.l.b16 %v1126_v22 }
  0xe3   : > { %2916 = vmatmul.msk.bf16.gmra.mxu2 %vm683_vm4, %v3685_v7 }
  0xe4   : > { %v3694_v29 = vpop.f32.mrf.mxu1  ;;  %v3720_v21 = vpack.c.b16 %v1195_v28, %v1194_v59  ;;  %v1131_v59 = vrot.slane %v1129_v52, 4 }
  0xe6   : > { %v3701_v63 = vpop.f32.mrf.mxu2  ;;  %4974 = vst [vmem:[#allocation30_spill] sm:$0xff] %v3720_v21 }
  0xe8   : > { %2937 = vmatmul.msk.bf16.gmra.mxu3 %vm683_vm4, %v3698_v4 }
  0xea   : > { %v3709_v20 = vpop.f32.mrf.mxu0 }
  0xeb   : > { %v3711_v61 = vpop.f32.mrf.mxu3 }
  0xec   : > { %4972 = vst [vmem:[#allocation28_spill] sm:$0xff] %v3711_v61  ;;  %v965_v7 = vpop.f32.mrf.mxu1  ;;  %v2901_v61 = vrot.slane %v3226_v36, 9 }
  0xed   : > { %v966_v33 = vadd.f32 %v965_v7, %v3585_v2  ;;  %2954 = vmatmul.msk.bf16.gmra.mxu0 %vm683_vm4, %v3199_v12  ;;  %v1132_v7 = vrot.slane %v3242_v49, 5 }
  0xee   : > { %v3716_v56 = vpop.f32.mrf.mxu2  ;;  %v1130_v45 = vsel %vm3478_vm8, %v2901_v61, %v1129_v52 }
  0xef   : > { %4973 = vst [vmem:[#allocation29_spill] sm:$0xff] %v3716_v56  ;;  %2884 = vmatmul.msk.bf16.gmra.mxu1 %vm683_vm4, %v3698_v4  ;;  %v1196_v39 = vunpack.c.l.b16 %v1130_v45 }
  0xf2   : > { %v3723_v31 = vpop.f32.mrf.mxu0 }
  0xf3   : > { %v3725_v51 = vpop.f32.mrf.mxu3  ;;  %2917 = vmatmul.msk.bf16.gmra.mxu2 %vm683_vm4, %v3720_v21 }
  0xf4   : > { %4975 = vst [vmem:[#allocation31_spill] sm:$0xff] %v3725_v51  ;;  %v967_v2 = vpop.f32.mrf.mxu1  ;;  %v1133_v51 = vsel %vm3478_vm8, %v1131_v59, %v1132_v7  ;;  %v1136_v7 = vrot.slane %v3311_v42, 5 }
  0xf5   : > { %v968_v22 = vadd.f32 %v967_v2, %v3609_v41  ;;  %v1197_v56 = vunpack.c.l.b16 %v1133_v51  ;;  %v1139_v51 = vrot.slane %v3314_v46, 5 }
  0xf6   : > { %v1286_v28 = vpop.f32.mrf.mxu2 }
  0xf7   : > { %v1366_v12 = vadd.f32 %v1286_v28, %v966_v33  ;;  %v3748_v2 = vpack.c.b16 %v1197_v56, %v1196_v39  ;;  %v3755_v28 = vld [vmem:[%s3132_s21 + $0x78] sm:$0xff] }
  0xf8   : > { %2938 = vmatmul.msk.bf16.gmra.mxu3 %vm683_vm4, %v3731_v48 }
  0xfa   : > { %v1576_v21 = vpop.f32.mrf.mxu0 }
  0xfb   : > { %v1420_v49 = vpop.f32.mrf.mxu3 }
  0xfc   : > { %v970_v4 = vpop.f32.mrf.mxu1  ;;  %v1500_v41 = vadd.f32 %v1420_v49, %v1366_v12 }
  0xfd   : > { %v971_v36 = vadd.f32 %v970_v4, %v3624_v11  ;;  %2955 = vmatmul.msk.bf16.gmra.mxu0 %vm683_vm4, %v3284_v0 }
  0xfe   : > { %v1288_v33 = vpop.f32.mrf.mxu2  ;;  %v3746_v61 = vadd.f32 %v1576_v21, %v1500_v41  ;;  %v2902_v21 = vrot.slane %v3303_v23, 9 }
  0xff   : > { %2885 = vmatmul.msk.bf16.gmra.mxu1 %vm683_vm4, %v3731_v48  ;;  %v1367_v52 = vadd.f32 %v1288_v33, %v968_v22  ;;  %v1138_v22 = vrot.slane %v1136_v7, 4 }
 0x100   : > { %v1137_v46 = vsel %vm3478_vm8, %v2902_v21, %v1136_v7 }
 0x101   : > { %v1140_v49 = vsel %vm3478_vm8, %v1138_v22, %v1139_v51  ;;  %v1146_v22 = vrot.slane %v3405_v38, 5 }
 0x102   : > { %v1578_v59 = vpop.f32.mrf.mxu0 }
 0x103   : > { %v1422_v12 = vpop.f32.mrf.mxu3  ;;  %2918 = vmatmul.msk.bf16.gmra.mxu2 %vm683_vm4, %v3748_v2 }
 0x104   : > { %v972_v11 = vpop.f32.mrf.mxu1  ;;  %v1501_v4 = vadd.f32 %v1422_v12, %v1367_v52  ;;  %v1199_v12 = vunpack.c.l.b16 %v1140_v49 }
 0x105   : > { %v973_v45 = vadd.f32 %v972_v11, %v3647_v15  ;;  %v1198_v15 = vunpack.c.l.b16 %v1137_v46  ;;  %v3781_v46 = vld [vmem:[%s3132_s21 + $0x84] sm:$0xff] }
 0x106   : > { %v1291_v56 = vpop.f32.mrf.mxu2  ;;  %v3759_v39 = vadd.f32 %v1578_v59, %v1501_v4  ;;  %v1143_v4 = vrot.slane %v3398_v27, 5 }
 0x107   : > { %v1368_v42 = vadd.f32 %v1291_v56, %v971_v36  ;;  %v3774_v51 = vpack.c.b16 %v1199_v12, %v1198_v15 }
 0x108   : > { %2939 = vmatmul.msk.bf16.gmra.mxu3 %vm683_vm4, %v3755_v28 }
 0x10a   : > { %v1581_v41 = vpop.f32.mrf.mxu0 }
 0x10b   : > { %v1425_v33 = vpop.f32.mrf.mxu3 }
 0x10c   : > { %v975_v52 = vpop.f32.mrf.mxu1  ;;  %v1502_v23 = vadd.f32 %v1425_v33, %v1368_v42 }
 0x10d   : > { %v976_v59 = vadd.f32 %v975_v52, %v3667_v19  ;;  %2956 = vmatmul.msk.bf16.gmra.mxu0 %vm683_vm4, %v3372_v24 }
 0x10e   : > { %v1293_v36 = vpop.f32.mrf.mxu2  ;;  %v3772_v7 = vadd.f32 %v1581_v41, %v1502_v23  ;;  %v4976_v41 = vld [vmem:[#allocation11_spill] sm:$0xff] }
 0x10f   : > { %2886 = vmatmul.msk.bf16.gmra.mxu1 %vm683_vm4, %v3755_v28  ;;  %v1369_v11 = vadd.f32 %v1293_v36, %v973_v45  ;;  %v2903_v33 = vrot.slane %v4976_v41, 9  ;;  %v1145_v45 = vrot.slane %v1143_v4, 4  ;;  %v3075_v41 = vld [vmem:[%s3132_s21 + $0x94] sm:$0xf] }
 0x111   : > { %v1144_v38 = vsel %vm3478_vm8, %v2903_v33, %v1143_v4  ;;  %v1147_v12 = vsel %vm3478_vm8, %v1145_v45, %v1146_v22  ;;  %v1150_v33 = vrot.slane %v3075_v41, 5 }
 0x112   : > { %v1583_v21 = vpop.f32.mrf.mxu0 }
 0x113   : > { %v1427_v56 = vpop.f32.mrf.mxu3  ;;  %2919 = vmatmul.msk.bf16.gmra.mxu2 %vm683_vm4, %v3774_v51 }
 0x114   : > { %v977_v19 = vpop.f32.mrf.mxu1  ;;  %v1503_v42 = vadd.f32 %v1427_v56, %v1369_v11  ;;  %v1200_v11 = vunpack.c.l.b16 %v1144_v38  ;;  %v1201_v56 = vunpack.c.l.b16 %v1147_v12 }
 0x115   : > { %v978_v49 = vadd.f32 %v977_v19, %v3687_v26 }
 0x116   : > { %v1296_v52 = vpop.f32.mrf.mxu2  ;;  %v3785_v15 = vadd.f32 %v1583_v21, %v1503_v42  ;;  %v3800_v42 = vpack.c.b16 %v1201_v56, %v1200_v11 }
 0x117   : > { %v1370_v27 = vadd.f32 %v1296_v52, %v976_v59  ;;  %v3076_v52 = vld [vmem:[%s3132_s21 + $0x98] sm:$0x1] }
 0x118   : > { %4977 = vst [vmem:[#allocation11_spill] sm:$0xff] %v3785_v15  ;;  %2940 = vmatmul.msk.bf16.gmra.mxu3 %vm683_vm4, %v3781_v46  ;;  %v3080_v15 = vld [vmem:[%s3132_s21 + $0x9c] sm:$0xf] }
 0x119   : > { %4979 = vst [vmem:[#allocation33_spill] sm:$0xff] %v3800_v42 }
 0x11a   : > { %v1586_v23 = vpop.f32.mrf.mxu0 }
 0x11b   : > { %v1430_v26 = vpop.f32.mrf.mxu3 }
 0x11c   : > { %v980_v36 = vpop.f32.mrf.mxu1  ;;  %v1504_v19 = vadd.f32 %v1430_v26, %v1370_v27  ;;  %v1153_v27 = vrot.slane %v3076_v52, 5  ;;  %v3807_v26 = vld [vmem:[%s3132_s21 + $0x90] sm:$0xff] }
 0x11d   : > { %v981_v21 = vadd.f32 %v980_v36, %v3709_v20  ;;  %2957 = vmatmul.msk.bf16.gmra.mxu0 %vm683_vm4, %v3458_v35  ;;  %4980 = vst [vmem:[#allocation34_spill] sm:$0xff] %v3807_v26 }
 0x11e   : > { %v1298_v59 = vpop.f32.mrf.mxu2  ;;  %v3798_v4 = vadd.f32 %v1586_v23, %v1504_v19  ;;  %v3077_v23 = vld [vmem:[%s3132_s21 + $0x90] sm:$0xf] }
 0x11f   : > { %2887 = vmatmul.msk.bf16.gmra.mxu1 %vm683_vm4, %v3781_v46  ;;  %v1371_v22 = vadd.f32 %v1298_v59, %v978_v49  ;;  %v2904_v19 = vrot.slane %v3077_v23, 9  ;;  %v1152_v49 = vrot.slane %v1150_v33, 4 }
 0x120   : > { %4978 = vst [vmem:[#allocation32_spill] sm:$0xff] %v3798_v4 }
 0x121   : > { %v1151_v41 = vsel %vm3478_vm8, %v2904_v19, %v1150_v33  ;;  %v3078_v19 = vld [vmem:[%s3132_s21 + $0xa0] sm:$0xf] }
 0x122   : > { %v1588_v45 = vpop.f32.mrf.mxu0 }
 0x123   : > { %v1432_v20 = vpop.f32.mrf.mxu3  ;;  %2920 = vmatmul.msk.bf16.gmra.mxu2 %vm683_vm4, %v3800_v42 }
 0x124   : > { %v982_v38 = vpop.f32.mrf.mxu1  ;;  %v1505_v12 = vadd.f32 %v1432_v20, %v1371_v22  ;;  %v1154_v22 = vsel %vm3478_vm8, %v1152_v49, %v1153_v27  ;;  %v1157_v49 = vrot.slane %v3078_v19, 5 }
 0x125   : > { %v983_v36 = vadd.f32 %v982_v38, %v3723_v31  ;;  %v1202_v38 = vunpack.c.l.b16 %v1151_v41  ;;  %v1203_v23 = vunpack.c.l.b16 %v1154_v22  ;;  %v3079_v22 = vld [vmem:[%s3132_s21 + $0xa4] sm:$0x1] }
 0x126   : > { %v1301_v11 = vpop.f32.mrf.mxu2  ;;  %v3811_v56 = vadd.f32 %v1588_v45, %v1505_v12  ;;  %v4982_v45 = vld [vmem:[#allocation5_spill] sm:$0xff] }
 0x127   : > { %v1372_v59 = vadd.f32 %v1301_v11, %v981_v21  ;;  %v3825_v27 = vpack.c.b16 %v1203_v23, %v1202_v38 }
 0x128   : > { %4981 = vst [vmem:[#allocation35_spill] sm:$0xff] %v3811_v56  ;;  %2941 = vmatmul.msk.bf16.gmra.mxu3 %vm683_vm4, %v3807_v26 }
 0x129   : > { %4984 = vst [vmem:[#allocation37_spill] sm:$0xff] %v3825_v27 }
 0x12a   : > { %v1591_v52 = vpop.f32.mrf.mxu0 }
 0x12b   : > { %v1435_v20 = vpop.f32.mrf.mxu3 }
 0x12c   : > { %v985_v31 = vpop.f32.mrf.mxu1  ;;  %v1506_v4 = vadd.f32 %v1435_v20, %v1372_v59  ;;  %v1160_v20 = vrot.slane %v3079_v22, 5 }
 0x12d   : > { %2958 = vmatmul.msk.bf16.gmra.mxu0 %vm683_vm4, %v4982_v45  ;;  %v3832_v45 = vld [vmem:[%s3132_s21 + $0x9c] sm:$0xff] }
 0x12e   : > { %v1303_v21 = vpop.f32.mrf.mxu2  ;;  %v3823_v33 = vadd.f32 %v1591_v52, %v1506_v4  ;;  %4985 = vst [vmem:[#allocation38_spill] sm:$0xff] %v3832_v45  ;;  %v1159_v4 = vrot.slane %v1157_v49, 4 }
 0x12f   : > { %2888 = vmatmul.msk.bf16.gmra.mxu1 %vm683_vm4, %v3807_v26  ;;  %v1373_v12 = vadd.f32 %v1303_v21, %v983_v36  ;;  %v2905_v26 = vrot.slane %v3080_v15, 9  ;;  %v986_v36 = vadd.f32 %v985_v31, %v3562_v6  ;;  %v4987_v31 = vld [vmem:[#allocation6_spill] sm:$0xff] }
 0x130   : > { %4983 = vst [vmem:[#allocation36_spill] sm:$0xff] %v3823_v33 }
 0x131   : > { %v1158_v21 = vsel %vm3478_vm8, %v2905_v26, %v1157_v49 }
 0x132   : > { %v1593_v11 = vpop.f32.mrf.mxu0  ;;  %v1204_v15 = vunpack.c.l.b16 %v1158_v21 }
 0x133   : > { %v1437_v41 = vpop.f32.mrf.mxu3  ;;  %2921 = vmatmul.msk.bf16.gmra.mxu2 %vm683_vm4, %v3825_v27 }
 0x134   : > { %v987_v59 = vpop.f32.mrf.mxu1  ;;  %v1507_v56 = vadd.f32 %v1437_v41, %v1373_v12  ;;  %v1161_v12 = vsel %vm3478_vm8, %v1159_v4, %v1160_v20  ;;  %v4990_v4 = vld [vmem:[#allocation8_spill] sm:$0xff] }
 0x135   : > { %v1205_v33 = vunpack.c.l.b16 %v1161_v12  ;;  %v4991_v12 = vld [vmem:[#allocation9_spill] sm:$0xff] }
 0x136   : > { %v1306_v52 = vpop.f32.mrf.mxu2  ;;  %v3836_v38 = vadd.f32 %v1593_v11, %v1507_v56  ;;  %v988_v56 = vadd.f32 %v987_v59, %v3579_v53  ;;  %v3858_v59 = vld [vmem:[%s3132_s21 + $0xa8] sm:$0xff] }
 0x137   : > { %v1374_v23 = vadd.f32 %v1306_v52, %v986_v36  ;;  %v3851_v20 = vpack.c.b16 %v1205_v33, %v1204_v15  ;;  %v1164_v36 = vrot.slane %v4990_v4, 5  ;;  %4992 = vst [vmem:[#allocation8_spill] sm:$0xff] %v3858_v59 }
 0x138   : > { %4986 = vst [vmem:[#allocation39_spill] sm:$0xff] %v3836_v38  ;;  %2942 = vmatmul.msk.bf16.gmra.mxu3 %vm683_vm4, %v3832_v45  ;;  %v4993_v38 = vld [vmem:[#allocation7_spill] sm:$0xff] }
 0x139   : > { %4989 = vst [vmem:[#allocation41_spill] sm:$0xff] %v3851_v20 }
 0x13a   : > { %v1596_v19 = vpop.f32.mrf.mxu0 }
 0x13b   : > { %v1440_v41 = vpop.f32.mrf.mxu3 }
 0x13c   : > { %v990_v22 = vpop.f32.mrf.mxu1  ;;  %v1508_v6 = vadd.f32 %v1440_v41, %v1374_v23  ;;  %v1167_v41 = vrot.slane %v4991_v12, 5 }
 0x13d   : > { %2959 = vmatmul.msk.bf16.gmra.mxu0 %vm683_vm4, %v4987_v31  ;;  %v2906_v31 = vrot.slane %v4993_v38, 9 }
 0x13e   : > { %v1308_v11 = vpop.f32.mrf.mxu2  ;;  %v3849_v26 = vadd.f32 %v1596_v19, %v1508_v6  ;;  %v1166_v19 = vrot.slane %v1164_v36, 4  ;;  %v991_v6 = vadd.f32 %v990_v22, %v3601_v55 }
 0x13f   : > { %2889 = vmatmul.msk.bf16.gmra.mxu1 %vm683_vm4, %v3832_v45  ;;  %v1375_v49 = vadd.f32 %v1308_v11, %v988_v56  ;;  %v1165_v11 = vsel %vm3478_vm8, %v2906_v31, %v1164_v36  ;;  %v3876_v31 = vld [vmem:[%s3132_s21 + $0xc0] sm:$0xf] }
 0x140   : > { %4988 = vst [vmem:[#allocation40_spill] sm:$0xff] %v3849_v26  ;;  %v1206_v12 = vunpack.c.l.b16 %v1165_v11  ;;  %v4995_v26 = vld [vmem:[#allocation12_spill] sm:$0xff]  ;;  %v1533_v11 = vshrl.u32 %v3876_v31, 16 }
 0x141   : > { %4996 = vst [vmem:[#allocation7_spill] sm:$0xff] %v3876_v31 }
 0x142   : > { %v1598_v52 = vpop.f32.mrf.mxu0 }
 0x143   : > { %v1442_v21 = vpop.f32.mrf.mxu3  ;;  %2922 = vmatmul.msk.bf16.gmra.mxu2 %vm683_vm4, %v3851_v20 }
 0x144   : > { %v992_v23 = vpop.f32.mrf.mxu1  ;;  %v1509_v53 = vadd.f32 %v1442_v21, %v1375_v49  ;;  %v1168_v49 = vsel %vm3478_vm8, %v1166_v19, %v1167_v41 }
 0x145   : > { %v1207_v55 = vunpack.c.l.b16 %v1168_v49 }
 0x146   : > { %v1311_v33 = vpop.f32.mrf.mxu2  ;;  %v3862_v15 = vadd.f32 %v1598_v52, %v1509_v53  ;;  %v993_v52 = vadd.f32 %v992_v23, %v3615_v50  ;;  %v1536_v50 = vshll.u32 %v3876_v31, 16 }
 0x147   : > { %v1376_v56 = vadd.f32 %v1311_v33, %v991_v6  ;;  %v3880_v19 = vpack.c.b16 %v1207_v55, %v1206_v12  ;;  %v3883_v6 = vld [vmem:[%s3132_s21 + $0xc4] sm:$0xf]  ;;  %v5000_v33 = vld [vmem:[#allocation14_spill] sm:$0xff]  ;;  %v5001_v12 = vld [vmem:[#allocation15_spill] sm:$0xff] }
 0x148   : > { %4994 = vst [vmem:[#allocation9_spill] sm:$0xff] %v3862_v15  ;;  %2943 = vmatmul.msk.bf16.gmra.mxu3 %vm683_vm4, %v3858_v59  ;;  %v1542_v23 = vshll.u32 %v3883_v6, 16  ;;  %v1174_v55 = vrot.slane %v5001_v12, 5  ;;  %v1538_v20 = vrot.slane %v1536_v50, 5 }
 0x149   : > { %4998 = vst [vmem:[#allocation43_spill] sm:$0xff] %v3880_v19 }
 0x14a   : > { %v1601_v4 = vpop.f32.mrf.mxu0  ;;  %4999 = vst [vmem:[#allocation44_spill] sm:$0xff] %v3883_v6 }
 0x14b   : > { %v1445_v38 = vpop.f32.mrf.mxu3 }
 0x14c   : > { %v995_v21 = vpop.f32.mrf.mxu1  ;;  %v1510_v22 = vadd.f32 %v1445_v38, %v1376_v56  ;;  %v1171_v56 = vrot.slane %v5000_v33, 5  ;;  %v1546_v38 = vshrl.u32 %v3883_v6, 16  ;;  %v1544_v6 = vrot.slane %v1542_v23, 5 }
 0x14d   : > { %2960 = vmatmul.msk.bf16.gmra.mxu0 %vm683_vm4, %v4995_v26  ;;  %v996_v31 = vadd.f32 %v995_v21, %v3635_v43  ;;  %v1535_v26 = vrot.slane %v1533_v11, 4 }
 0x14e   : > { %v1313_v53 = vpop.f32.mrf.mxu2  ;;  %v3878_v36 = vadd.f32 %v1601_v4, %v1510_v22  ;;  %v1548_v45 = vrot.slane %v1546_v38, 4 }
 0x14f   : > { %2890 = vmatmul.msk.bf16.gmra.mxu1 %vm683_vm4, %v3858_v59  ;;  %v1377_v41 = vadd.f32 %v1313_v53, %v993_v52  ;;  %v3894_v52 = vld [vmem:[%s3132_s21 + $0xb4] sm:$0xff]  ;;  %v5002_v53 = vld [vmem:[#allocation13_spill] sm:$0xff]  ;;  %v1539_v21 = vor.u32 %v1538_v20, %v1535_v26 }
 0x150   : > { %4997 = vst [vmem:[#allocation42_spill] sm:$0xff] %v3878_v36  ;;  %v2907_v33 = vrot.slane %v5002_v53, 9  ;;  %v1173_v36 = vrot.slane %v1171_v56, 4  ;;  %v1549_v11 = vor.u32 %v1548_v45, %v1544_v6 }
 0x152   : > { %v1603_v49 = vpop.f32.mrf.mxu0  ;;  %v1550_v26 = vrot.slane %v1549_v11, 4 }
 0x153   : > { %v1447_v15 = vpop.f32.mrf.mxu3  ;;  %2923 = vmatmul.msk.bf16.gmra.mxu2 %vm683_vm4, %v3880_v19  ;;  %v3901_v19 = vld [vmem:[%s3132_s21 + $0xc8] sm:$0x1] }
 0x154   : > { %v997_v4 = vpop.f32.mrf.mxu1  ;;  %v1511_v22 = vadd.f32 %v1447_v15, %v1377_v41  ;;  %v1172_v15 = vsel %vm3478_vm8, %v2907_v33, %v1171_v56  ;;  %v1175_v41 = vsel %vm3478_vm8, %v1173_v36, %v1174_v55  ;;  %v1552_v50 = vshll.u32 %v3901_v19, 16 }
 0x155   : > { %v1208_v38 = vunpack.c.l.b16 %v1172_v15  ;;  %v998_v12 = vadd.f32 %v997_v4, %v3656_v10  ;;  %v1540_v36 = vrot.slane %v1539_v21, 4 }
 0x156   : > { %v1316_v59 = vpop.f32.mrf.mxu2  ;;  %v3898_v27 = vadd.f32 %v1603_v49, %v1511_v22  ;;  %v1554_v45 = vrot.slane %v1552_v50, 5 }
 0x157   : > { %v1378_v42 = vadd.f32 %v1316_v59, %v996_v31  ;;  %v1209_v59 = vunpack.c.l.b16 %v1175_v41  ;;  %v3926_v41 = vld [vmem:[%s3132_s21 + $0xc0] sm:$0xff] }
 0x158   : > { %2944 = vmatmul.msk.bf16.gmra.mxu3 %vm683_vm4, %v3894_v52  ;;  %v1555_v10 = vsel %vm3159_vm5, %v1550_v26, %v1554_v45 }
 0x159   : > { %v3917_v22 = vpack.c.b16 %v1209_v59, %v1208_v38  ;;  %v1559_v11 = vunpack.c.l.b16 %v1555_v10 }
 0x15a   : > { %v1606_v43 = vpop.f32.mrf.mxu0 }
 0x15b   : > { %v1450_v23 = vpop.f32.mrf.mxu3 }
 0x15c   : > { %v1000_v49 = vpop.f32.mrf.mxu1  ;;  %v1512_v31 = vadd.f32 %v1450_v23, %v1378_v42  ;;  %v1545_v42 = vsel %vm3159_vm5, %v1540_v36, %v1544_v6 }
 0x15d   : > { %2961 = vmatmul.msk.bf16.gmra.mxu0 %vm683_vm4, %v3486_v62  ;;  %v1558_v21 = vunpack.c.l.b16 %v1545_v42 }
 0x15e   : > { %v1318_v56 = vpop.f32.mrf.mxu2  ;;  %v3915_v20 = vadd.f32 %v1606_v43, %v1512_v31  ;;  %v1001_v43 = vadd.f32 %v1000_v49, %v3677_v9 }
 0x15f   : > { %2891 = vmatmul.msk.bf16.gmra.mxu1 %vm683_vm4, %v3894_v52  ;;  %v1379_v55 = vadd.f32 %v1318_v56, %v998_v12  ;;  %v3933_v6 = vpack.c.b16 %v1559_v11, %v1558_v21 }
 0x162   : > { %v1608_v53 = vpop.f32.mrf.mxu0 }
 0x163   : > { %v1452_v4 = vpop.f32.mrf.mxu3  ;;  %2924 = vmatmul.msk.bf16.gmra.mxu2 %vm683_vm4, %v3917_v22 }
 0x164   : > { %v1002_v33 = vpop.f32.mrf.mxu1  ;;  %v1513_v15 = vadd.f32 %v1452_v4, %v1379_v55 }
 0x165   : > { %v1003_v9 = vadd.f32 %v1002_v33, %v3694_v29 }
 0x166   : > { %v1321_v50 = vpop.f32.mrf.mxu2  ;;  %v3929_v23 = vadd.f32 %v1608_v53, %v1513_v15 }
 0x167   : > { %v1380_v38 = vadd.f32 %v1321_v50, %v1001_v43 }
 0x168   : > { %2945 = vmatmul.msk.bf16.gmra.mxu3 %vm683_vm4, %v3926_v41 }
 0x16a   : > { %v1611_v59 = vpop.f32.mrf.mxu0 }
 0x16b   : > { %v1455_v31 = vpop.f32.mrf.mxu3 }
 0x16c   : > { %v1005_v12 = vpop.f32.mrf.mxu1  ;;  %v1514_v56 = vadd.f32 %v1455_v31, %v1380_v38 }
 0x16d   : > { %2962 = vmatmul.msk.bf16.gmra.mxu0 %vm683_vm4, %v3933_v6  ;;  %v1006_v10 = vadd.f32 %v1005_v12, %v3577_v3 }
 0x16e   : > { %v1323_v49 = vpop.f32.mrf.mxu2  ;;  %v3940_v36 = vadd.f32 %v1611_v59, %v1514_v56 }
 0x16f   : > { %2965 = vmatmul.msk.bf16.vlgmr.msra.gmra.mxu1 %vm683_vm4, %v3513_v44  ;;  %v1381_v26 = vadd.f32 %v1323_v49, %v1003_v9 }
 0x172   : > { %v1613_v45 = vpop.f32.mrf.mxu0 }
 0x173   : > { %v1457_v55 = vpop.f32.mrf.mxu3  ;;  %2986 = vmatmul.msk.bf16.vlgmr.msra.gmra.mxu2 %vm683_vm4, %v3525_v14 }
 0x174   : > { %v1007_v53 = vpop.f32.mrf.mxu1  ;;  %v1515_v42 = vadd.f32 %v1457_v55, %v1381_v26 }
 0x175   : > { %v1008_v14 = vadd.f32 %v1007_v53, %v3599_v17 }
 0x176   : > { %v1326_v4 = vpop.f32.mrf.mxu2  ;;  %v3945_v15 = vadd.f32 %v1613_v45, %v1515_v42 }
 0x177   : > { %v1382_v29 = vadd.f32 %v1326_v4, %v1006_v10 }
 0x178   : > { %3003 = vmatmul.msk.bf16.vlgmr.msra.gmra.mxu3 %vm683_vm4, %v3416_v18 }
 0x17a   : > { %v1616_v44 = vpop.f32.mrf.mxu0 }
 0x17b   : > { %v1460_v33 = vpop.f32.mrf.mxu3 }
 0x17c   : > { %v1010_v43 = vpop.f32.mrf.mxu1  ;;  %v1516_v21 = vadd.f32 %v1460_v33, %v1382_v29 }
 0x17d   : > { %3021 = vmatmul.msk.bf16.vlgmr.msra.gmra.mxu0 %vm683_vm4, %v3539_v32  ;;  %v1011_v12 = vadd.f32 %v1010_v43, %v3621_v54 }
 0x17e   : > { %v1328_v11 = vpop.f32.mrf.mxu2  ;;  %v3954_v3 = vadd.f32 %v1616_v44, %v1516_v21 }
 0x17f   : > { %2966 = vmatmul.msk.bf16.gmra.mxu1 %vm683_vm4, %v3539_v32  ;;  %v1383_v50 = vadd.f32 %v1328_v11, %v1008_v14 }
 0x182   : > { %v1618_v38 = vpop.f32.mrf.mxu0 }
 0x183   : > { %v1462_v59 = vpop.f32.mrf.mxu3  ;;  %2987 = vmatmul.msk.bf16.gmra.mxu2 %vm683_vm4, %v3545_v13 }
 0x184   : > { %v1012_v18 = vpop.f32.mrf.mxu1  ;;  %v1517_v31 = vadd.f32 %v1462_v59, %v1383_v50 }
 0x185   : > { %v1013_v13 = vadd.f32 %v1012_v18, %v3643_v30 }
 0x186   : > { %v1331_v56 = vpop.f32.mrf.mxu2  ;;  %v3959_v9 = vadd.f32 %v1618_v38, %v1517_v31 }
 0x187   : > { %v1384_v17 = vadd.f32 %v1331_v56, %v1011_v12 }
 0x188   : > { %3004 = vmatmul.msk.bf16.gmra.mxu3 %vm683_vm4, %v3506_v1 }
 0x18a   : > { %v1621_v32 = vpop.f32.mrf.mxu0 }
 0x18b   : > { %v1465_v49 = vpop.f32.mrf.mxu3 }
 0x18c   : > { %v1015_v26 = vpop.f32.mrf.mxu1  ;;  %v1518_v45 = vadd.f32 %v1465_v49, %v1384_v17 }
 0x18d   : > { %3022 = vmatmul.msk.bf16.gmra.mxu0 %vm683_vm4, %v3559_v34  ;;  %v1016_v29 = vadd.f32 %v1015_v26, %v3660_v60  ;;  %v5003_v26 = vld [vmem:[#allocation29_spill] sm:$0xff] }
 0x18e   : > { %v1333_v55 = vpop.f32.mrf.mxu2  ;;  %v3968_v54 = vadd.f32 %v1621_v32, %v1518_v45 }
 0x18f   : > { %2967 = vmatmul.msk.bf16.gmra.mxu1 %vm683_vm4, %v3559_v34  ;;  %v1385_v53 = vadd.f32 %v1333_v55, %v1013_v13 }
 0x192   : > { %v1623_v42 = vpop.f32.mrf.mxu0 }
 0x193   : > { %v1467_v10 = vpop.f32.mrf.mxu3  ;;  %2988 = vmatmul.msk.bf16.gmra.mxu2 %vm683_vm4, %v3567_v37 }
 0x194   : > { %v1017_v1 = vpop.f32.mrf.mxu1  ;;  %v1519_v4 = vadd.f32 %v1467_v10, %v1385_v53 }
 0x195   : > { %v1018_v37 = vadd.f32 %v1017_v1, %v3679_v8  ;;  %v5005_v1 = vld [vmem:[#allocation17_spill] sm:$0xff] }
 0x196   : > { %v1336_v44 = vpop.f32.mrf.mxu2  ;;  %v3973_v33 = vadd.f32 %v1623_v42, %v1519_v4  ;;  %v5004_v42 = vld [vmem:[#allocation19_spill] sm:$0xff] }
 0x197   : > { %v1386_v30 = vadd.f32 %v1336_v44, %v1016_v29 }
 0x198   : > { %3005 = vmatmul.msk.bf16.gmra.mxu3 %vm683_vm4, %v3180_v58 }
 0x19a   : > { %v1626_v34 = vpop.f32.mrf.mxu0 }
 0x19b   : > { %v1470_v43 = vpop.f32.mrf.mxu3 }
 0x19c   : > { %v1020_v21 = vpop.f32.mrf.mxu1  ;;  %v1520_v14 = vadd.f32 %v1470_v43, %v1386_v30 }
 0x19d   : > { %3023 = vmatmul.msk.bf16.gmra.mxu0 %vm683_vm4, %v3587_v5  ;;  %v1021_v31 = vadd.f32 %v1020_v21, %v3701_v63 }
 0x19e   : > { %v1338_v11 = vpop.f32.mrf.mxu2  ;;  %v3982_v60 = vadd.f32 %v1626_v34, %v1520_v14  ;;  %v5006_v34 = vld [vmem:[#allocation10_spill] sm:$0xff] }
 0x19f   : > { %2968 = vmatmul.msk.bf16.gmra.mxu1 %vm683_vm4, %v3587_v5  ;;  %v1387_v50 = vadd.f32 %v1338_v11, %v1018_v37  ;;  %v5007_v37 = vld [vmem:[#allocation22_spill] sm:$0xff] }
 0x1a0   : > { %v5008_v11 = vld [vmem:[#allocation18_spill] sm:$0xff] }
 0x1a2   : > { %v1628_v38 = vpop.f32.mrf.mxu0 }
 0x1a3   : > { %v1472_v59 = vpop.f32.mrf.mxu3  ;;  %2989 = vmatmul.msk.bf16.gmra.mxu2 %vm683_vm4, %v3595_v57 }
 0x1a4   : > { %v1022_v58 = vpop.f32.mrf.mxu1  ;;  %v1521_v18 = vadd.f32 %v1472_v59, %v1387_v50 }
 0x1a5   : > { %v1023_v57 = vadd.f32 %v1022_v58, %v5003_v26 }
 0x1a6   : > { %v1341_v12 = vpop.f32.mrf.mxu2  ;;  %v3987_v56 = vadd.f32 %v1628_v38, %v1521_v18 }
 0x1a7   : > { %v1388_v8 = vadd.f32 %v1341_v12, %v1021_v31  ;;  %v5009_v12 = vld [vmem:[#allocation23_spill] sm:$0xff] }
 0x1a8   : > { %3006 = vmatmul.msk.bf16.gmra.mxu3 %vm683_vm4, %v3262_v40 }
 0x1aa   : > { %v1631_v5 = vpop.f32.mrf.mxu0 }
 0x1ab   : > { %v1475_v17 = vpop.f32.mrf.mxu3 }
 0x1ac   : > { %v1025_v32 = vpop.f32.mrf.mxu1  ;;  %v1522_v49 = vadd.f32 %v1475_v17, %v1388_v8  ;;  %v5010_v17 = vld [vmem:[#allocation20_spill] sm:$0xff] }
 0x1ad   : > { %3024 = vmatmul.msk.bf16.gmra.mxu0 %vm683_vm4, %v3619_v47  ;;  %v1026_v4 = vadd.f32 %v1025_v32, %v5005_v1 }
 0x1ae   : > { %v1343_v45 = vpop.f32.mrf.mxu2  ;;  %v3996_v63 = vadd.f32 %v1631_v5, %v1522_v49 }
 0x1af   : > { %2969 = vmatmul.msk.bf16.gmra.mxu1 %vm683_vm4, %v3619_v47  ;;  %v1389_v13 = vadd.f32 %v1343_v45, %v1023_v57  ;;  %v5011_v45 = vld [vmem:[#allocation16_spill] sm:$0xff] }
 0x1b2   : > { %v1633_v55 = vpop.f32.mrf.mxu0 }
 0x1b3   : > { %v1477_v53 = vpop.f32.mrf.mxu3  ;;  %2990 = vmatmul.msk.bf16.gmra.mxu2 %vm683_vm4, %v5004_v42 }
 0x1b4   : > { %v1027_v40 = vpop.f32.mrf.mxu1  ;;  %v1523_v10 = vadd.f32 %v1477_v53, %v1389_v13 }
 0x1b5   : > { %v1028_v50 = vadd.f32 %v1027_v40, %v5008_v11  ;;  %v5012_v40 = vld [vmem:[#allocation25_spill] sm:$0xff] }
 0x1b6   : > { %v1346_v29 = vpop.f32.mrf.mxu2  ;;  %v4001_v44 = vadd.f32 %v1633_v55, %v1523_v10  ;;  %v5013_v10 = vld [vmem:[#allocation21_spill] sm:$0xff] }
 0x1b7   : > { %v1390_v30 = vadd.f32 %v1346_v29, %v1026_v4 }
 0x1b8   : > { %3007 = vmatmul.msk.bf16.gmra.mxu3 %vm683_vm4, %v5006_v34 }
 0x1ba   : > { %v1636_v47 = vpop.f32.mrf.mxu0 }
 0x1bb   : > { %v1480_v43 = vpop.f32.mrf.mxu3 }
 0x1bc   : > { %v1030_v21 = vpop.f32.mrf.mxu1  ;;  %v1524_v14 = vadd.f32 %v1480_v43, %v1390_v30  ;;  %v5014_v43 = vld [vmem:[#allocation27_spill] sm:$0xff] }
 0x1bd   : > { %3025 = vmatmul.msk.bf16.gmra.mxu0 %vm683_vm4, %v5007_v37  ;;  %v1031_v32 = vadd.f32 %v1030_v21, %v5010_v17  ;;  %v5017_v17 = vld [vmem:[#allocation30_spill] sm:$0xff] }
 0x1be   : > { %v1348_v38 = vpop.f32.mrf.mxu2  ;;  %v4010_v59 = vadd.f32 %v1636_v47, %v1524_v14 }
 0x1bf   : > { %2970 = vmatmul.msk.bf16.gmra.mxu1 %vm683_vm4, %v5007_v37  ;;  %v1391_v58 = vadd.f32 %v1348_v38, %v1028_v50  ;;  %v5015_v37 = vld [vmem:[#allocation24_spill] sm:$0xff] }
 0x1c2   : > { %v1638_v18 = vpop.f32.mrf.mxu0 }
 0x1c3   : > { %v1482_v31 = vpop.f32.mrf.mxu3  ;;  %2991 = vmatmul.msk.bf16.gmra.mxu2 %vm683_vm4, %v5009_v12 }
 0x1c4   : > { %v1032_v8 = vpop.f32.mrf.mxu1  ;;  %v1525_v5 = vadd.f32 %v1482_v31, %v1391_v58 }
 0x1c5   : > { %v1033_v1 = vadd.f32 %v1032_v8, %v5013_v10  ;;  %v5019_v10 = vld [vmem:[#allocation28_spill] sm:$0xff] }
 0x1c6   : > { %v1351_v49 = vpop.f32.mrf.mxu2  ;;  %v4015_v26 = vadd.f32 %v1638_v18, %v1525_v5  ;;  %v5016_v18 = vld [vmem:[#allocation4_spill] sm:$0xff] }
 0x1c7   : > { %v1392_v57 = vadd.f32 %v1351_v49, %v1031_v32  ;;  %v5018_v32 = vld [vmem:[#allocation26_spill] sm:$0xff] }
 0x1c8   : > { %3008 = vmatmul.msk.bf16.gmra.mxu3 %vm683_vm4, %v5011_v45 }
 0x1ca   : > { %v1641_v13 = vpop.f32.mrf.mxu0 }
 0x1cb   : > { %v1485_v55 = vpop.f32.mrf.mxu3 }
 0x1cc   : > { %v1035_v53 = vpop.f32.mrf.mxu1  ;;  %v1526_v42 = vadd.f32 %v1485_v55, %v1392_v57 }
 0x1cd   : > { %3026 = vmatmul.msk.bf16.gmra.mxu0 %vm683_vm4, %v5012_v40  ;;  %v1036_v11 = vadd.f32 %v1035_v53, %v5015_v37  ;;  %v5020_v37 = vld [vmem:[#allocation31_spill] sm:$0xff] }
 0x1ce   : > { %v1353_v4 = vpop.f32.mrf.mxu2  ;;  %v4024_v29 = vadd.f32 %v1641_v13, %v1526_v42 }
 0x1cf   : > { %2971 = vmatmul.msk.bf16.gmra.mxu1 %vm683_vm4, %v5012_v40  ;;  %v1393_v30 = vadd.f32 %v1353_v4, %v1033_v1 }
 0x1d2   : > { %v1643_v34 = vpop.f32.mrf.mxu0 }
 0x1d3   : > { %v1487_v47 = vpop.f32.mrf.mxu3  ;;  %2992 = vmatmul.msk.bf16.gmra.mxu2 %vm683_vm4, %v5014_v43 }
 0x1d4   : > { %v1037_v21 = vpop.f32.mrf.mxu1  ;;  %v1527_v14 = vadd.f32 %v1487_v47, %v1393_v30 }
 0x1d5   : > { %v1038_v49 = vadd.f32 %v1037_v21, %v5018_v32 }
 0x1d6   : > { %v1356_v50 = vpop.f32.mrf.mxu2  ;;  %v4029_v38 = vadd.f32 %v1643_v34, %v1527_v14 }
 0x1d7   : > { %v1394_v58 = vadd.f32 %v1356_v50, %v1036_v11 }
 0x1d8   : > { %3009 = vmatmul.msk.bf16.gmra.mxu3 %vm683_vm4, %v5016_v18 }
 0x1da   : > { %v1646_v31 = vpop.f32.mrf.mxu0 }
 0x1db   : > { %v1490_v12 = vpop.f32.mrf.mxu3 }
 0x1dc   : > { %v1040_v8 = vpop.f32.mrf.mxu1  ;;  %v1528_v5 = vadd.f32 %v1490_v12, %v1394_v58 }
 0x1dd   : > { %3027 = vmatmul.msk.bf16.gmra.mxu0 %vm683_vm4, %v5017_v17  ;;  %v1041_v1 = vadd.f32 %v1040_v8, %v5019_v10 }
 0x1de   : > { %v1358_v57 = vpop.f32.mrf.mxu2  ;;  %v4038_v45 = vadd.f32 %v1646_v31, %v1528_v5 }
 0x1df   : > { %2972 = vmatmul.msk.bf16.gmra.mxu1 %vm683_vm4, %v5017_v17  ;;  %v1395_v13 = vadd.f32 %v1358_v57, %v1038_v49 }
 0x1e2   : > { %v1648_v55 = vpop.f32.mrf.mxu0 }
 0x1e3   : > { %v1492_v53 = vpop.f32.mrf.mxu3  ;;  %2993 = vmatmul.msk.bf16.gmra.mxu2 %vm683_vm4, %v3731_v48 }
 0x1e4   : > { %v1042_v42 = vpop.f32.mrf.mxu1  ;;  %v1529_v40 = vadd.f32 %v1492_v53, %v1395_v13 }
 0x1e5   : > { %v1043_v48 = vadd.f32 %v1042_v42, %v5020_v37 }
 0x1e6   : > { %v1361_v4 = vpop.f32.mrf.mxu2  ;;  %v4043_v30 = vadd.f32 %v1648_v55, %v1529_v40 }
 0x1e7   : > { %v1396_v34 = vadd.f32 %v1361_v4, %v1041_v1 }
 0x1e8   : > { %3010 = vmatmul.msk.bf16.gmra.mxu3 %vm683_vm4, %v3284_v0 }
 0x1ea   : > { %v1651_v47 = vpop.f32.mrf.mxu0 }
 0x1eb   : > { %v1495_v43 = vpop.f32.mrf.mxu3 }
 0x1ec   : > { %v1716_v21 = vpop.f32.mrf.mxu1  ;;  %v1530_v14 = vadd.f32 %v1495_v43, %v1396_v34 }
 0x1ed   : > { %3028 = vmatmul.msk.bf16.gmra.mxu0 %vm683_vm4, %v3748_v2  ;;  %v1796_v8 = vadd.f32 %v1716_v21, %v3746_v61 }
 0x1ee   : > { %v1363_v11 = vpop.f32.mrf.mxu2  ;;  %v4052_v50 = vadd.f32 %v1651_v47, %v1530_v14 }
 0x1ef   : > { %2973 = vmatmul.msk.bf16.gmra.mxu1 %vm683_vm4, %v3748_v2  ;;  %v1397_v58 = vadd.f32 %v1363_v11, %v1043_v48 }
 0x1f2   : > { %v1653_v18 = vpop.f32.mrf.mxu0 }
 0x1f3   : > { %v1497_v31 = vpop.f32.mrf.mxu3  ;;  %2994 = vmatmul.msk.bf16.gmra.mxu2 %vm683_vm4, %v3755_v28 }
 0x1f4   : > { %v1718_v0 = vpop.f32.mrf.mxu1  ;;  %v1531_v12 = vadd.f32 %v1497_v31, %v1397_v58  ;;  %v5021_v31 = vld [vmem:[#allocation33_spill] sm:$0xff] }
 0x1f6   : > { %v1850_v5 = vpop.f32.mrf.mxu2  ;;  %v4057_v17 = vadd.f32 %v1653_v18, %v1531_v12  ;;  %v5022_v12 = vld [vmem:[#allocation11_spill] sm:$0xff] }
 0x1f7   : > { %v1930_v32 = vadd.f32 %v1850_v5, %v1796_v8 }
 0x1f8   : > { %3011 = vmatmul.msk.bf16.gmra.mxu3 %vm683_vm4, %v3372_v24  ;;  %v1797_v24 = vadd.f32 %v1718_v0, %v3759_v39 }
 0x1fa   : > { %v2146_v2 = vpop.f32.mrf.mxu0 }
 0x1fb   : > { %v2006_v49 = vpop.f32.mrf.mxu3 }
 0x1fc   : > { %v1721_v57 = vpop.f32.mrf.mxu1  ;;  %v2086_v13 = vadd.f32 %v2006_v49, %v1930_v32 }
 0x1fd   : > { %3029 = vmatmul.msk.bf16.gmra.mxu0 %vm683_vm4, %v3774_v51  ;;  %v1798_v34 = vadd.f32 %v1721_v57, %v3772_v7 }
 0x1fe   : > { %v2226_v61 = vadd.f32 %v2146_v2, %v2086_v13  ;;  %v1852_v28 = vpop.f32.mrf.mxu2 }
 0x1ff   : > { %2974 = vmatmul.msk.bf16.gmra.mxu1 %vm683_vm4, %v3774_v51  ;;  %v1931_v55 = vadd.f32 %v1852_v28, %v1797_v24  ;;  %v5023_v28 = vld [vmem:[#allocation34_spill] sm:$0xff] }
 0x200   : > { %2261 = vst.msk [vmem:[%s4067_s19] sm:$0xff] %vm2260_vm9, %v2226_v61  ;;  %v2367_v1 = vmul.f32 %v2226_v61, %v2226_v61  ;;  %v2294_v39 = vsel %vm2260_vm9, %v2226_v61, 0.0 }
 0x202   : > { %v2148_v53 = vpop.f32.mrf.mxu0  ;;  %v2399_v14 = vsel %vm2260_vm9, %v2367_v1, 0.0 }
 0x203   : > { %v2008_v42 = vpop.f32.mrf.mxu3  ;;  %2995 = vmatmul.msk.bf16.gmra.mxu2 %vm683_vm4, %v3781_v46 }
 0x204   : > { %v1723_v40 = vpop.f32.mrf.mxu1  ;;  %v2087_v10 = vadd.f32 %v2008_v42, %v1931_v55 }
 0x205   : > { %v1799_v8 = vadd.f32 %v1723_v40, %v5022_v12  ;;  %v5024_v40 = vld [vmem:[#allocation32_spill] sm:$0xff] }
 0x206   : > { %v2227_v4 = vadd.f32 %v2148_v53, %v2087_v10  ;;  %v1855_v47 = vpop.f32.mrf.mxu2 }
 0x207   : > { %v1932_v21 = vadd.f32 %v1855_v47, %v1798_v34  ;;  %v5025_v47 = vld [vmem:[#allocation5_spill] sm:$0xff] }
 0x208   : > { %2262 = vst.msk [vmem:[%s4067_s19 + $0x8] sm:$0xff] %vm2260_vm9, %v2227_v4  ;;  %v2295_v51 = vsel %vm2260_vm9, %v2227_v4, 0.0  ;;  %v2368_v43 = vmul.f32 %v2227_v4, %v2227_v4  ;;  %3012 = vmatmul.msk.bf16.gmra.mxu3 %vm683_vm4, %v3458_v35 }
 0x209   : > { %v2296_v46 = vadd.f32 %v2295_v51, %v2294_v39 }
 0x20a   : > { %v2400_v37 = vsel %vm2260_vm9, %v2368_v43, 0.0  ;;  %v2151_v48 = vpop.f32.mrf.mxu0 }
 0x20b   : > { %v2401_v7 = vadd.f32 %v2400_v37, %v2399_v14  ;;  %v2011_v11 = vpop.f32.mrf.mxu3 }
 0x20c   : > { %v1726_v58 = vpop.f32.mrf.mxu1  ;;  %v2088_v18 = vadd.f32 %v2011_v11, %v1932_v21 }
 0x20d   : > { %3030 = vmatmul.msk.bf16.gmra.mxu0 %vm683_vm4, %v5021_v31  ;;  %v1800_v10 = vadd.f32 %v1726_v58, %v5024_v40  ;;  %v5027_v58 = vld [vmem:[#allocation35_spill] sm:$0xff] }
 0x20e   : > { %v2228_v0 = vadd.f32 %v2151_v48, %v2088_v18  ;;  %v1857_v5 = vpop.f32.mrf.mxu2 }
 0x20f   : > { %2975 = vmatmul.msk.bf16.gmra.mxu1 %vm683_vm4, %v5021_v31  ;;  %v1933_v2 = vadd.f32 %v1857_v5, %v1799_v8 }
 0x210   : > { %2263 = vst.msk [vmem:[%s4067_s19 + $0x10] sm:$0xff] %vm2260_vm9, %v2228_v0  ;;  %v2297_v35 = vsel %vm2260_vm9, %v2228_v0, 0.0  ;;  %v2369_v32 = vmul.f32 %v2228_v0, %v2228_v0 }
 0x211   : > { %v2298_v49 = vadd.f32 %v2297_v35, %v2296_v46 }
 0x212   : > { %v2402_v57 = vsel %vm2260_vm9, %v2369_v32, 0.0  ;;  %v2153_v13 = vpop.f32.mrf.mxu0 }
 0x213   : > { %v2403_v61 = vadd.f32 %v2402_v57, %v2401_v7  ;;  %v2013_v24 = vpop.f32.mrf.mxu3  ;;  %2996 = vmatmul.msk.bf16.gmra.mxu2 %vm683_vm4, %v5023_v28  ;;  %v5026_v7 = vld [vmem:[#allocation37_spill] sm:$0xff]  ;;  %v5028_v57 = vld [vmem:[#allocation38_spill] sm:$0xff]  ;;  %v5029_v28 = vld [vmem:[#allocation36_spill] sm:$0xff] }
 0x214   : > { %v1728_v55 = vpop.f32.mrf.mxu1  ;;  %v2089_v53 = vadd.f32 %v2013_v24, %v1933_v2 }
 0x215   : > { %v1801_v18 = vadd.f32 %v1728_v55, %v5027_v58 }
 0x216   : > { %v2229_v42 = vadd.f32 %v2153_v13, %v2089_v53  ;;  %v1860_v1 = vpop.f32.mrf.mxu2 }
 0x217   : > { %v1934_v39 = vadd.f32 %v1860_v1, %v1800_v10  ;;  %v5030_v10 = vld [vmem:[#allocation6_spill] sm:$0xff] }
 0x218   : > { %2264 = vst.msk [vmem:[%s4067_s19 + $0x18] sm:$0xff] %vm2260_vm9, %v2229_v42  ;;  %v2299_v4 = vsel %vm2260_vm9, %v2229_v42, 0.0  ;;  %v2370_v34 = vmul.f32 %v2229_v42, %v2229_v42  ;;  %3013 = vmatmul.msk.bf16.gmra.mxu3 %vm683_vm4, %v5025_v47 }
 0x219   : > { %v2300_v51 = vadd.f32 %v2299_v4, %v2298_v49 }
 0x21a   : > { %v2404_v43 = vsel %vm2260_vm9, %v2370_v34, 0.0  ;;  %v2156_v21 = vpop.f32.mrf.mxu0 }
 0x21b   : > { %v2405_v46 = vadd.f32 %v2404_v43, %v2403_v61  ;;  %v2016_v14 = vpop.f32.mrf.mxu3 }
 0x21c   : > { %v1731_v37 = vpop.f32.mrf.mxu1  ;;  %v2090_v48 = vadd.f32 %v2016_v14, %v1934_v39 }
 0x21d   : > { %3031 = vmatmul.msk.bf16.gmra.mxu0 %vm683_vm4, %v5026_v7  ;;  %v1802_v55 = vadd.f32 %v1731_v37, %v5029_v28  ;;  %v5032_v37 = vld [vmem:[#allocation39_spill] sm:$0xff] }
 0x21e   : > { %v2230_v11 = vadd.f32 %v2156_v21, %v2090_v48  ;;  %v1862_v31 = vpop.f32.mrf.mxu2 }
 0x21f   : > { %2976 = vmatmul.msk.bf16.gmra.mxu1 %vm683_vm4, %v5026_v7  ;;  %v1935_v8 = vadd.f32 %v1862_v31, %v1801_v18 }
 0x220   : > { %2265 = vst.msk [vmem:[%s4067_s19 + $0x20] sm:$0xff] %vm2260_vm9, %v2230_v11  ;;  %v2301_v0 = vsel %vm2260_vm9, %v2230_v11, 0.0  ;;  %v2371_v12 = vmul.f32 %v2230_v11, %v2230_v11 }
 0x221   : > { %v2302_v5 = vadd.f32 %v2301_v0, %v2300_v51 }
 0x222   : > { %v2406_v35 = vsel %vm2260_vm9, %v2371_v12, 0.0  ;;  %v2158_v32 = vpop.f32.mrf.mxu0 }
 0x223   : > { %v2407_v2 = vadd.f32 %v2406_v35, %v2405_v46  ;;  %v2018_v49 = vpop.f32.mrf.mxu3  ;;  %2997 = vmatmul.msk.bf16.gmra.mxu2 %vm683_vm4, %v5028_v57  ;;  %v5031_v46 = vld [vmem:[#allocation41_spill] sm:$0xff]  ;;  %v5033_v35 = vld [vmem:[#allocation8_spill] sm:$0xff] }
 0x224   : > { %v1733_v13 = vpop.f32.mrf.mxu1  ;;  %v2091_v61 = vadd.f32 %v2018_v49, %v1935_v8  ;;  %v5034_v57 = vld [vmem:[#allocation40_spill] sm:$0xff] }
 0x225   : > { %v1803_v48 = vadd.f32 %v1733_v13, %v5032_v37 }
 0x226   : > { %v2231_v24 = vadd.f32 %v2158_v32, %v2091_v61  ;;  %v1865_v53 = vpop.f32.mrf.mxu2 }
 0x227   : > { %v1936_v1 = vadd.f32 %v1865_v53, %v1802_v55  ;;  %v5035_v55 = vld [vmem:[#allocation12_spill] sm:$0xff] }
 0x228   : > { %2266 = vst.msk [vmem:[%s4067_s19 + $0x28] sm:$0xff] %vm2260_vm9, %v2231_v24  ;;  %v2303_v42 = vsel %vm2260_vm9, %v2231_v24, 0.0  ;;  %v2372_v40 = vmul.f32 %v2231_v24, %v2231_v24  ;;  %3014 = vmatmul.msk.bf16.gmra.mxu3 %vm683_vm4, %v5030_v10 }
 0x229   : > { %v2304_v4 = vadd.f32 %v2303_v42, %v2302_v5 }
 0x22a   : > { %v2408_v34 = vsel %vm2260_vm9, %v2372_v40, 0.0  ;;  %v2161_v47 = vpop.f32.mrf.mxu0 }
 0x22b   : > { %v2409_v39 = vadd.f32 %v2408_v34, %v2407_v2  ;;  %v2021_v51 = vpop.f32.mrf.mxu3 }
 0x22c   : > { %v1736_v43 = vpop.f32.mrf.mxu1  ;;  %v2092_v21 = vadd.f32 %v2021_v51, %v1936_v1 }
 0x22d   : > { %3032 = vmatmul.msk.bf16.gmra.mxu0 %vm683_vm4, %v5031_v46  ;;  %v1804_v13 = vadd.f32 %v1736_v43, %v5034_v57  ;;  %v5037_v43 = vld [vmem:[#allocation9_spill] sm:$0xff] }
 0x22e   : > { %v2232_v14 = vadd.f32 %v2161_v47, %v2092_v21  ;;  %v1867_v7 = vpop.f32.mrf.mxu2 }
 0x22f   : > { %2977 = vmatmul.msk.bf16.gmra.mxu1 %vm683_vm4, %v5031_v46  ;;  %v1937_v18 = vadd.f32 %v1867_v7, %v1803_v48 }
 0x230   : > { %2267 = vst.msk [vmem:[%s4067_s19 + $0x30] sm:$0xff] %vm2260_vm9, %v2232_v14  ;;  %v2305_v11 = vsel %vm2260_vm9, %v2232_v14, 0.0  ;;  %v2373_v58 = vmul.f32 %v2232_v14, %v2232_v14 }
 0x231   : > { %v2306_v31 = vadd.f32 %v2305_v11, %v2304_v4 }
 0x232   : > { %v2410_v0 = vsel %vm2260_vm9, %v2373_v58, 0.0  ;;  %v2163_v12 = vpop.f32.mrf.mxu0 }
 0x233   : > { %v2411_v8 = vadd.f32 %v2410_v0, %v2409_v39  ;;  %v2023_v5 = vpop.f32.mrf.mxu3  ;;  %2998 = vmatmul.msk.bf16.gmra.mxu2 %vm683_vm4, %v5033_v35  ;;  %v5036_v39 = vld [vmem:[#allocation43_spill] sm:$0xff] }
 0x234   : > { %v1738_v32 = vpop.f32.mrf.mxu1  ;;  %v2093_v2 = vadd.f32 %v2023_v5, %v1937_v18  ;;  %v5038_v5 = vld [vmem:[#allocation42_spill] sm:$0xff] }
 0x235   : > { %v1805_v21 = vadd.f32 %v1738_v32, %v5037_v43 }
 0x236   : > { %v2233_v49 = vadd.f32 %v2163_v12, %v2093_v2  ;;  %v1870_v61 = vpop.f32.mrf.mxu2 }
 0x237   : > { %v1938_v53 = vadd.f32 %v1870_v61, %v1804_v13  ;;  %v4157_v13 = vld [vmem:[%s3132_s21 + $0xcc] sm:$0xf] }
 0x238   : > { %2268 = vst.msk [vmem:[%s4067_s19 + $0x38] sm:$0xff] %vm2260_vm9, %v2233_v49  ;;  %v2307_v24 = vsel %vm2260_vm9, %v2233_v49, 0.0  ;;  %v2374_v28 = vmul.f32 %v2233_v49, %v2233_v49  ;;  %3015 = vmatmul.msk.bf16.gmra.mxu3 %vm683_vm4, %v5035_v55 }
 0x239   : > { %v2308_v42 = vadd.f32 %v2307_v24, %v2306_v31 }
 0x23a   : > { %v2412_v40 = vsel %vm2260_vm9, %v2374_v28, 0.0  ;;  %v2166_v10 = vpop.f32.mrf.mxu0  ;;  %v5039_v28 = vld [vmem:[#allocation44_spill] sm:$0xff] }
 0x23b   : > { %v2413_v1 = vadd.f32 %v2412_v40, %v2411_v8  ;;  %v2026_v4 = vpop.f32.mrf.mxu3  ;;  %v1691_v55 = vrot.slane %v5039_v28, 5 }
 0x23c   : > { %v1741_v34 = vpop.f32.mrf.mxu1  ;;  %v2094_v47 = vadd.f32 %v2026_v4, %v1938_v53  ;;  %v4162_v53 = vld [vmem:[%s3132_s21 + $0xd0] sm:$0xf] }
 0x23d   : > { %3033 = vmatmul.msk.bf16.gmra.mxu0 %vm683_vm4, %v5036_v39  ;;  %v1806_v35 = vadd.f32 %v1741_v34, %v5038_v5  ;;  %v5040_v34 = vld [vmem:[#allocation7_spill] sm:$0xff]  ;;  %v244_v5 = vld [vmem:[%s3132_s21 + $0xd4] sm:$0x1] }
 0x23e   : > { %v2234_v51 = vadd.f32 %v2166_v10, %v2094_v47  ;;  %v1872_v46 = vpop.f32.mrf.mxu2  ;;  %v2963_v47 = vrot.slane %v5040_v34, 9  ;;  %v1982_v28 = vshll.u32 %v244_v5, 16 }
 0x23f   : > { %2978 = vmatmul.msk.bf16.gmra.mxu1 %vm683_vm4, %v5036_v39  ;;  %v1939_v48 = vadd.f32 %v1872_v46, %v1805_v21  ;;  %v1972_v39 = vshll.u32 %v4162_v53, 16 }
 0x240   : > { %2269 = vst.msk [vmem:[%s4067_s19 + $0x40] sm:$0xff] %vm2260_vm9, %v2234_v51  ;;  %v2309_v14 = vsel %vm2260_vm9, %v2234_v51, 0.0  ;;  %v2375_v37 = vmul.f32 %v2234_v51, %v2234_v51  ;;  %v1976_v51 = vshrl.u32 %v4162_v53, 16 }
 0x241   : > { %v2310_v7 = vadd.f32 %v2309_v14, %v2308_v42  ;;  %v1693_v14 = vrot.slane %v1691_v55, 4 }
 0x242   : > { %v2414_v11 = vsel %vm2260_vm9, %v2375_v37, 0.0  ;;  %v2168_v58 = vpop.f32.mrf.mxu0  ;;  %v1694_v37 = vrot.slane %v3901_v19, 5 }
 0x243   : > { %v2415_v18 = vadd.f32 %v2414_v11, %v2413_v1  ;;  %v2028_v31 = vpop.f32.mrf.mxu3  ;;  %2999 = vmatmul.msk.bf16.gmra.mxu2 %vm683_vm4, %v3894_v52  ;;  %v1963_v1 = vshrl.u32 %v4157_v13, 16 }
 0x244   : > { %v1743_v0 = vpop.f32.mrf.mxu1  ;;  %v2095_v12 = vadd.f32 %v2028_v31, %v1939_v48  ;;  %v1695_v19 = vsel %vm3478_vm8, %v1693_v14, %v1694_v37 }
 0x245   : > { %v1807_v21 = vadd.f32 %v1743_v0, %v3898_v27  ;;  %v1965_v48 = vrot.slane %v1963_v1, 4 }
 0x246   : > { %v2235_v8 = vadd.f32 %v2168_v58, %v2095_v12  ;;  %v1875_v32 = vpop.f32.mrf.mxu2  ;;  %v1974_v12 = vrot.slane %v1972_v39, 5 }
 0x247   : > { %v1940_v57 = vadd.f32 %v1875_v32, %v1806_v35 }
 0x248   : > { %2270 = vst.msk [vmem:[%s4067_s19 + $0x48] sm:$0xff] %vm2260_vm9, %v2235_v8  ;;  %v2311_v2 = vsel %vm2260_vm9, %v2235_v8, 0.0  ;;  %v2376_v49 = vmul.f32 %v2235_v8, %v2235_v8  ;;  %3016 = vmatmul.msk.bf16.gmra.mxu3 %vm683_vm4, %v3486_v62  ;;  %v1966_v62 = vshll.u32 %v4157_v13, 16  ;;  %v1978_v8 = vrot.slane %v1976_v51, 4 }
 0x249   : > { %v2312_v61 = vadd.f32 %v2311_v2, %v2310_v7  ;;  %v1984_v51 = vrot.slane %v1982_v28, 5 }
 0x24a   : > { %v2416_v52 = vsel %vm2260_vm9, %v2376_v49, 0.0  ;;  %v2171_v24 = vpop.f32.mrf.mxu0 }
 0x24b   : > { %v2417_v42 = vadd.f32 %v2416_v52, %v2415_v18  ;;  %v2031_v40 = vpop.f32.mrf.mxu3  ;;  %v1968_v18 = vrot.slane %v1966_v62, 5  ;;  %v1699_v52 = vunpack.c.l.b16 %v1695_v19 }
 0x24c   : > { %v1746_v10 = vpop.f32.mrf.mxu1  ;;  %v2096_v4 = vadd.f32 %v2031_v40, %v1940_v57 }
 0x24d   : > { %3034 = vmatmul.msk.bf16.gmra.mxu0 %vm683_vm4, %v3917_v22  ;;  %v1969_v57 = vor.u32 %v1968_v18, %v1965_v48 }
 0x24e   : > { %v2236_v43 = vadd.f32 %v2171_v24, %v2096_v4  ;;  %v1877_v46 = vpop.f32.mrf.mxu2  ;;  %v1979_v24 = vor.u32 %v1978_v8, %v1974_v12  ;;  %v3058_v8 = vld [vmem:[%s3132_s21 + $0xcc] sm:$0xff] }
 0x24f   : > { %2979 = vmatmul.msk.bf16.gmra.mxu1 %vm683_vm4, %v3917_v22  ;;  %v1941_v58 = vadd.f32 %v1877_v46, %v1807_v21  ;;  %v1692_v22 = vsel %vm3478_vm8, %v2963_v47, %v1691_v55  ;;  %v1808_v55 = vadd.f32 %v1746_v10, %v3915_v20  ;;  %v1970_v62 = vrot.slane %v1969_v57, 4 }
 0x250   : > { %2271 = vst.msk [vmem:[%s4067_s19 + $0x50] sm:$0xff] %vm2260_vm9, %v2236_v43  ;;  %v2313_v7 = vsel %vm2260_vm9, %v2236_v43, 0.0  ;;  %v2377_v11 = vmul.f32 %v2236_v43, %v2236_v43  ;;  %v1980_v39 = vrot.slane %v1979_v24, 4  ;;  %v2121_v20 = vrot.slane %v4162_v53, 5 }
 0x251   : > { %v2314_v31 = vadd.f32 %v2313_v7, %v2312_v61  ;;  %v1698_v61 = vunpack.c.l.b16 %v1692_v22  ;;  %v3019_v7 = vrot.slane %v4157_v13, 9 }
 0x252   : > { %v2418_v27 = vsel %vm2260_vm9, %v2377_v11, 0.0  ;;  %v2173_v0 = vpop.f32.mrf.mxu0  ;;  %v1985_v48 = vsel %vm3159_vm5, %v1980_v39, %v1984_v51  ;;  %v2123_v53 = vrot.slane %v2121_v20, 4 }
 0x253   : > { %v2419_v35 = vadd.f32 %v2418_v27, %v2417_v42  ;;  %v2033_v32 = vpop.f32.mrf.mxu3  ;;  %3000 = vmatmul.msk.bf16.gmra.mxu2 %vm683_vm4, %v3926_v41  ;;  %v1700_v47 = vpack.c.b16 %v1699_v52, %v1698_v61  ;;  %v1989_v25 = vunpack.c.l.b16 %v1985_v48 }
 0x254   : > { %v1748_v2 = vpop.f32.mrf.mxu1  ;;  %v2097_v49 = vadd.f32 %v2033_v32, %v1941_v58 }
 0x255   : > { %v1809_v58 = vadd.f32 %v1748_v2, %v3929_v23  ;;  %v2122_v23 = vsel %vm3478_vm8, %v3019_v7, %v2121_v20 }
 0x256   : > { %v2237_v40 = vadd.f32 %v2173_v0, %v2097_v49  ;;  %v1880_v1 = vpop.f32.mrf.mxu2  ;;  %v2128_v52 = vunpack.c.l.b16 %v2122_v23 }
 0x257   : > { %v1942_v41 = vadd.f32 %v1880_v1, %v1808_v55 }
 0x258   : > { %2272 = vst.msk [vmem:[%s4067_s19 + $0x58] sm:$0xff] %vm2260_vm9, %v2237_v40  ;;  %v2315_v4 = vsel %vm2260_vm9, %v2237_v40, 0.0  ;;  %v2378_v42 = vmul.f32 %v2237_v40, %v2237_v40  ;;  %3017 = vmatmul.msk.bf16.gmra.mxu3 %vm683_vm4, %v3933_v6  ;;  %v1975_v6 = vsel %vm3159_vm5, %v1970_v62, %v1974_v12 }
 0x259   : > { %v2316_v34 = vadd.f32 %v2315_v4, %v2314_v31  ;;  %v2124_v31 = vrot.slane %v244_v5, 5  ;;  %v1988_v27 = vunpack.c.l.b16 %v1975_v6 }
 0x25a   : > { %v2420_v43 = vsel %vm2260_vm9, %v2378_v42, 0.0  ;;  %v2176_v21 = vpop.f32.mrf.mxu0 }
 0x25b   : > { %v2421_v10 = vadd.f32 %v2420_v43, %v2419_v35  ;;  %v2036_v46 = vpop.f32.mrf.mxu3  ;;  %v2125_v5 = vsel %vm3478_vm8, %v2123_v53, %v2124_v31  ;;  %v1990_v61 = vpack.c.b16 %v1989_v25, %v1988_v27 }
 0x25c   : > { %v1751_v14 = vpop.f32.mrf.mxu1  ;;  %v2098_v37 = vadd.f32 %v2036_v46, %v1942_v41  ;;  %v2129_v24 = vunpack.c.l.b16 %v2125_v5 }
 0x25d   : > { %3035 = vmatmul.msk.bf16.gmra.mxu0 %vm683_vm4, %v1700_v47  ;;  %v1810_v40 = vadd.f32 %v1751_v14, %v3940_v36 }
 0x25e   : > { %v2238_v11 = vadd.f32 %v2176_v21, %v2098_v37  ;;  %v1882_v18 = vpop.f32.mrf.mxu2  ;;  %v2130_v41 = vpack.c.b16 %v2129_v24, %v2128_v52 }
 0x25f   : > { %2980 = vmatmul.msk.bf16.gmra.mxu1 %vm683_vm4, %v1700_v47  ;;  %v1943_v22 = vadd.f32 %v1882_v18, %v1809_v58 }
 0x260   : > { %2273 = vst.msk [vmem:[%s4067_s19 + $0x60] sm:$0xff] %vm2260_vm9, %v2238_v11  ;;  %v2317_v12 = vsel %vm2260_vm9, %v2238_v11, 0.0  ;;  %v2379_v0 = vmul.f32 %v2238_v11, %v2238_v11 }
 0x261   : > { %v2318_v19 = vadd.f32 %v2317_v12, %v2316_v34 }
 0x262   : > { %v2422_v13 = vsel %vm2260_vm9, %v2379_v0, 0.0  ;;  %v2178_v35 = vpop.f32.mrf.mxu0 }
 0x263   : > { %v2423_v32 = vadd.f32 %v2422_v13, %v2421_v10  ;;  %v2038_v2 = vpop.f32.mrf.mxu3  ;;  %3001 = vmatmul.msk.bf16.gmra.mxu2 %vm683_vm4, %v3058_v8 }
 0x264   : > { %v1753_v49 = vpop.f32.mrf.mxu1  ;;  %v2099_v57 = vadd.f32 %v2038_v2, %v1943_v22 }
 0x265   : > { %v1811_v21 = vadd.f32 %v1753_v49, %v3945_v15 }
 0x266   : > { %v2239_v28 = vadd.f32 %v2178_v35, %v2099_v57  ;;  %v1885_v55 = vpop.f32.mrf.mxu2 }
 0x267   : > { %v1944_v4 = vadd.f32 %v1885_v55, %v1810_v40 }
 0x268   : > { %2274 = vst.msk [vmem:[%s4067_s19 + $0x68] sm:$0xff] %vm2260_vm9, %v2239_v28  ;;  %v2319_v1 = vsel %vm2260_vm9, %v2239_v28, 0.0  ;;  %v2380_v16 = vmul.f32 %v2239_v28, %v2239_v28  ;;  %3018 = vmatmul.msk.bf16.gmra.mxu3 %vm683_vm4, %v1990_v61 }
 0x269   : > { %v2320_v42 = vadd.f32 %v2319_v1, %v2318_v19 }
 0x26a   : > { %v2424_v62 = vsel %vm2260_vm9, %v2380_v16, 0.0  ;;  %v2181_v34 = vpop.f32.mrf.mxu0 }
 0x26b   : > { %v2425_v47 = vadd.f32 %v2424_v62, %v2423_v32  ;;  %v2041_v39 = vpop.f32.mrf.mxu3 }
 0x26c   : > { %v1756_v51 = vpop.f32.mrf.mxu1  ;;  %v2100_v43 = vadd.f32 %v2041_v39, %v1944_v4 }
 0x26d   : > { %3036 = vmatmul.msk.bf16.gmra.mxu0 %vm683_vm4, %v2130_v41  ;;  %v1812_v31 = vadd.f32 %v1756_v51, %v3954_v3 }
 0x26e   : > { %v2240_v36 = vadd.f32 %v2181_v34, %v2100_v43  ;;  %v1887_v20 = vpop.f32.mrf.mxu2 }
 0x26f   : > { %v1945_v14 = vadd.f32 %v1887_v20, %v1811_v21 }
 0x270   : > { %2275 = vst.msk [vmem:[%s4067_s19 + $0x70] sm:$0xff] %vm2260_vm9, %v2240_v36  ;;  %v2321_v10 = vsel %vm2260_vm9, %v2240_v36, 0.0  ;;  %v2381_v46 = vmul.f32 %v2240_v36, %v2240_v36 }
 0x271   : > { %v2322_v37 = vadd.f32 %v2321_v10, %v2320_v42 }
 0x272   : > { %v2426_v6 = vsel %vm2260_vm9, %v2381_v46, 0.0  ;;  %v2183_v48 = vpop.f32.mrf.mxu0 }
 0x273   : > { %v2427_v7 = vadd.f32 %v2426_v6, %v2425_v47  ;;  %v2043_v11 = vpop.f32.mrf.mxu3 }
 0x274   : > { %v1758_v58 = vpop.f32.mrf.mxu1  ;;  %v2101_v18 = vadd.f32 %v2043_v11, %v1945_v14 }
 0x275   : > { %v1813_v32 = vadd.f32 %v1758_v58, %v3959_v9 }
 0x276   : > { %v2241_v53 = vadd.f32 %v2183_v48, %v2101_v18  ;;  %v1890_v15 = vpop.f32.mrf.mxu2 }
 0x277   : > { %v1946_v12 = vadd.f32 %v1890_v15, %v1812_v31 }
 0x278   : > { %2276 = vst.msk [vmem:[%s4067_s19 + $0x78] sm:$0xff] %vm2260_vm9, %v2241_v53  ;;  %v2323_v8 = vsel %vm2260_vm9, %v2241_v53, 0.0  ;;  %v2382_v27 = vmul.f32 %v2241_v53, %v2241_v53 }
 0x279   : > { %v2324_v0 = vadd.f32 %v2323_v8, %v2322_v37 }
 0x27a   : > { %v2428_v22 = vsel %vm2260_vm9, %v2382_v27, 0.0  ;;  %v2186_v25 = vpop.f32.mrf.mxu0 }
 0x27b   : > { %v2429_v19 = vadd.f32 %v2428_v22, %v2427_v7  ;;  %v2046_v13 = vpop.f32.mrf.mxu3 }
 0x27c   : > { %v1761_v35 = vpop.f32.mrf.mxu1  ;;  %v2102_v23 = vadd.f32 %v2046_v13, %v1946_v12 }
 0x27d   : > { %v1814_v4 = vadd.f32 %v1761_v35, %v3968_v54 }
 0x27e   : > { %v2242_v5 = vadd.f32 %v2186_v25, %v2102_v23  ;;  %v1892_v3 = vpop.f32.mrf.mxu2 }
 0x27f   : > { %v1947_v57 = vadd.f32 %v1892_v3, %v1813_v32 }
 0x280   : > { %2277 = vst.msk [vmem:[%s4067_s19 + $0x80] sm:$0xff] %vm2260_vm9, %v2242_v5  ;;  %v2325_v2 = vsel %vm2260_vm9, %v2242_v5, 0.0  ;;  %v2383_v49 = vmul.f32 %v2242_v5, %v2242_v5 }
 0x281   : > { %v2326_v61 = vadd.f32 %v2325_v2, %v2324_v0 }
 0x282   : > { %v2430_v52 = vsel %vm2260_vm9, %v2383_v49, 0.0  ;;  %v2188_v24 = vpop.f32.mrf.mxu0 }
 0x283   : > { %v2431_v28 = vadd.f32 %v2430_v52, %v2429_v19  ;;  %v2048_v40 = vpop.f32.mrf.mxu3 }
 0x284   : > { %v1763_v55 = vpop.f32.mrf.mxu1  ;;  %v2103_v1 = vadd.f32 %v2048_v40, %v1947_v57 }
 0x285   : > { %v1815_v10 = vadd.f32 %v1763_v55, %v3973_v33 }
 0x286   : > { %v2243_v16 = vadd.f32 %v2188_v24, %v2103_v1  ;;  %v1895_v9 = vpop.f32.mrf.mxu2 }
 0x287   : > { %v1948_v62 = vadd.f32 %v1895_v9, %v1814_v4 }
 0x288   : > { %2278 = vst.msk [vmem:[%s4067_s19 + $0x88] sm:$0xff] %vm2260_vm9, %v2243_v16  ;;  %v2327_v42 = vsel %vm2260_vm9, %v2243_v16, 0.0  ;;  %v2384_v41 = vmul.f32 %v2243_v16, %v2243_v16 }
 0x289   : > { %v2328_v34 = vadd.f32 %v2327_v42, %v2326_v61 }
 0x28a   : > { %v2432_v47 = vsel %vm2260_vm9, %v2384_v41, 0.0  ;;  %v2191_v39 = vpop.f32.mrf.mxu0 }
 0x28b   : > { %v2433_v51 = vadd.f32 %v2432_v47, %v2431_v28  ;;  %v2051_v43 = vpop.f32.mrf.mxu3 }
 0x28c   : > { %v1766_v36 = vpop.f32.mrf.mxu1  ;;  %v2104_v21 = vadd.f32 %v2051_v43, %v1948_v62 }
 0x28d   : > { %v1816_v15 = vadd.f32 %v1766_v36, %v3982_v60 }
 0x28e   : > { %v2244_v20 = vadd.f32 %v2191_v39, %v2104_v21  ;;  %v1897_v54 = vpop.f32.mrf.mxu2 }
 0x28f   : > { %v1949_v37 = vadd.f32 %v1897_v54, %v1815_v10 }
 0x290   : > { %2279 = vst.msk [vmem:[%s4067_s19 + $0x90] sm:$0xff] %vm2260_vm9, %v2244_v20  ;;  %v2329_v46 = vsel %vm2260_vm9, %v2244_v20, 0.0  ;;  %v2385_v14 = vmul.f32 %v2244_v20, %v2244_v20 }
 0x291   : > { %v2330_v6 = vadd.f32 %v2329_v46, %v2328_v34 }
 0x292   : > { %v2434_v48 = vsel %vm2260_vm9, %v2385_v14, 0.0  ;;  %v2193_v7 = vpop.f32.mrf.mxu0 }
 0x293   : > { %v2435_v11 = vadd.f32 %v2434_v48, %v2433_v51  ;;  %v2053_v58 = vpop.f32.mrf.mxu3 }
 0x294   : > { %v1768_v18 = vpop.f32.mrf.mxu1  ;;  %v2105_v53 = vadd.f32 %v2053_v58, %v1949_v37 }
 0x295   : > { %v1817_v32 = vadd.f32 %v1768_v18, %v3987_v56 }
 0x296   : > { %v2245_v31 = vadd.f32 %v2193_v7, %v2105_v53  ;;  %v1900_v33 = vpop.f32.mrf.mxu2 }
 0x297   : > { %v1950_v12 = vadd.f32 %v1900_v33, %v1816_v15 }
 0x298   : > { %2280 = vst.msk [vmem:[%s4067_s19 + $0x98] sm:$0xff] %vm2260_vm9, %v2245_v31  ;;  %v2331_v8 = vsel %vm2260_vm9, %v2245_v31, 0.0  ;;  %v2386_v27 = vmul.f32 %v2245_v31, %v2245_v31 }
 0x299   : > { %v2332_v0 = vadd.f32 %v2331_v8, %v2330_v6 }
 0x29a   : > { %v2436_v22 = vsel %vm2260_vm9, %v2386_v27, 0.0  ;;  %v2196_v25 = vpop.f32.mrf.mxu0 }
 0x29b   : > { %v2437_v19 = vadd.f32 %v2436_v22, %v2435_v11  ;;  %v2056_v13 = vpop.f32.mrf.mxu3 }
 0x29c   : > { %v1771_v35 = vpop.f32.mrf.mxu1  ;;  %v2106_v23 = vadd.f32 %v2056_v13, %v1950_v12 }
 0x29d   : > { %v1818_v16 = vadd.f32 %v1771_v35, %v3996_v63 }
 0x29e   : > { %v2246_v5 = vadd.f32 %v2196_v25, %v2106_v23  ;;  %v1902_v60 = vpop.f32.mrf.mxu2 }
 0x29f   : > { %v1951_v49 = vadd.f32 %v1902_v60, %v1817_v32 }
 0x2a0   : > { %2281 = vst.msk [vmem:[%s4067_s19 + $0xa0] sm:$0xff] %vm2260_vm9, %v2246_v5  ;;  %v2333_v3 = vsel %vm2260_vm9, %v2246_v5, 0.0  ;;  %v2387_v2 = vmul.f32 %v2246_v5, %v2246_v5 }
 0x2a1   : > { %v2334_v57 = vadd.f32 %v2333_v3, %v2332_v0 }
 0x2a2   : > { %v2438_v61 = vsel %vm2260_vm9, %v2387_v2, 0.0  ;;  %v2198_v52 = vpop.f32.mrf.mxu0 }
 0x2a3   : > { %v2439_v24 = vadd.f32 %v2438_v61, %v2437_v19  ;;  %v2058_v28 = vpop.f32.mrf.mxu3 }
 0x2a4   : > { %v1773_v40 = vpop.f32.mrf.mxu1  ;;  %v2107_v55 = vadd.f32 %v2058_v28, %v1951_v49 }
 0x2a5   : > { %v1819_v21 = vadd.f32 %v1773_v40, %v4001_v44 }
 0x2a6   : > { %v2247_v1 = vadd.f32 %v2198_v52, %v2107_v55  ;;  %v1905_v56 = vpop.f32.mrf.mxu2 }
 0x2a7   : > { %v1952_v42 = vadd.f32 %v1905_v56, %v1818_v16 }
 0x2a8   : > { %2282 = vst.msk [vmem:[%s4067_s19 + $0xa8] sm:$0xff] %vm2260_vm9, %v2247_v1  ;;  %v2335_v4 = vsel %vm2260_vm9, %v2247_v1, 0.0  ;;  %v2388_v9 = vmul.f32 %v2247_v1, %v2247_v1 }
 0x2a9   : > { %v2336_v41 = vadd.f32 %v2335_v4, %v2334_v57 }
 0x2aa   : > { %v2440_v62 = vsel %vm2260_vm9, %v2388_v9, 0.0  ;;  %v2201_v34 = vpop.f32.mrf.mxu0 }
 0x2ab   : > { %v2441_v47 = vadd.f32 %v2440_v62, %v2439_v24  ;;  %v2061_v39 = vpop.f32.mrf.mxu3 }
 0x2ac   : > { %v1776_v51 = vpop.f32.mrf.mxu1  ;;  %v2108_v43 = vadd.f32 %v2061_v39, %v1952_v42 }
 0x2ad   : > { %v1820_v18 = vadd.f32 %v1776_v51, %v4010_v59 }
 0x2ae   : > { %v2248_v36 = vadd.f32 %v2201_v34, %v2108_v43  ;;  %v1907_v63 = vpop.f32.mrf.mxu2 }
 0x2af   : > { %v1953_v54 = vadd.f32 %v1907_v63, %v1819_v21 }
 0x2b0   : > { %2283 = vst.msk [vmem:[%s4067_s19 + $0xb0] sm:$0xff] %vm2260_vm9, %v2248_v36  ;;  %v2337_v20 = vsel %vm2260_vm9, %v2248_v36, 0.0  ;;  %v2389_v10 = vmul.f32 %v2248_v36, %v2248_v36 }
 0x2b1   : > { %v2338_v46 = vadd.f32 %v2337_v20, %v2336_v41 }
 0x2b2   : > { %v2442_v14 = vsel %vm2260_vm9, %v2389_v10, 0.0  ;;  %v2203_v37 = vpop.f32.mrf.mxu0 }
 0x2b3   : > { %v2443_v6 = vadd.f32 %v2442_v14, %v2441_v47  ;;  %v2063_v48 = vpop.f32.mrf.mxu3 }
 0x2b4   : > { %v1778_v7 = vpop.f32.mrf.mxu1  ;;  %v2109_v11 = vadd.f32 %v2063_v48, %v1953_v54 }
 0x2b5   : > { %v1821_v13 = vadd.f32 %v1778_v7, %v4015_v26 }
 0x2b6   : > { %v2249_v58 = vadd.f32 %v2203_v37, %v2109_v11  ;;  %v1910_v44 = vpop.f32.mrf.mxu2 }
 0x2b7   : > { %v1954_v15 = vadd.f32 %v1910_v44, %v1820_v18 }
 0x2b8   : > { %2284 = vst.msk [vmem:[%s4067_s19 + $0xb8] sm:$0xff] %vm2260_vm9, %v2249_v58  ;;  %v2339_v53 = vsel %vm2260_vm9, %v2249_v58, 0.0  ;;  %v2390_v31 = vmul.f32 %v2249_v58, %v2249_v58 }
 0x2b9   : > { %v2340_v33 = vadd.f32 %v2339_v53, %v2338_v46 }
 0x2ba   : > { %v2444_v8 = vsel %vm2260_vm9, %v2390_v31, 0.0  ;;  %v2206_v27 = vpop.f32.mrf.mxu0 }
 0x2bb   : > { %v2445_v12 = vadd.f32 %v2444_v8, %v2443_v6  ;;  %v2066_v0 = vpop.f32.mrf.mxu3 }
 0x2bc   : > { %v1781_v22 = vpop.f32.mrf.mxu1  ;;  %v2110_v25 = vadd.f32 %v2066_v0, %v1954_v15 }
 0x2bd   : > { %v1822_v24 = vadd.f32 %v1781_v22, %v4024_v29 }
 0x2be   : > { %v2250_v19 = vadd.f32 %v2206_v27, %v2110_v25  ;;  %v1912_v59 = vpop.f32.mrf.mxu2 }
 0x2bf   : > { %v1955_v5 = vadd.f32 %v1912_v59, %v1821_v13 }
 0x2c0   : > { %2285 = vst.msk [vmem:[%s4067_s19 + $0xc0] sm:$0xff] %vm2260_vm9, %v2250_v19  ;;  %v2341_v35 = vsel %vm2260_vm9, %v2250_v19, 0.0  ;;  %v2391_v23 = vmul.f32 %v2250_v19, %v2250_v19 }
 0x2c1   : > { %v2342_v32 = vadd.f32 %v2341_v35, %v2340_v33 }
 0x2c2   : > { %v2446_v60 = vsel %vm2260_vm9, %v2391_v23, 0.0  ;;  %v2208_v3 = vpop.f32.mrf.mxu0 }
 0x2c3   : > { %v2447_v2 = vadd.f32 %v2446_v60, %v2445_v12  ;;  %v2068_v49 = vpop.f32.mrf.mxu3 }
 0x2c4   : > { %v1783_v57 = vpop.f32.mrf.mxu1  ;;  %v2111_v61 = vadd.f32 %v2068_v49, %v1955_v5 }
 0x2c5   : > { %v1823_v34 = vadd.f32 %v1783_v57, %v4029_v38 }
 0x2c6   : > { %v2251_v52 = vadd.f32 %v2208_v3, %v2111_v61  ;;  %v1915_v26 = vpop.f32.mrf.mxu2 }
 0x2c7   : > { %v1956_v55 = vadd.f32 %v1915_v26, %v1822_v24 }
 0x2c8   : > { %2286 = vst.msk [vmem:[%s4067_s19 + $0xc8] sm:$0xff] %vm2260_vm9, %v2251_v52  ;;  %v2343_v28 = vsel %vm2260_vm9, %v2251_v52, 0.0  ;;  %v2392_v40 = vmul.f32 %v2251_v52, %v2251_v52 }
 0x2c9   : > { %v2344_v1 = vadd.f32 %v2343_v28, %v2342_v32 }
 0x2ca   : > { %v2448_v16 = vsel %vm2260_vm9, %v2392_v40, 0.0  ;;  %v2211_v56 = vpop.f32.mrf.mxu0 }
 0x2cb   : > { %v2449_v4 = vadd.f32 %v2448_v16, %v2447_v2  ;;  %v2071_v9 = vpop.f32.mrf.mxu3 }
 0x2cc   : > { %v2112_v42 = vadd.f32 %v2071_v9, %v1956_v55  ;;  %v1786_v41 = vpop.f32.mrf.mxu1 }
 0x2cd   : > { %v1824_v46 = vadd.f32 %v1786_v41, %v4038_v45 }
 0x2ce   : > { %v2252_v62 = vadd.f32 %v2211_v56, %v2112_v42  ;;  %v1917_v29 = vpop.f32.mrf.mxu2 }
 0x2cf   : > { %v1957_v51 = vadd.f32 %v1917_v29, %v1823_v34 }
 0x2d0   : > { %2287 = vst.msk [vmem:[%s4067_s19 + $0xd0] sm:$0xff] %vm2260_vm9, %v2252_v62  ;;  %v2345_v47 = vsel %vm2260_vm9, %v2252_v62, 0.0  ;;  %v2393_v39 = vmul.f32 %v2252_v62, %v2252_v62 }
 0x2d1   : > { %v2346_v43 = vadd.f32 %v2345_v47, %v2344_v1 }
 0x2d2   : > { %v2450_v36 = vsel %vm2260_vm9, %v2393_v39, 0.0  ;;  %v2213_v21 = vpop.f32.mrf.mxu0 }
 0x2d3   : > { %v2451_v63 = vadd.f32 %v2450_v36, %v2449_v4  ;;  %v2073_v20 = vpop.f32.mrf.mxu3 }
 0x2d4   : > { %v2113_v10 = vadd.f32 %v2073_v20, %v1957_v51  ;;  %v1788_v14 = vpop.f32.mrf.mxu1 }
 0x2d5   : > { %v1825_v15 = vadd.f32 %v1788_v14, %v4043_v30 }
 0x2d6   : > { %v2253_v54 = vadd.f32 %v2213_v21, %v2113_v10  ;;  %v1920_v38 = vpop.f32.mrf.mxu2 }
 0x2d7   : > { %v1958_v48 = vadd.f32 %v1920_v38, %v1824_v46  ;;  %v2293_v38 = vld [vmem:[#allocation2] sm:$0x1] }
 0x2d8   : > { %2288 = vst.msk [vmem:[%s4067_s19 + $0xd8] sm:$0xff] %vm2260_vm9, %v2253_v54  ;;  %v2347_v37 = vsel %vm2260_vm9, %v2253_v54, 0.0  ;;  %v2394_v6 = vmul.f32 %v2253_v54, %v2253_v54 }
 0x2d9   : > { %v2348_v7 = vadd.f32 %v2347_v37, %v2346_v43 }
 0x2da   : > { %v2452_v11 = vsel %vm2260_vm9, %v2394_v6, 0.0  ;;  %v2216_v58 = vpop.f32.mrf.mxu0  ;;  %v2366_v6 = vld [vmem:[#allocation3] sm:$0x1] }
 0x2db   : > { %v2453_v18 = vadd.f32 %v2452_v11, %v2451_v63  ;;  %v2076_v44 = vpop.f32.mrf.mxu3 }
 0x2dc   : > { %v2114_v53 = vadd.f32 %v2076_v44, %v1958_v48  ;;  %v1791_v12 = vpop.f32.mrf.mxu1 }
 0x2dd   : > { %v1826_v23 = vadd.f32 %v1791_v12, %v4052_v50 }
 0x2de   : > { %v2254_v31 = vadd.f32 %v2216_v58, %v2114_v53  ;;  %v1922_v45 = vpop.f32.mrf.mxu2 }
 0x2df   : > { %v1959_v27 = vadd.f32 %v1922_v45, %v1825_v15 }
 0x2e0   : > { %2289 = vst.msk [vmem:[%s4067_s19 + $0xe0] sm:$0xff] %vm2260_vm9, %v2254_v31  ;;  %v2349_v33 = vsel %vm2260_vm9, %v2254_v31, 0.0  ;;  %v2395_v8 = vmul.f32 %v2254_v31, %v2254_v31 }
 0x2e1   : > { %v2350_v0 = vadd.f32 %v2349_v33, %v2348_v7 }
 0x2e2   : > { %v2454_v22 = vsel %vm2260_vm9, %v2395_v8, 0.0  ;;  %v2218_v25 = vpop.f32.mrf.mxu0 }
 0x2e3   : > { %v2455_v19 = vadd.f32 %v2454_v22, %v2453_v18  ;;  %v2078_v13 = vpop.f32.mrf.mxu3 }
 0x2e4   : > { %v2115_v59 = vadd.f32 %v2078_v13, %v1959_v27  ;;  %v1793_v49 = vpop.f32.mrf.mxu1 }
 0x2e5   : > { %v1827_v50 = vadd.f32 %v1793_v49, %v4057_v17 }
 0x2e6   : > { %v2255_v35 = vadd.f32 %v2218_v25, %v2115_v59  ;;  %v1925_v30 = vpop.f32.mrf.mxu2 }
 0x2e7   : > { %v1960_v60 = vadd.f32 %v1925_v30, %v1826_v23 }
 0x2e8   : > { %2290 = vst.msk [vmem:[%s4067_s19 + $0xe8] sm:$0xff] %vm2260_vm9, %v2255_v35  ;;  %v2351_v5 = vsel %vm2260_vm9, %v2255_v35, 0.0  ;;  %v2396_v32 = vmul.f32 %v2255_v35, %v2255_v35 }
 0x2e9   : > { %v2352_v3 = vadd.f32 %v2351_v5, %v2350_v0 }
 0x2ea   : > { %v2456_v2 = vsel %vm2260_vm9, %v2396_v32, 0.0  ;;  %v2221_v61 = vpop.f32.mrf.mxu0 }
 0x2eb   : > { %v2457_v57 = vadd.f32 %v2456_v2, %v2455_v19  ;;  %v2081_v52 = vpop.f32.mrf.mxu3 }
 0x2ec   : > { %v2116_v24 = vadd.f32 %v2081_v52, %v1960_v60 }
 0x2ee   : > { %v2256_v26 = vadd.f32 %v2221_v61, %v2116_v24  ;;  %v1927_v28 = vpop.f32.mrf.mxu2 }
 0x2ef   : > { %v1961_v1 = vadd.f32 %v1927_v28, %v1827_v50 }
 0x2f0   : > { %2291 = vst.msk [vmem:[%s4067_s19 + $0xf0] sm:$0xff] %vm2260_vm9, %v2256_v26  ;;  %v2353_v40 = vsel %vm2260_vm9, %v2256_v26, 0.0  ;;  %v2397_v55 = vmul.f32 %v2256_v26, %v2256_v26 }
 0x2f1   : > { %v2354_v16 = vadd.f32 %v2353_v40, %v2352_v3 }
 0x2f2   : > { %v2458_v56 = vsel %vm2260_vm9, %v2397_v55, 0.0  ;;  %v2223_v41 = vpop.f32.mrf.mxu0 }
 0x2f3   : > { %v2459_v4 = vadd.f32 %v2458_v56, %v2457_v57  ;;  %v2083_v9 = vpop.f32.mrf.mxu3 }
 0x2f4   : > { %v2117_v42 = vadd.f32 %v2083_v9, %v1961_v1 }
 0x2f6   : > { %v2257_v62 = vadd.f32 %v2223_v41, %v2117_v42 }
 0x2f8   : > { %2292 = vst.msk [vmem:[%s4067_s19 + $0xf8] sm:$0xff] %vm2260_vm9, %v2257_v62  ;;  %v2355_v34 = vsel %vm2260_vm9, %v2257_v62, 0.0  ;;  %v2398_v17 = vmul.f32 %v2257_v62, %v2257_v62 }
 0x2f9   : > { %v2356_v29 = vadd.f32 %v2355_v34, %v2354_v16 }
 0x2fa   : > { %v2460_v47 = vsel %vm2260_vm9, %v2398_v17, 0.0 }
 0x2fb   : > { %v2357_v39 = vrot.slane %v2356_v29, 4  ;;  %v2461_v51 = vadd.f32 %v2460_v47, %v2459_v4 }
 0x2fd   : > { %v2358_v43 = vadd.f32 %v2357_v39, %v2356_v29  ;;  %v2462_v36 = vrot.slane %v2461_v51, 4 }
 0x2ff   : > { %v2359_v21 = vrot.slane %v2358_v43, 2  ;;  %v2463_v63 = vadd.f32 %v2462_v36, %v2461_v51 }
 0x301   : > { %v2360_v20 = vadd.f32 %v2359_v21, %v2358_v43  ;;  %v2464_v10 = vrot.slane %v2463_v63, 2 }
 0x303   : > { %v2361_v54 = vrot.slane %v2360_v20, 1  ;;  %v2465_v46 = vadd.f32 %v2464_v10, %v2463_v63 }
 0x305   : > { %v2362_v14 = vadd.f32 %v2361_v54, %v2360_v20  ;;  %v2466_v37 = vrot.slane %v2465_v46, 1 }
 0x307   : > { %v2363_v48 = vadd.f32 %v2362_v14, %v2293_v38  ;;  %v2467_v7 = vadd.f32 %v2466_v37, %v2465_v46  ;;  %2473 = sbr.rel (%p3038_p5) target bundleno = 887 (0x377), region = 44 }
 0x309   : > { %2365 = vst.msk [vmem:[#allocation2] sm:$0x1] %vm2364_vm10, %v2363_v48  ;;  %v2468_v11 = vadd.f32 %v2467_v7, %v2366_v6 }
 0x30b   : > { %2469 = vst.msk [vmem:[#allocation3] sm:$0x1] %vm2364_vm10, %v2468_v11 }
 0x30c   : > { %v2481_v25 = vld [vmem:[%s4903_s2] sm:$0x1]  ;;  %v2498_v30 = vld [vmem:[%s4905_s4 + $0x8] sm:$0xff]  ;;  %v2499_v5 = vld [vmem:[%s4905_s4 + $0x10] sm:$0xff] }
 0x30d   : > { %v2494_v35 = vld [vmem:[%s4904_s3] sm:$0x1]  ;;  %v2500_v3 = vld [vmem:[%s4905_s4 + $0x18] sm:$0xff]  ;;  %v2502_v24 = vld [vmem:[%s4905_s4 + $0x28] sm:$0xff] }
 0x30e   : > { %v2497_v23 = vld [vmem:[%s4905_s4] sm:$0xff]  ;;  %v2503_v50 = vld [vmem:[%s4905_s4 + $0x30] sm:$0xff]  ;;  %v2504_v55 = vld [vmem:[%s4905_s4 + $0x38] sm:$0xff] }
 0x30f   : > { %v2501_v2 = vld [vmem:[%s4905_s4 + $0x20] sm:$0xff]  ;;  %v2506_v41 = vld [vmem:[%s4905_s4 + $0x48] sm:$0xff]  ;;  %v2507_v17 = vld [vmem:[%s4905_s4 + $0x50] sm:$0xff] }
 0x310   : > { %v2474_v58 = vld [vmem:[#allocation2] sm:$0x1]  ;;  %v2508_v39 = vld [vmem:[%s4905_s4 + $0x58] sm:$0xff]  ;;  %v2510_v20 = vld [vmem:[%s4905_s4 + $0x68] sm:$0xff] }
 0x311   : > { %v2475_v44 = vmul.f32 0.001953125, %v2474_v58  ;;  %v2505_v16 = vld [vmem:[%s4905_s4 + $0x40] sm:$0xff]  ;;  %v2511_v46 = vld [vmem:[%s4905_s4 + $0x70] sm:$0xff]  ;;  %v2512_v37 = vld [vmem:[%s4905_s4 + $0x78] sm:$0xff] }
 0x312   : > { %v2476_v18 = vld [vmem:[#allocation3] sm:$0x1] }
 0x313   : > { %v2477_v53 = vmul.f32 0.001953125, %v2476_v18  ;;  %v2478_v31 = vmul.f32 %v2475_v44, %v2475_v44  ;;  %v2509_v36 = vld [vmem:[%s4905_s4 + $0x60] sm:$0xff]  ;;  %v2514_v18 = vld [vmem:[%s4905_s4 + $0x88] sm:$0xff] }
 0x314   : > { %v2513_v7 = vld [vmem:[%s4905_s4 + $0x80] sm:$0xff] }
 0x315   : > { %v2479_v15 = vsub.f32 %v2477_v53, %v2478_v31  ;;  %v2515_v31 = vld [vmem:[%s4905_s4 + $0x90] sm:$0xff] }
 0x317   : > { %v2480_v45 = vmax.f32 %v2479_v15, 0.0 }
 0x319   : > { %v2482_v33 = vadd.f32 1e-05, %v2480_v45 }
 0x31b   : > { %3081 = vrsqrt.f32 %v2482_v33  ;;  %vm2489_vm11 = vweird.f32 %v2482_v33 }
 0x321   : > { %v3082_v8 = vpop.eup %3081 }
 0x322   : > { %v2484_v27 = vmul.f32 %v3082_v8, %v2482_v33  ;;  %vm2490_vm12 = vweird.f32 %v3082_v8  ;;  %v2516_v33 = vld [vmem:[%s4905_s4 + $0x98] sm:$0xff] }
 0x323   : > { %vm2491_vm13 = vmor %vm2489_vm11, %vm2490_vm12 }
 0x324   : > { %v2485_v12 = vmul.f32 %v3082_v8, %v2484_v27 }
 0x326   : > { %v2486_v0 = vmul.f32 0.5, %v2485_v12  ;;  %v2517_v12 = vld [vmem:[%s4905_s4 + $0xa0] sm:$0xff] }
 0x328   : > { %v2487_v22 = vsub.f32 1.5, %v2486_v0 }
 0x32a   : > { %v2488_v19 = vmul.f32 %v3082_v8, %v2487_v22 }
 0x32c   : > { %v2492_v13 = vsel %vm2491_vm13, %v3082_v8, %v2488_v19 }
 0x32d   : > { %v2493_v59 = vmul.f32 %v2492_v13, %v2481_v25  ;;  %v2518_v25 = vld [vmem:[%s4905_s4 + $0xa8] sm:$0xff] }
 0x32f   : > { %v2495_v32 = vmul.f32 %v2493_v59, %v2475_v44  ;;  %v4324_v60 = vperm.slane %v2493_v59, 0  ;;  %v2519_v59 = vld [vmem:[%s4905_s4 + $0xb0] sm:$0xff] }
 0x331   : > { %v2496_v49 = vsub.f32 %v2494_v35, %v2495_v32  ;;  %v2564_v57 = vmul.f32 %v4324_v60, %v2497_v23  ;;  %v2565_v61 = vmul.f32 %v4324_v60, %v2498_v30  ;;  %v2566_v52 = vmul.f32 %v4324_v60, %v2499_v5  ;;  %v2520_v30 = vld [vmem:[%s4905_s4 + $0xb8] sm:$0xff] }
 0x332   : > { %v2567_v26 = vmul.f32 %v4324_v60, %v2500_v3  ;;  %v2568_v40 = vmul.f32 %v4324_v60, %v2501_v2  ;;  %v2569_v1 = vmul.f32 %v4324_v60, %v2502_v24  ;;  %v2570_v42 = vmul.f32 %v4324_v60, %v2503_v50  ;;  %v2521_v3 = vld [vmem:[%s4905_s4 + $0xc0] sm:$0xff]  ;;  %v2523_v24 = vld [vmem:[%s4905_s4 + $0xd0] sm:$0xff] }
 0x333   : > { %v4342_v28 = vperm.slane %v2496_v49, 0  ;;  %v2571_v34 = vmul.f32 %v4324_v60, %v2504_v55  ;;  %v2572_v47 = vmul.f32 %v4324_v60, %v2505_v16  ;;  %v2573_v43 = vmul.f32 %v4324_v60, %v2506_v41  ;;  %v2525_v16 = vld [vmem:[%s4905_s4 + $0xe0] sm:$0xff] }
 0x334   : > { %v2574_v63 = vmul.f32 %v4324_v60, %v2507_v17  ;;  %v2575_v54 = vmul.f32 %v4324_v60, %v2508_v39  ;;  %v2576_v14 = vmul.f32 %v4324_v60, %v2509_v36  ;;  %v2577_v48 = vmul.f32 %v4324_v60, %v2510_v20 }
 0x335   : > { %v2631_v56 = vadd.f32 %v4342_v28, %v2564_v57  ;;  %v2632_v4 = vadd.f32 %v4342_v28, %v2565_v61  ;;  %v2633_v9 = vadd.f32 %v4342_v28, %v2566_v52  ;;  %v2634_v62 = vadd.f32 %v4342_v28, %v2567_v26  ;;  %v2522_v57 = vld [vmem:[%s4905_s4 + $0xc8] sm:$0xff] }
 0x336   : > { %v2635_v29 = vadd.f32 %v4342_v28, %v2568_v40  ;;  %v2636_v51 = vadd.f32 %v4342_v28, %v2569_v1  ;;  %v2637_v21 = vadd.f32 %v4342_v28, %v2570_v42  ;;  %v2638_v10 = vadd.f32 %v4342_v28, %v2571_v34  ;;  %v2524_v40 = vld [vmem:[%s4905_s4 + $0xd8] sm:$0xff] }
 0x337   : > { %2695 = vst.msk [vmem:[%s4905_s4] sm:$0xff] %vm2260_vm9, %v2631_v56  ;;  %v2639_v38 = vadd.f32 %v4342_v28, %v2572_v47  ;;  %v2640_v6 = vadd.f32 %v4342_v28, %v2573_v43  ;;  %v2641_v11 = vadd.f32 %v4342_v28, %v2574_v63  ;;  %v2578_v58 = vmul.f32 %v4324_v60, %v2511_v46 }
 0x338   : > { %2696 = vst.msk [vmem:[%s4905_s4 + $0x8] sm:$0xff] %vm2260_vm9, %v2632_v4  ;;  %v2642_v44 = vadd.f32 %v4342_v28, %v2575_v54  ;;  %v2579_v53 = vmul.f32 %v4324_v60, %v2512_v37  ;;  %v2643_v15 = vadd.f32 %v4342_v28, %v2576_v14  ;;  %v2580_v45 = vmul.f32 %v4324_v60, %v2513_v7 }
 0x339   : > { %2697 = vst.msk [vmem:[%s4905_s4 + $0x10] sm:$0xff] %vm2260_vm9, %v2633_v9  ;;  %v2644_v8 = vadd.f32 %v4342_v28, %v2577_v48  ;;  %v2581_v27 = vmul.f32 %v4324_v60, %v2514_v18  ;;  %v2645_v0 = vadd.f32 %v4342_v28, %v2578_v58  ;;  %v2582_v22 = vmul.f32 %v4324_v60, %v2515_v31  ;;  %v2526_v9 = vld [vmem:[%s4905_s4 + $0xe8] sm:$0xff]  ;;  %v2560_v48 = vld [vmem:[%s4905_s4 + $0x1f8] sm:$0xff]  ;;  %v2535_v31 = vld [vmem:[%s4905_s4 + $0x130] sm:$0xff] }
 0x33a   : > { %2698 = vst.msk [vmem:[%s4905_s4 + $0x18] sm:$0xff] %vm2260_vm9, %v2634_v62  ;;  %v2646_v19 = vadd.f32 %v4342_v28, %v2579_v53  ;;  %v2583_v13 = vmul.f32 %v4324_v60, %v2516_v33  ;;  %v2647_v35 = vadd.f32 %v4342_v28, %v2580_v45  ;;  %v2584_v23 = vmul.f32 %v4324_v60, %v2517_v12  ;;  %v2527_v62 = vld [vmem:[%s4905_s4 + $0xf0] sm:$0xff]  ;;  %v2534_v58 = vld [vmem:[%s4905_s4 + $0x128] sm:$0xff]  ;;  %v2536_v33 = vld [vmem:[%s4905_s4 + $0x138] sm:$0xff] }
 0x33b   : > { %2699 = vst.msk [vmem:[%s4905_s4 + $0x20] sm:$0xff] %vm2260_vm9, %v2635_v29  ;;  %v2648_v5 = vadd.f32 %v4342_v28, %v2581_v27  ;;  %v2585_v32 = vmul.f32 %v4324_v60, %v2518_v25  ;;  %v2649_v2 = vadd.f32 %v4342_v28, %v2582_v22  ;;  %v2586_v49 = vmul.f32 %v4324_v60, %v2519_v59  ;;  %v2528_v29 = vld [vmem:[%s4905_s4 + $0xf8] sm:$0xff] }
 0x33c   : > { %2700 = vst.msk [vmem:[%s4905_s4 + $0x28] sm:$0xff] %vm2260_vm9, %v2636_v51  ;;  %v2650_v61 = vadd.f32 %v4342_v28, %v2583_v13  ;;  %v2587_v52 = vmul.f32 %v4324_v60, %v2520_v30  ;;  %v2651_v26 = vadd.f32 %v4342_v28, %v2584_v23  ;;  %v2588_v50 = vmul.f32 %v4324_v60, %v2521_v3  ;;  %v2529_v51 = vld [vmem:[%s4905_s4 + $0x100] sm:$0xff] }
 0x33d   : > { %2701 = vst.msk [vmem:[%s4905_s4 + $0x30] sm:$0xff] %vm2260_vm9, %v2637_v21  ;;  %v2652_v55 = vadd.f32 %v4342_v28, %v2585_v32  ;;  %v2589_v1 = vmul.f32 %v4324_v60, %v2522_v57  ;;  %v2653_v56 = vadd.f32 %v4342_v28, %v2586_v49  ;;  %v2590_v4 = vmul.f32 %v4324_v60, %v2523_v24  ;;  %v2530_v21 = vld [vmem:[%s4905_s4 + $0x108] sm:$0xff] }
 0x33e   : > { %2702 = vst.msk [vmem:[%s4905_s4 + $0x38] sm:$0xff] %vm2260_vm9, %v2638_v10  ;;  %v2654_v42 = vadd.f32 %v4342_v28, %v2587_v52  ;;  %v2591_v41 = vmul.f32 %v4324_v60, %v2524_v40  ;;  %v2655_v34 = vadd.f32 %v4342_v28, %v2588_v50  ;;  %v2592_v17 = vmul.f32 %v4324_v60, %v2525_v16  ;;  %v2531_v10 = vld [vmem:[%s4905_s4 + $0x110] sm:$0xff] }
 0x33f   : > { %2703 = vst.msk [vmem:[%s4905_s4 + $0x40] sm:$0xff] %vm2260_vm9, %v2639_v38  ;;  %v2656_v47 = vadd.f32 %v4342_v28, %v2589_v1  ;;  %v2593_v39 = vmul.f32 %v4324_v60, %v2526_v9  ;;  %v2657_v43 = vadd.f32 %v4342_v28, %v2590_v4  ;;  %v2594_v36 = vmul.f32 %v4324_v60, %v2527_v62  ;;  %v2532_v38 = vld [vmem:[%s4905_s4 + $0x118] sm:$0xff] }
 0x340   : > { %2704 = vst.msk [vmem:[%s4905_s4 + $0x48] sm:$0xff] %vm2260_vm9, %v2640_v6  ;;  %v2658_v63 = vadd.f32 %v4342_v28, %v2591_v41  ;;  %v2595_v20 = vmul.f32 %v4324_v60, %v2528_v29  ;;  %v2659_v54 = vadd.f32 %v4342_v28, %v2592_v17  ;;  %v2596_v46 = vmul.f32 %v4324_v60, %v2529_v51  ;;  %v2533_v6 = vld [vmem:[%s4905_s4 + $0x120] sm:$0xff] }
 0x341   : > { %2705 = vst.msk [vmem:[%s4905_s4 + $0x50] sm:$0xff] %vm2260_vm9, %v2641_v11  ;;  %v2660_v14 = vadd.f32 %v4342_v28, %v2593_v39  ;;  %v2597_v37 = vmul.f32 %v4324_v60, %v2530_v21  ;;  %v2661_v7 = vadd.f32 %v4342_v28, %v2594_v36  ;;  %v2598_v11 = vmul.f32 %v4324_v60, %v2531_v10 }
 0x342   : > { %2706 = vst.msk [vmem:[%s4905_s4 + $0x58] sm:$0xff] %vm2260_vm9, %v2642_v44  ;;  %v2627_v18 = vmul.f32 %v4324_v60, %v2560_v48  ;;  %v2662_v44 = vadd.f32 %v4342_v28, %v2595_v20  ;;  %v2599_v53 = vmul.f32 %v4324_v60, %v2532_v38  ;;  %v2600_v45 = vmul.f32 %v4324_v60, %v2533_v6  ;;  %v2553_v48 = vld [vmem:[%s4905_s4 + $0x1c0] sm:$0xff] }
 0x343   : > { %2707 = vst.msk [vmem:[%s4905_s4 + $0x60] sm:$0xff] %vm2260_vm9, %v2643_v15  ;;  %v2663_v15 = vadd.f32 %v4342_v28, %v2596_v46  ;;  %v2664_v27 = vadd.f32 %v4342_v28, %v2597_v37  ;;  %v2601_v12 = vmul.f32 %v4324_v60, %v2534_v58  ;;  %v2665_v22 = vadd.f32 %v4342_v28, %v2598_v11  ;;  %v2554_v58 = vld [vmem:[%s4905_s4 + $0x1c8] sm:$0xff] }
 0x344   : > { %2708 = vst.msk [vmem:[%s4905_s4 + $0x68] sm:$0xff] %vm2260_vm9, %v2644_v8  ;;  %v4630_v8 = vadd.f32 %v4342_v28, %v2627_v18  ;;  %v2602_v25 = vmul.f32 %v4324_v60, %v2535_v31  ;;  %v2666_v13 = vadd.f32 %v4342_v28, %v2599_v53  ;;  %v2603_v59 = vmul.f32 %v4324_v60, %v2536_v33  ;;  %v2555_v53 = vld [vmem:[%s4905_s4 + $0x1d0] sm:$0xff] }
 0x345   : > { %2709 = vst.msk [vmem:[%s4905_s4 + $0x70] sm:$0xff] %vm2260_vm9, %v2645_v0  ;;  %v2537_v0 = vld [vmem:[%s4905_s4 + $0x140] sm:$0xff]  ;;  %v2667_v23 = vadd.f32 %v4342_v28, %v2600_v45  ;;  %v2668_v32 = vadd.f32 %v4342_v28, %v2601_v12  ;;  %v2556_v45 = vld [vmem:[%s4905_s4 + $0x1d8] sm:$0xff] }
 0x346   : > { %2710 = vst.msk [vmem:[%s4905_s4 + $0x78] sm:$0xff] %vm2260_vm9, %v2646_v19  ;;  %v2538_v19 = vld [vmem:[%s4905_s4 + $0x148] sm:$0xff]  ;;  %v2604_v30 = vmul.f32 %v4324_v60, %v2537_v0  ;;  %v2669_v49 = vadd.f32 %v4342_v28, %v2602_v25  ;;  %v2670_v52 = vadd.f32 %v4342_v28, %v2603_v59  ;;  %v2557_v12 = vld [vmem:[%s4905_s4 + $0x1e0] sm:$0xff]  ;;  %v2559_v59 = vld [vmem:[%s4905_s4 + $0x1f0] sm:$0xff] }
 0x347   : > { %2711 = vst.msk [vmem:[%s4905_s4 + $0x80] sm:$0xff] %vm2260_vm9, %v2647_v35  ;;  %v2539_v35 = vld [vmem:[%s4905_s4 + $0x150] sm:$0xff]  ;;  %v2605_v3 = vmul.f32 %v4324_v60, %v2538_v19  ;;  %v2558_v25 = vld [vmem:[%s4905_s4 + $0x1e8] sm:$0xff] }
 0x348   : > { %2712 = vst.msk [vmem:[%s4905_s4 + $0x88] sm:$0xff] %vm2260_vm9, %v2648_v5  ;;  %v2540_v5 = vld [vmem:[%s4905_s4 + $0x158] sm:$0xff]  ;;  %v2606_v57 = vmul.f32 %v4324_v60, %v2539_v35  ;;  %v2671_v50 = vadd.f32 %v4342_v28, %v2604_v30 }
 0x349   : > { %2713 = vst.msk [vmem:[%s4905_s4 + $0x90] sm:$0xff] %vm2260_vm9, %v2649_v2  ;;  %v2541_v2 = vld [vmem:[%s4905_s4 + $0x160] sm:$0xff]  ;;  %v2607_v24 = vmul.f32 %v4324_v60, %v2540_v5  ;;  %v2672_v1 = vadd.f32 %v4342_v28, %v2605_v3  ;;  %v2625_v5 = vmul.f32 %v4324_v60, %v2558_v25  ;;  %v2626_v3 = vmul.f32 %v4324_v60, %v2559_v59 }
 0x34a   : > { %2714 = vst.msk [vmem:[%s4905_s4 + $0x98] sm:$0xff] %vm2260_vm9, %v2650_v61  ;;  %v2542_v61 = vld [vmem:[%s4905_s4 + $0x168] sm:$0xff]  ;;  %v2608_v40 = vmul.f32 %v4324_v60, %v2541_v2  ;;  %v2673_v4 = vadd.f32 %v4342_v28, %v2606_v57 }
 0x34b   : > { %2715 = vst.msk [vmem:[%s4905_s4 + $0xa0] sm:$0xff] %vm2260_vm9, %v2651_v26  ;;  %v2543_v26 = vld [vmem:[%s4905_s4 + $0x170] sm:$0xff]  ;;  %v2609_v16 = vmul.f32 %v4324_v60, %v2542_v61  ;;  %v2674_v41 = vadd.f32 %v4342_v28, %v2607_v24  ;;  %v2693_v57 = vadd.f32 %v4342_v28, %v2626_v3 }
 0x34c   : > { %2716 = vst.msk [vmem:[%s4905_s4 + $0xa8] sm:$0xff] %vm2260_vm9, %v2652_v55  ;;  %v2544_v55 = vld [vmem:[%s4905_s4 + $0x178] sm:$0xff]  ;;  %v2610_v9 = vmul.f32 %v4324_v60, %v2543_v26  ;;  %v2675_v17 = vadd.f32 %v4342_v28, %v2608_v40 }
 0x34d   : > { %2717 = vst.msk [vmem:[%s4905_s4 + $0xb0] sm:$0xff] %vm2260_vm9, %v2653_v56  ;;  %v2545_v56 = vld [vmem:[%s4905_s4 + $0x180] sm:$0xff]  ;;  %v2611_v62 = vmul.f32 %v4324_v60, %v2544_v55  ;;  %v2676_v39 = vadd.f32 %v4342_v28, %v2609_v16 }
 0x34e   : > { %2718 = vst.msk [vmem:[%s4905_s4 + $0xb8] sm:$0xff] %vm2260_vm9, %v2654_v42  ;;  %v2546_v42 = vld [vmem:[%s4905_s4 + $0x188] sm:$0xff]  ;;  %v2612_v29 = vmul.f32 %v4324_v60, %v2545_v56  ;;  %v2677_v36 = vadd.f32 %v4342_v28, %v2610_v9 }
 0x34f   : > { %2719 = vst.msk [vmem:[%s4905_s4 + $0xc0] sm:$0xff] %vm2260_vm9, %v2655_v34  ;;  %v2547_v34 = vld [vmem:[%s4905_s4 + $0x190] sm:$0xff]  ;;  %v2613_v51 = vmul.f32 %v4324_v60, %v2546_v42  ;;  %v2678_v20 = vadd.f32 %v4342_v28, %v2611_v62 }
 0x350   : > { %2720 = vst.msk [vmem:[%s4905_s4 + $0xc8] sm:$0xff] %vm2260_vm9, %v2656_v47  ;;  %v2548_v47 = vld [vmem:[%s4905_s4 + $0x198] sm:$0xff]  ;;  %v2614_v21 = vmul.f32 %v4324_v60, %v2547_v34  ;;  %v2679_v46 = vadd.f32 %v4342_v28, %v2612_v29 }
 0x351   : > { %2721 = vst.msk [vmem:[%s4905_s4 + $0xd0] sm:$0xff] %vm2260_vm9, %v2657_v43  ;;  %v2549_v43 = vld [vmem:[%s4905_s4 + $0x1a0] sm:$0xff]  ;;  %v2615_v10 = vmul.f32 %v4324_v60, %v2548_v47  ;;  %v2680_v37 = vadd.f32 %v4342_v28, %v2613_v51 }
 0x352   : > { %2722 = vst.msk [vmem:[%s4905_s4 + $0xd8] sm:$0xff] %vm2260_vm9, %v2658_v63  ;;  %v2550_v63 = vld [vmem:[%s4905_s4 + $0x1a8] sm:$0xff]  ;;  %v2616_v38 = vmul.f32 %v4324_v60, %v2549_v43 }
 0x353   : > { %2723 = vst.msk [vmem:[%s4905_s4 + $0xe0] sm:$0xff] %vm2260_vm9, %v2659_v54  ;;  %v2551_v54 = vld [vmem:[%s4905_s4 + $0x1b0] sm:$0xff]  ;;  %v2617_v6 = vmul.f32 %v4324_v60, %v2550_v63  ;;  %v2682_v18 = vadd.f32 %v4342_v28, %v2615_v10 }
 0x354   : > { %2724 = vst.msk [vmem:[%s4905_s4 + $0xe8] sm:$0xff] %vm2260_vm9, %v2660_v14  ;;  %v2552_v14 = vld [vmem:[%s4905_s4 + $0x1b8] sm:$0xff]  ;;  %v2618_v11 = vmul.f32 %v4324_v60, %v2551_v54  ;;  %v2683_v31 = vadd.f32 %v4342_v28, %v2616_v38 }
 0x355   : > { %2725 = vst.msk [vmem:[%s4905_s4 + $0xf0] sm:$0xff] %vm2260_vm9, %v2661_v7  ;;  %v2681_v7 = vadd.f32 %v4342_v28, %v2614_v21  ;;  %v2684_v33 = vadd.f32 %v4342_v28, %v2617_v6 }
 0x356   : > { %2726 = vst.msk [vmem:[%s4905_s4 + $0xf8] sm:$0xff] %vm2260_vm9, %v2662_v44  ;;  %v2619_v44 = vmul.f32 %v4324_v60, %v2552_v14  ;;  %v2685_v0 = vadd.f32 %v4342_v28, %v2618_v11 }
 0x357   : > { %2727 = vst.msk [vmem:[%s4905_s4 + $0x100] sm:$0xff] %vm2260_vm9, %v2663_v15  ;;  %v2620_v15 = vmul.f32 %v4324_v60, %v2553_v48 }
 0x358   : > { %2728 = vst.msk [vmem:[%s4905_s4 + $0x108] sm:$0xff] %vm2260_vm9, %v2664_v27  ;;  %v2621_v27 = vmul.f32 %v4324_v60, %v2554_v58  ;;  %v2686_v19 = vadd.f32 %v4342_v28, %v2619_v44 }
 0x359   : > { %2729 = vst.msk [vmem:[%s4905_s4 + $0x110] sm:$0xff] %vm2260_vm9, %v2665_v22  ;;  %v2622_v22 = vmul.f32 %v4324_v60, %v2555_v53  ;;  %v2687_v35 = vadd.f32 %v4342_v28, %v2620_v15 }
 0x35a   : > { %2730 = vst.msk [vmem:[%s4905_s4 + $0x118] sm:$0xff] %vm2260_vm9, %v2666_v13  ;;  %v2623_v13 = vmul.f32 %v4324_v60, %v2556_v45  ;;  %v2688_v30 = vadd.f32 %v4342_v28, %v2621_v27 }
 0x35b   : > { %2731 = vst.msk [vmem:[%s4905_s4 + $0x120] sm:$0xff] %vm2260_vm9, %v2667_v23  ;;  %v2624_v23 = vmul.f32 %v4324_v60, %v2557_v12  ;;  %v2692_v60 = vadd.f32 %v4342_v28, %v2625_v5 }
 0x35c   : > { %2732 = vst.msk [vmem:[%s4905_s4 + $0x128] sm:$0xff] %vm2260_vm9, %v2668_v32  ;;  %v2689_v32 = vadd.f32 %v4342_v28, %v2622_v22  ;;  %v2690_v2 = vadd.f32 %v4342_v28, %v2623_v13 }
 0x35d   : > { %2733 = vst.msk [vmem:[%s4905_s4 + $0x130] sm:$0xff] %vm2260_vm9, %v2669_v49  ;;  %v2691_v49 = vadd.f32 %v4342_v28, %v2624_v23 }
 0x35e   : > { %2734 = vst.msk [vmem:[%s4905_s4 + $0x138] sm:$0xff] %vm2260_vm9, %v2670_v52 }
 0x35f   : > { %2735 = vst.msk [vmem:[%s4905_s4 + $0x140] sm:$0xff] %vm2260_vm9, %v2671_v50 }
 0x360   : > { %2736 = vst.msk [vmem:[%s4905_s4 + $0x148] sm:$0xff] %vm2260_vm9, %v2672_v1 }
 0x361   : > { %2737 = vst.msk [vmem:[%s4905_s4 + $0x150] sm:$0xff] %vm2260_vm9, %v2673_v4 }
 0x362   : > { %2738 = vst.msk [vmem:[%s4905_s4 + $0x158] sm:$0xff] %vm2260_vm9, %v2674_v41 }
 0x363   : > { %2739 = vst.msk [vmem:[%s4905_s4 + $0x160] sm:$0xff] %vm2260_vm9, %v2675_v17 }
 0x364   : > { %2740 = vst.msk [vmem:[%s4905_s4 + $0x168] sm:$0xff] %vm2260_vm9, %v2676_v39 }
 0x365   : > { %2741 = vst.msk [vmem:[%s4905_s4 + $0x170] sm:$0xff] %vm2260_vm9, %v2677_v36 }
 0x366   : > { %2742 = vst.msk [vmem:[%s4905_s4 + $0x178] sm:$0xff] %vm2260_vm9, %v2678_v20 }
 0x367   : > { %2743 = vst.msk [vmem:[%s4905_s4 + $0x180] sm:$0xff] %vm2260_vm9, %v2679_v46 }
 0x368   : > { %2744 = vst.msk [vmem:[%s4905_s4 + $0x188] sm:$0xff] %vm2260_vm9, %v2680_v37 }
 0x369   : > { %2745 = vst.msk [vmem:[%s4905_s4 + $0x190] sm:$0xff] %vm2260_vm9, %v2681_v7 }
 0x36a   : > { %2746 = vst.msk [vmem:[%s4905_s4 + $0x198] sm:$0xff] %vm2260_vm9, %v2682_v18 }
 0x36b   : > { %2747 = vst.msk [vmem:[%s4905_s4 + $0x1a0] sm:$0xff] %vm2260_vm9, %v2683_v31 }
 0x36c   : > { %2748 = vst.msk [vmem:[%s4905_s4 + $0x1a8] sm:$0xff] %vm2260_vm9, %v2684_v33 }
 0x36d   : > { %2749 = vst.msk [vmem:[%s4905_s4 + $0x1b0] sm:$0xff] %vm2260_vm9, %v2685_v0 }
 0x36e   : > { %2750 = vst.msk [vmem:[%s4905_s4 + $0x1b8] sm:$0xff] %vm2260_vm9, %v2686_v19 }
 0x36f   : > { %2751 = vst.msk [vmem:[%s4905_s4 + $0x1c0] sm:$0xff] %vm2260_vm9, %v2687_v35 }
 0x370   : > { %2752 = vst.msk [vmem:[%s4905_s4 + $0x1c8] sm:$0xff] %vm2260_vm9, %v2688_v30 }
 0x371   : > { %2753 = vst.msk [vmem:[%s4905_s4 + $0x1d0] sm:$0xff] %vm2260_vm9, %v2689_v32 }
 0x372   : > { %2754 = vst.msk [vmem:[%s4905_s4 + $0x1d8] sm:$0xff] %vm2260_vm9, %v2690_v2 }
 0x373   : > { %2755 = vst.msk [vmem:[%s4905_s4 + $0x1e0] sm:$0xff] %vm2260_vm9, %v2691_v49 }
 0x374   : > { %2756 = vst.msk [vmem:[%s4905_s4 + $0x1e8] sm:$0xff] %vm2260_vm9, %v2692_v60 }
 0x375   : > { %2757 = vst.msk [vmem:[%s4905_s4 + $0x1f0] sm:$0xff] %vm2260_vm9, %v2693_v57 }
 0x376   : > { %2758 = vst.msk [vmem:[%s4905_s4 + $0x1f8] sm:$0xff] %vm2260_vm9, %v4630_v8 }
 0x377 PF: > { %s14_s15 = sadd.s32 1, %s3089_s15  }
 0x378   : > { %p11_p6 = scmp.ge.s32.totalorder %s14_s15, 4  }
 0x37a   :  { %13 = sbr.rel (!%p11_p6) target bundleno = 1 (0x1), region = 79 }

</bundles_post_ra>
